<compile_context>
chip_gen: v6e
topology: v6e:2x2x1
jax: 0.10.0
libtpu: 0.0.40
codegen_flags: <defaults>
</compile_context>

<pallas_src>
import functools
import math

import jax
import jax.numpy as jnp
from jax.experimental import pallas as pl
from jax.experimental.pallas import tpu as pltpu

BLK_R = 512          # sublane rows per block: (512, 128) f32 = 256 KiB / buffer
LANES = 128          # lane tile
PAD_TARGET = -1e30   # target sentinel marking padded elements (real targets are 0/1/ignore_label)


def _stats_kernel(score_ref, target_ref, mscore_ref, lsum_ref, vcnt_ref, *, ignore_label):
    """Pass 1: masked score (+inf where invalid/padded) + per-block partial sums
    for the global BCE loss sum and the valid-pixel count."""
    x = score_ref[...]
    t = target_ref[...]

    # binary_cross_entropy_with_logits (stable form): max(x,0) - x*t + log1p(exp(-|x|))
    loss = jnp.maximum(x, 0.0) - x * t + jnp.log1p(jnp.exp(-jnp.abs(x)))

    real = t != jnp.float32(PAD_TARGET)                   # excludes padding only
    valid = real & (t != jnp.float32(ignore_label))       # excludes padding + ignore pixels

    # sigmoid is strictly monotone -> sort/threshold in score space; no pred array.
    mscore_ref[...] = jnp.where(valid, x, jnp.inf)

    # Per-block partials folded to one (8, LANES) tile: no cross-grid-step
    # accumulator, so the grid axis can be "parallel" and the final reduce is a
    # tree reduce in the glue (better accuracy than one long running sum).
    lsum_ref[...] = jnp.where(real, loss, 0.0).reshape(BLK_R // 8, 8, LANES).sum(axis=0)
    vcnt_ref[...] = valid.astype(jnp.float32).reshape(BLK_R // 8, 8, LANES).sum(axis=0)


def _ohem_kernel(thr_ref, score_ref, target_ref, ksum_ref, kcnt_ref, *, ignore_label):
    """Pass 2: recompute per-pixel BCE loss (flops hidden under HBM traffic) and
    reduce sum/count of losses kept by the OHEM threshold (score space)."""
    thr = thr_ref[0]
    x = score_ref[...]
    t = target_ref[...]

    loss = jnp.maximum(x, 0.0) - x * t + jnp.log1p(jnp.exp(-jnp.abs(x)))
    valid = (t != jnp.float32(PAD_TARGET)) & (t != jnp.float32(ignore_label))
    keep = valid & (x < thr)

    ksum_ref[...] = jnp.where(keep, loss, 0.0).reshape(BLK_R // 8, 8, LANES).sum(axis=0)
    kcnt_ref[...] = keep.astype(jnp.float32).reshape(BLK_R // 8, 8, LANES).sum(axis=0)


def binary_ohem_cross_entropy(score, target, *, ignore_label=255, thresh=0.7,
                              min_kept=100000, loss_weight=1.0):
    min_kept = max(1, min_kept)
    n_total = int(score.size)

    # Pad to a whole number of (BLK_R, LANES) blocks.
    pad = (-n_total) % (BLK_R * LANES)
    total_p = n_total + pad
    rows = total_p // LANES
    grid_n = rows // BLK_R

    score2d = jnp.pad(score.reshape(-1).astype(jnp.float32), (0, pad)).reshape(rows, LANES)
    target2d = jnp.pad(target.reshape(-1).astype(jnp.float32), (0, pad),
                       constant_values=PAD_TARGET).reshape(rows, LANES)

    blk = pl.BlockSpec((BLK_R, LANES), lambda i: (i, 0))
    part = pl.BlockSpec((8, LANES), lambda i: (i, 0))

    # ---- pass 1: masked score + global partials ----------------------------
    mscore2d, lsum_part, vcnt_part = pl.pallas_call(
        functools.partial(_stats_kernel, ignore_label=float(ignore_label)),
        out_shape=(
            jax.ShapeDtypeStruct((rows, LANES), jnp.float32),        # masked score (+inf invalid)
            jax.ShapeDtypeStruct((grid_n * 8, LANES), jnp.float32),  # per-block loss sums
            jax.ShapeDtypeStruct((grid_n * 8, LANES), jnp.float32),  # per-block valid counts
        ),
        grid_spec=pltpu.PrefetchScalarGridSpec(
            num_scalar_prefetch=0, grid=(grid_n,),
            in_specs=[blk, blk],
            out_specs=[blk, part, part]),
        compiler_params=pltpu.CompilerParams(dimension_semantics=("parallel",)),
    )(score2d, target2d)

    loss_sum = jnp.sum(lsum_part)
    n_valid = jnp.sum(vcnt_part).astype(jnp.int32)

    # ---- glue: k-th smallest valid score -> OHEM threshold -----------------
    # TODO(synk): exact data-dependent order-statistic selection stays in plain
    # JAX (lax.top_k); a histogram fused into pass 1 would remove this N-sized
    # pass but yields a bin-quantized threshold, changing reference semantics.
    k_static = int(min(min_kept + 1, total_p))
    neg_sorted, _ = jax.lax.top_k(-mscore2d.reshape(-1), k_static)   # = -(ascending masked scores)
    k_dyn = jnp.clip(jnp.minimum(jnp.int32(min_kept), n_valid - 1), 0, k_static - 1)
    min_value_score = -neg_sorted[k_dyn]

    # pred < max(pred_k, thresh)  <=>  score < max(score_k, logit(thresh))
    # (exact up to f32 sigmoid rounding ties in the torch reference).
    if thresh <= 0.0:
        logit_thresh = -float("inf")
    elif thresh >= 1.0:
        logit_thresh = float("inf")
    else:
        logit_thresh = math.log(thresh / (1.0 - thresh))
    thr = jnp.maximum(min_value_score, jnp.float32(logit_thresh)).reshape(1).astype(jnp.float32)

    # ---- pass 2: masked reduction of kept losses ----------------------------
    blk_p = pl.BlockSpec((BLK_R, LANES), lambda i, thr_ref: (i, 0))
    part_p = pl.BlockSpec((8, LANES), lambda i, thr_ref: (i, 0))

    ksum_part, kcnt_part = pl.pallas_call(
        functools.partial(_ohem_kernel, ignore_label=float(ignore_label)),
        out_shape=(
            jax.ShapeDtypeStruct((grid_n * 8, LANES), jnp.float32),
            jax.ShapeDtypeStruct((grid_n * 8, LANES), jnp.float32),
        ),
        grid_spec=pltpu.PrefetchScalarGridSpec(
            num_scalar_prefetch=1, grid=(grid_n,),
            in_specs=[blk_p, blk_p],
            out_specs=[part_p, part_p]),
        compiler_params=pltpu.CompilerParams(dimension_semantics=("parallel",)),
    )(thr, score2d, target2d)

    kept_sum = jnp.sum(ksum_part)
    kept_cnt = jnp.sum(kcnt_part)

    loss_ce = loss_sum / jnp.float32(n_total)      # BCEWithLogitsLoss mean over ALL pixels (incl. ignore)
    ohem_mean = kept_sum / kept_cnt                # NaN if nothing kept (matches torch .mean() of empty)
    result = 0.5 * loss_ce + 0.5 * jnp.float32(loss_weight) * ohem_mean
    # torch returns 0.0 when there are no valid (non-ignored) pixels at all
    return jnp.where(n_valid > 0, result, jnp.float32(0.0))


if __name__ == "__main__":
    key = jax.random.PRNGKey(0)
    k1, k2, k3 = jax.random.split(key, 3)

    shape = (2, 4, 16, 16)  # NCHW, same convention as the PyTorch module
    score = jax.random.normal(k1, shape, dtype=jnp.float32)
    target_bits = jax.random.bernoulli(k2, 0.5, shape).astype(jnp.float32)
    ignore_mask = jax.random.bernoulli(k3, 0.1, shape)
    target = jnp.where(ignore_mask, jnp.float32(255.0), target_bits)

    out = binary_ohem_cross_entropy(score, target,
                                    ignore_label=255, thresh=0.7,
                                    min_kept=100000, loss_weight=1.0)
    jax.block_until_ready(out)
    print("KERNEL_OK")
</pallas_src>

<mosaic_0001>
module attributes {stable_mosaic.version = 11 : i64} {
  func.func @_stats_kernel(%arg0: i32, %arg1: memref<512x128xf32, #tpu.memory_space<vmem>>, %arg2: memref<512x128xf32, #tpu.memory_space<vmem>>, %arg3: memref<512x128xf32, #tpu.memory_space<vmem>>, %arg4: memref<8x128xf32, #tpu.memory_space<vmem>>, %arg5: memref<8x128xf32, #tpu.memory_space<vmem>>) attributes {dimension_semantics = [#tpu.dimension_semantics<parallel>], iteration_bounds = array<i64: 1>, scalar_prefetch = 0 : i64, scratch_operands = 0 : i64, tpu.core_type = #tpu.core_type<tc>, window_params = [{transform_indices = @transform_0, window_bounds = array<i64: 512, 128>}, {transform_indices = @transform_1, window_bounds = array<i64: 512, 128>}, {transform_indices = @transform_2, window_bounds = array<i64: 512, 128>}, {transform_indices = @transform_3, window_bounds = array<i64: 8, 128>}, {transform_indices = @transform_4, window_bounds = array<i64: 8, 128>}]} {
    %c0 = arith.constant 0 : index
    %c0_0 = arith.constant 0 : index
    %0 = vector.load %arg1[%c0, %c0_0] : memref<512x128xf32, #tpu.memory_space<vmem>>, vector<512x128xf32>
    %c0_1 = arith.constant 0 : index
    %c0_2 = arith.constant 0 : index
    %1 = vector.load %arg2[%c0_1, %c0_2] : memref<512x128xf32, #tpu.memory_space<vmem>>, vector<512x128xf32>
    %cst = arith.constant 0.000000e+00 : f32
    %2 = vector.broadcast %cst : f32 to vector<512x128xf32>
    %3 = arith.maximumf %0, %2 : vector<512x128xf32>
    %4 = arith.mulf %0, %1 : vector<512x128xf32>
    %5 = arith.subf %3, %4 : vector<512x128xf32>
    %6 = math.absf %0 : vector<512x128xf32>
    %cst_3 = arith.constant 0.000000e+00 : f32
    %7 = vector.broadcast %cst_3 : f32 to vector<512x128xf32>
    %8 = arith.subf %7, %6 : vector<512x128xf32>
    %9 = math.exp %8 : vector<512x128xf32>
    %10 = math.log1p %9 : vector<512x128xf32>
    %11 = arith.addf %5, %10 : vector<512x128xf32>
    %cst_4 = arith.constant -1.000000e+30 : f32
    %12 = vector.broadcast %cst_4 : f32 to vector<512x128xf32>
    %13 = arith.cmpf one, %1, %12 : vector<512x128xf32>
    %cst_5 = arith.constant 2.550000e+02 : f32
    %14 = vector.broadcast %cst_5 : f32 to vector<512x128xf32>
    %15 = arith.cmpf one, %1, %14 : vector<512x128xf32>
    %16 = arith.andi %13, %15 : vector<512x128xi1>
    %cst_6 = arith.constant 0x7F800000 : f32
    %17 = vector.broadcast %cst_6 : f32 to vector<512x128xf32>
    %18 = arith.select %16, %0, %17 : vector<512x128xi1>, vector<512x128xf32>
    %c0_7 = arith.constant 0 : index
    %c0_8 = arith.constant 0 : index
    %19 = vector.load %arg3[%c0_7, %c0_8] : memref<512x128xf32, #tpu.memory_space<vmem>>, vector<512x128xf32>
    tpu.vector_store %arg3[%c0_7, %c0_8], %18 {strides = array<i32>} : memref<512x128xf32, #tpu.memory_space<vmem>>, vector<512x128xf32>,
    %cst_9 = arith.constant 0.000000e+00 : f32
    %20 = vector.broadcast %cst_9 : f32 to vector<512x128xf32>
    %21 = arith.select %13, %11, %20 : vector<512x128xi1>, vector<512x128xf32>
    %22 = vector.shape_cast %21 : vector<512x128xf32> to vector<64x8x128xf32>
    %cst_10 = arith.constant dense<0.000000e+00> : vector<8x128xf32>
    %23 = vector.multi_reduction <add>, %22, %cst_10 [0] : vector<64x8x128xf32> to vector<8x128xf32>
    %c0_11 = arith.constant 0 : index
    %c0_12 = arith.constant 0 : index
    %24 = vector.load %arg4[%c0_11, %c0_12] : memref<8x128xf32, #tpu.memory_space<vmem>>, vector<8x128xf32>
    tpu.vector_store %arg4[%c0_11, %c0_12], %23 {strides = array<i32>} : memref<8x128xf32, #tpu.memory_space<vmem>>, vector<8x128xf32>,
    %25 = arith.extui %16 : vector<512x128xi1> to vector<512x128xi32>
    %26 = arith.sitofp %25 : vector<512x128xi32> to vector<512x128xf32>
    %27 = vector.shape_cast %26 : vector<512x128xf32> to vector<64x8x128xf32>
    %cst_13 = arith.constant dense<0.000000e+00> : vector<8x128xf32>
    %28 = vector.multi_reduction <add>, %27, %cst_13 [0] : vector<64x8x128xf32> to vector<8x128xf32>
    %c0_14 = arith.constant 0 : index
    %c0_15 = arith.constant 0 : index
    %29 = vector.load %arg5[%c0_14, %c0_15] : memref<8x128xf32, #tpu.memory_space<vmem>>, vector<8x128xf32>
    tpu.vector_store %arg5[%c0_14, %c0_15], %28 {strides = array<i32>} : memref<8x128xf32, #tpu.memory_space<vmem>>, vector<8x128xf32>,
    return
  }
  func.func @transform_0(%arg0: i32) -> (i32, i32) {
    %c0_i32 = arith.constant 0 : i32
    %c0_i32_0 = arith.constant 0 : i32
    return %arg0, %c0_i32 : i32, i32
  }
  func.func @transform_1(%arg0: i32) -> (i32, i32) {
    %c0_i32 = arith.constant 0 : i32
    %c0_i32_0 = arith.constant 0 : i32
    return %arg0, %c0_i32 : i32, i32
  }
  func.func @transform_2(%arg0: i32) -> (i32, i32) {
    %c0_i32 = arith.constant 0 : i32
    %c0_i32_0 = arith.constant 0 : i32
    return %arg0, %c0_i32 : i32, i32
  }
  func.func @transform_3(%arg0: i32) -> (i32, i32) {
    %c0_i32 = arith.constant 0 : i32
    %c0_i32_0 = arith.constant 0 : i32
    return %arg0, %c0_i32 : i32, i32
  }
  func.func @transform_4(%arg0: i32) -> (i32, i32) {
    %c0_i32 = arith.constant 0 : i32
    %c0_i32_0 = arith.constant 0 : i32
    return %arg0, %c0_i32 : i32, i32
  }
}

</mosaic_0001>

<bundles_post_ra>
// kernel: tpu_custom_call.1
= control target key start
LH: loop header
LB: loop body
LE: loop exit
PB: predicated region body
PF: predicated region fallthrough
CT: control target
= control target key end

     0   :  { %10 = vsyncpa [#allocation3], 0  ;;  %s6509_s0 = inlined_call_operand.hbm [shape: f32[512,128], index: 0, kind: input, shape index: {}]   ;;  %s6510_s1 = inlined_call_operand.hbm [shape: f32[512,128], index: 1, kind: input, shape index: {}]   ;;  %s6511_s2 = inlined_call_operand.hbm [shape: f32[512,128], index: 2, kind: output, shape index: {0}]   ;;  %s6512_s3 = inlined_call_operand.hbm [shape: f32[8,128], index: 3, kind: output, shape index: {1}]   ;;  %s6513_s4 = inlined_call_operand.hbm [shape: f32[8,128], index: 4, kind: output, shape index: {2}]  }
   0x1   :  { %11 = vsyncpa [#allocation6], 0 }
   0x2   :  { %12 = vsyncpa [#allocation4], 0 }
   0x3   :  { %13 = vsyncpa [#allocation9], 0  ;;  %s2509_s15 = smov [#allocation2]  }
   0x4   :  { %s19_s16 = sshll.u32 %s2509_s15, 4  ;;  %s20_s16 = int_to_ptr.vmem [resolvable:$true] %s19_s16 }
   0x5   :  { %s2409_s17 = scalar_lea.vmem %s20_s16, 8192  ;;  %p2414_p1 = scmp.lt.s32.totalorder %s20_s16, %s20_s16 }
   0x6   :  { %p2410_p0 = scmp.ne.s32.totalorder %s20_s16, %s2409_s17  ;;  %p2415_p2 = scmp.lt.s32.totalorder %s2409_s17, %s2409_s17 }
   0x8   :  { %p2416_p3 = por %p2415_p2, %p2414_p1 }
   0xa   :  { %p2417_p4 = pnand %p2416_p3, %p2410_p0 }
   0xc   :  { %2420 = shalt.err (!%p2417_p4)
}
   0xd   :  { %s2510_s18 = smov 128   ;;  %s2511_s19 = smov 8  }
   0xe   :  { %25 = dma.hbm_to_vmem [thread:$0]  %s6509_s0, 8192, %s20_s16, [#allocation3], %s2510_s18, %s2510_s18, %s2511_s19  }
   0xf   :  { %s2512_s22 = smov [#allocation5]  }
  0x10   :  { %s31_s23 = sshll.u32 %s2512_s22, 4  ;;  %s32_s23 = int_to_ptr.vmem [resolvable:$true] %s31_s23 }
  0x11   :  { %s2429_s24 = scalar_lea.vmem %s32_s23, 8192  ;;  %p2434_p6 = scmp.lt.s32.totalorder %s32_s23, %s32_s23 }
  0x12   :  { %p2430_p5 = scmp.ne.s32.totalorder %s32_s23, %s2429_s24  ;;  %p2435_p7 = scmp.lt.s32.totalorder %s2429_s24, %s2429_s24 }
  0x14   :  { %p2436_p8 = por %p2435_p7, %p2434_p6 }
  0x16   :  { %p2437_p9 = pnand %p2436_p8, %p2430_p5 }
  0x18   :  { %2440 = shalt.err (!%p2437_p9)
}
  0x19   :  { %37 = dma.hbm_to_vmem [thread:$0]  %s6510_s1, 8192, %s32_s23, [#allocation6], %s2510_s18, %s2510_s18, %s2511_s19  }
  0x1a   :  { %2501 = dma.done.wait [#allocation3], 8192  }
  0x1b   :  { %2502 = vsyncadd [#allocation3], 4294959104 }
  0x1c   :  { %2503 = dma.done.wait [#allocation6], 8192  }
  0x1d   :  { %2504 = vsyncadd [#allocation6], 4294959104  ;;  %v2554_v0 = vld [vmem:[#allocation2] sm:$0xff]  ;;  %v2556_v1 = vld [vmem:[#allocation2 + $0x8] sm:$0xff]  ;;  %s2514_s0 = smov [#allocation7]  }
  0x1e   :  { %6926 = vst [vmem:[#allocation15_spill] sm:$0xff] %v2554_v0  ;;  %6927 = vst [vmem:[#allocation16_spill] sm:$0xff] %v2556_v1  ;;  %v2558_v2 = vld [vmem:[#allocation2 + $0x10] sm:$0xff]  ;;  %v2560_v3 = vld [vmem:[#allocation2 + $0x18] sm:$0xff]  ;;  %s1905_s1 = sshll.u32 %s2514_s0, 4  ;;  %s1906_s1 = int_to_ptr.vmem [resolvable:$true] %s1905_s1 }
  0x1f   :  { %6928 = vst [vmem:[#allocation17_spill] sm:$0xff] %v2558_v2  ;;  %6929 = vst [vmem:[#allocation18_spill] sm:$0xff] %v2560_v3  ;;  %v2562_v4 = vld [vmem:[#allocation2 + $0x20] sm:$0xff]  ;;  %v2564_v5 = vld [vmem:[#allocation2 + $0x28] sm:$0xff]  ;;  %s2441_s27 = scalar_lea.vmem %s1906_s1, 8192  ;;  %p2446_p11 = scmp.lt.s32.totalorder %s1906_s1, %s1906_s1 }
  0x20   :  { %6930 = vst [vmem:[#allocation19_spill] sm:$0xff] %v2562_v4  ;;  %6931 = vst [vmem:[#allocation20_spill] sm:$0xff] %v2564_v5  ;;  %v2566_v6 = vld [vmem:[#allocation2 + $0x30] sm:$0xff]  ;;  %v2568_v7 = vld [vmem:[#allocation2 + $0x38] sm:$0xff]  ;;  %p2442_p10 = scmp.ne.s32.totalorder %s1906_s1, %s2441_s27  ;;  %p2447_p12 = scmp.lt.s32.totalorder %s2441_s27, %s2441_s27 }
  0x21   :  { %6932 = vst [vmem:[#allocation21_spill] sm:$0xff] %v2566_v6  ;;  %6933 = vst [vmem:[#allocation22_spill] sm:$0xff] %v2568_v7  ;;  %v2570_v8 = vld [vmem:[#allocation2 + $0x40] sm:$0xff]  ;;  %v2572_v9 = vld [vmem:[#allocation2 + $0x48] sm:$0xff] }
  0x22   :  { %6934 = vst [vmem:[#allocation23_spill] sm:$0xff] %v2570_v8  ;;  %6935 = vst [vmem:[#allocation24_spill] sm:$0xff] %v2572_v9  ;;  %v2574_v10 = vld [vmem:[#allocation2 + $0x50] sm:$0xff]  ;;  %v2576_v11 = vld [vmem:[#allocation2 + $0x58] sm:$0xff]  ;;  %p2448_p13 = por %p2447_p12, %p2446_p11 }
  0x23   :  { %6936 = vst [vmem:[#allocation25_spill] sm:$0xff] %v2574_v10  ;;  %6937 = vst [vmem:[#allocation26_spill] sm:$0xff] %v2576_v11  ;;  %v2581_v15 = vld [vmem:[#allocation2 + $0x60] sm:$0xff]  ;;  %v2583_v16 = vld [vmem:[#allocation2 + $0x68] sm:$0xff] }
  0x24   :  { %6938 = vst [vmem:[#allocation27_spill] sm:$0xff] %v2581_v15  ;;  %6939 = vst [vmem:[#allocation28_spill] sm:$0xff] %v2583_v16  ;;  %v2585_v17 = vld [vmem:[#allocation2 + $0x70] sm:$0xff]  ;;  %v2590_v21 = vld [vmem:[#allocation2 + $0x78] sm:$0xff]  ;;  %p2449_p0 = pnand %p2448_p13, %p2442_p10 }
  0x25   :  { %6940 = vst [vmem:[#allocation29_spill] sm:$0xff] %v2585_v17  ;;  %v2592_v22 = vld [vmem:[#allocation2 + $0x80] sm:$0xff]  ;;  %v2594_v23 = vld [vmem:[#allocation2 + $0x88] sm:$0xff]  ;;  %v2599_v27 = vld [vmem:[#allocation2 + $0x90] sm:$0xff] }
  0x26   :  { %6941 = vst [vmem:[#allocation30_spill] sm:$0xff] %v2594_v23  ;;  %v2601_v28 = vld [vmem:[#allocation2 + $0x98] sm:$0xff]  ;;  %v2603_v29 = vld [vmem:[#allocation2 + $0xa0] sm:$0xff]  ;;  %v2608_v33 = vld [vmem:[#allocation2 + $0xa8] sm:$0xff] }
  0x27   :  { %6942 = vst [vmem:[#allocation31_spill] sm:$0xff] %v2601_v28  ;;  %6943 = vst [vmem:[#allocation32_spill] sm:$0xff] %v2603_v29  ;;  %v2610_v34 = vld [vmem:[#allocation2 + $0xb0] sm:$0xff]  ;;  %v2612_v35 = vld [vmem:[#allocation2 + $0xb8] sm:$0xff] }
  0x28   :  { %6944 = vst [vmem:[#allocation33_spill] sm:$0xff] %v2612_v35  ;;  %v2617_v39 = vld [vmem:[#allocation2 + $0xc0] sm:$0xff]  ;;  %v2619_v40 = vld [vmem:[#allocation2 + $0xc8] sm:$0xff]  ;;  %v2621_v41 = vld [vmem:[#allocation2 + $0xd0] sm:$0xff] }
  0x29   :  { %6945 = vst [vmem:[#allocation34_spill] sm:$0xff] %v2621_v41  ;;  %v2626_v45 = vld [vmem:[#allocation2 + $0xd8] sm:$0xff]  ;;  %v2628_v46 = vld [vmem:[#allocation2 + $0xe0] sm:$0xff]  ;;  %v2630_v47 = vld [vmem:[#allocation2 + $0xe8] sm:$0xff] }
  0x2a   :  { %6946 = vst [vmem:[#allocation35_spill] sm:$0xff] %v2630_v47  ;;  %v2635_v51 = vld [vmem:[#allocation2 + $0xf0] sm:$0xff]  ;;  %v2637_v52 = vld [vmem:[#allocation2 + $0xf8] sm:$0xff]  ;;  %v2639_v53 = vld [vmem:[#allocation2 + $0x100] sm:$0xff] }
  0x2b   :  { %6947 = vst [vmem:[#allocation36_spill] sm:$0xff] %v2635_v51  ;;  %6948 = vst [vmem:[#allocation37_spill] sm:$0xff] %v2637_v52  ;;  %v2644_v57 = vld [vmem:[#allocation2 + $0x108] sm:$0xff]  ;;  %v2646_v58 = vld [vmem:[#allocation2 + $0x110] sm:$0xff] }
  0x2c   :  { %6949 = vst [vmem:[#allocation38_spill] sm:$0xff] %v2639_v53  ;;  %6950 = vst [vmem:[#allocation39_spill] sm:$0xff] %v2644_v57  ;;  %v2648_v59 = vld [vmem:[#allocation2 + $0x118] sm:$0xff]  ;;  %v2653_v63 = vld [vmem:[#allocation2 + $0x120] sm:$0xff] }
  0x2d   :  { %6951 = vst [vmem:[#allocation40_spill] sm:$0xff] %v2646_v58  ;;  %6952 = vst [vmem:[#allocation41_spill] sm:$0xff] %v2648_v59  ;;  %v2655_v50 = vld [vmem:[#allocation2 + $0x128] sm:$0xff]  ;;  %v2657_v54 = vld [vmem:[#allocation2 + $0x130] sm:$0xff] }
  0x2e   :  { %6953 = vst [vmem:[#allocation42_spill] sm:$0xff] %v2653_v63  ;;  %6954 = vst [vmem:[#allocation43_spill] sm:$0xff] %v2655_v50  ;;  %v2662_v48 = vld [vmem:[#allocation2 + $0x138] sm:$0xff]  ;;  %v2664_v44 = vld [vmem:[#allocation2 + $0x140] sm:$0xff] }
  0x2f   :  { %6955 = vst [vmem:[#allocation44_spill] sm:$0xff] %v2657_v54  ;;  %6956 = vst [vmem:[#allocation45_spill] sm:$0xff] %v2662_v48  ;;  %v2666_v60 = vld [vmem:[#allocation2 + $0x148] sm:$0xff]  ;;  %v2671_v42 = vld [vmem:[#allocation2 + $0x150] sm:$0xff] }
  0x30   :  { %6957 = vst [vmem:[#allocation46_spill] sm:$0xff] %v2664_v44  ;;  %6958 = vst [vmem:[#allocation47_spill] sm:$0xff] %v2666_v60  ;;  %v2673_v38 = vld [vmem:[#allocation2 + $0x158] sm:$0xff]  ;;  %v2675_v56 = vld [vmem:[#allocation2 + $0x160] sm:$0xff] }
  0x31   :  { %6959 = vst [vmem:[#allocation48_spill] sm:$0xff] %v2671_v42  ;;  %6960 = vst [vmem:[#allocation49_spill] sm:$0xff] %v2673_v38  ;;  %v2680_v36 = vld [vmem:[#allocation2 + $0x168] sm:$0xff]  ;;  %v2682_v32 = vld [vmem:[#allocation2 + $0x170] sm:$0xff] }
  0x32   :  { %6961 = vst [vmem:[#allocation50_spill] sm:$0xff] %v2675_v56  ;;  %6962 = vst [vmem:[#allocation51_spill] sm:$0xff] %v2680_v36  ;;  %v2684_v62 = vld [vmem:[#allocation2 + $0x178] sm:$0xff]  ;;  %v2689_v30 = vld [vmem:[#allocation2 + $0x180] sm:$0xff] }
  0x33   :  { %6963 = vst [vmem:[#allocation52_spill] sm:$0xff] %v2682_v32  ;;  %6964 = vst [vmem:[#allocation53_spill] sm:$0xff] %v2684_v62  ;;  %v2691_v26 = vld [vmem:[#allocation2 + $0x188] sm:$0xff]  ;;  %v2693_v49 = vld [vmem:[#allocation2 + $0x190] sm:$0xff] }
  0x34   :  { %6965 = vst [vmem:[#allocation54_spill] sm:$0xff] %v2689_v30  ;;  %6966 = vst [vmem:[#allocation55_spill] sm:$0xff] %v2691_v26  ;;  %v2698_v24 = vld [vmem:[#allocation2 + $0x198] sm:$0xff]  ;;  %v2700_v20 = vld [vmem:[#allocation2 + $0x1a0] sm:$0xff] }
  0x35   :  { %6967 = vst [vmem:[#allocation56_spill] sm:$0xff] %v2693_v49  ;;  %6968 = vst [vmem:[#allocation57_spill] sm:$0xff] %v2698_v24  ;;  %v2702_v43 = vld [vmem:[#allocation2 + $0x1a8] sm:$0xff]  ;;  %v2707_v18 = vld [vmem:[#allocation2 + $0x1b0] sm:$0xff] }
  0x36   :  { %6969 = vst [vmem:[#allocation58_spill] sm:$0xff] %v2700_v20  ;;  %6970 = vst [vmem:[#allocation59_spill] sm:$0xff] %v2702_v43  ;;  %v2709_v14 = vld [vmem:[#allocation2 + $0x1b8] sm:$0xff]  ;;  %v2711_v37 = vld [vmem:[#allocation2 + $0x1c0] sm:$0xff] }
  0x37   :  { %6971 = vst [vmem:[#allocation60_spill] sm:$0xff] %v2707_v18  ;;  %6972 = vst [vmem:[#allocation61_spill] sm:$0xff] %v2709_v14  ;;  %v2716_v12 = vld [vmem:[#allocation2 + $0x1c8] sm:$0xff]  ;;  %v2718_v60 = vld [vmem:[#allocation2 + $0x1d0] sm:$0xff] }
  0x38   :  { %6973 = vst [vmem:[#allocation62_spill] sm:$0xff] %v2711_v37  ;;  %6974 = vst [vmem:[#allocation63_spill] sm:$0xff] %v2716_v12  ;;  %v2720_v31 = vld [vmem:[#allocation2 + $0x1d8] sm:$0xff]  ;;  %v108_v61 = vld [vmem:[#allocation5] sm:$0xff] }
  0x39   :  { %6975 = vst [vmem:[#allocation64_spill] sm:$0xff] %v2718_v60  ;;  %6976 = vst [vmem:[#allocation65_spill] sm:$0xff] %v2720_v31  ;;  %v2725_v42 = vld [vmem:[#allocation2 + $0x1e0] sm:$0xff]  ;;  %v2727_v25 = vld [vmem:[#allocation2 + $0x1e8] sm:$0xff]  ;;  %v236_v43 = vmul.f32 %v108_v61, %v2554_v0 }
  0x3a   :  { %6977 = vst [vmem:[#allocation66_spill] sm:$0xff] %v2725_v42  ;;  %6978 = vst [vmem:[#allocation67_spill] sm:$0xff] %v2727_v25  ;;  %v109_v55 = vld [vmem:[#allocation5 + $0x8] sm:$0xff]  ;;  %v2732_v36 = vld [vmem:[#allocation2 + $0x1f0] sm:$0xff] }
  0x3b   :  { %6979 = vst [vmem:[#allocation68_spill] sm:$0xff] %v2732_v36  ;;  %v2734_v44 = vld [vmem:[#allocation2 + $0x1f8] sm:$0xff]  ;;  %v110_v19 = vld [vmem:[#allocation5 + $0x10] sm:$0xff]  ;;  %v112_v30 = vld [vmem:[#allocation5 + $0x20] sm:$0xff]  ;;  %v237_v37 = vmul.f32 %v109_v55, %v2556_v1 }
  0x3c   :  { %6980 = vst [vmem:[#allocation69_spill] sm:$0xff] %v2734_v44  ;;  %v111_v26 = vld [vmem:[#allocation5 + $0x18] sm:$0xff]  ;;  %v113_v48 = vld [vmem:[#allocation5 + $0x28] sm:$0xff]  ;;  %v114_v20 = vld [vmem:[#allocation5 + $0x30] sm:$0xff]  ;;  %v238_v32 = vmul.f32 %v110_v19, %v2558_v2  ;;  %v240_v38 = vmul.f32 %v112_v30, %v2562_v4  ;;  %v6981_v44 = vmax.f32 %v2554_v0, 0.0 }
  0x3d   :  { %v115_v24 = vld [vmem:[#allocation5 + $0x38] sm:$0xff]  ;;  %v116_v54 = vld [vmem:[#allocation5 + $0x40] sm:$0xff]  ;;  %v117_v14 = vld [vmem:[#allocation5 + $0x48] sm:$0xff]  ;;  %v239_v56 = vmul.f32 %v111_v26, %v2560_v3  ;;  %v241_v49 = vmul.f32 %v113_v48, %v2564_v5  ;;  %v242_v62 = vmul.f32 %v114_v20, %v2566_v6  ;;  %v6983_v20 = vmax.f32 %v2556_v1, 0.0 }
  0x3e   :  { %v118_v18 = vld [vmem:[#allocation5 + $0x50] sm:$0xff]  ;;  %v119_v13 = vld [vmem:[#allocation5 + $0x58] sm:$0xff]  ;;  %v120_v31 = vld [vmem:[#allocation5 + $0x60] sm:$0xff]  ;;  %v243_v19 = vmul.f32 %v115_v24, %v2568_v7  ;;  %v244_v61 = vmul.f32 %v116_v54, %v2570_v8  ;;  %v2759_v50 = vsub.f32 %v6981_v44, %v236_v43  ;;  %v245_v48 = vmul.f32 %v117_v14, %v2572_v9 }
  0x3f   :  { %v121_v60 = vld [vmem:[#allocation5 + $0x68] sm:$0xff]  ;;  %v122_v12 = vld [vmem:[#allocation5 + $0x70] sm:$0xff]  ;;  %v123_v36 = vld [vmem:[#allocation5 + $0x78] sm:$0xff]  ;;  %v2763_v55 = vmul.f32 %v118_v18, %v2574_v10  ;;  %v2766_v59 = vmul.f32 %v119_v13, %v2576_v11  ;;  %v2770_v24 = vsub.f32 %v6983_v20, %v237_v37  ;;  %v2773_v43 = vmul.f32 %v120_v31, %v2581_v15 }
  0x40   :  { %v124_v25 = vld [vmem:[#allocation5 + $0x80] sm:$0xff]  ;;  %v125_v42 = vld [vmem:[#allocation5 + $0x88] sm:$0xff]  ;;  %6982 = vst [vmem:[#allocation70_spill] sm:$0xff] %v2759_v50  ;;  %v126_v26 = vld [vmem:[#allocation5 + $0x90] sm:$0xff]  ;;  %v2776_v44 = vmul.f32 %v121_v60, %v2583_v16  ;;  %v2779_v14 = vmul.f32 %v122_v12, %v2585_v17  ;;  %v6985_v18 = vmax.f32 %v2558_v2, 0.0  ;;  %v2786_v20 = vmul.f32 %v123_v36, %v2590_v21 }
  0x41   :  { %v127_v63 = vld [vmem:[#allocation5 + $0x98] sm:$0xff]  ;;  %v128_v30 = vld [vmem:[#allocation5 + $0xa0] sm:$0xff]  ;;  %6984 = vst [vmem:[#allocation71_spill] sm:$0xff] %v2770_v24  ;;  %v129_v54 = vld [vmem:[#allocation5 + $0xa8] sm:$0xff]  ;;  %v2789_v24 = vmul.f32 %v124_v25, %v2592_v22  ;;  %v2792_v31 = vmul.f32 %v125_v42, %v2594_v23  ;;  %v6987_v60 = vmax.f32 %v2560_v3, 0.0  ;;  %v6989_v25 = vmax.f32 %v2562_v4, 0.0 }
  0x42   :  { %v130_v58 = vld [vmem:[#allocation5 + $0xb0] sm:$0xff]  ;;  %v131_v0 = vld [vmem:[#allocation5 + $0xb8] sm:$0xff]  ;;  %v2783_v13 = vsub.f32 %v6985_v18, %v238_v32  ;;  %v132_v50 = vld [vmem:[#allocation5 + $0xc0] sm:$0xff]  ;;  %v2799_v18 = vmul.f32 %v126_v26, %v2599_v27  ;;  %v2805_v36 = vmul.f32 %v128_v30, %v2603_v29 }
  0x43   :  { %v133_v1 = vld [vmem:[#allocation5 + $0xc8] sm:$0xff]  ;;  %v134_v37 = vld [vmem:[#allocation5 + $0xd0] sm:$0xff]  ;;  %v2796_v12 = vsub.f32 %v6987_v60, %v239_v56  ;;  %v135_v17 = vld [vmem:[#allocation5 + $0xd8] sm:$0xff]  ;;  %v2809_v42 = vsub.f32 %v6989_v25, %v240_v38  ;;  %v2812_v60 = vmul.f32 %v129_v54, %v2608_v33  ;;  %v2818_v26 = vmul.f32 %v131_v0, %v2612_v35 }
  0x44   :  { %6986 = vst [vmem:[#allocation72_spill] sm:$0xff] %v2783_v13  ;;  %v136_v2 = vld [vmem:[#allocation5 + $0xe0] sm:$0xff]  ;;  %v137_v32 = vld [vmem:[#allocation5 + $0xe8] sm:$0xff]  ;;  %v2802_v13 = vmul.f32 %v127_v63, %v2601_v28  ;;  %v138_v23 = vld [vmem:[#allocation5 + $0xf0] sm:$0xff]  ;;  %v6991_v63 = vmax.f32 %v2564_v5, 0.0  ;;  %v2825_v25 = vmul.f32 %v132_v50, %v2617_v39  ;;  %v2831_v54 = vmul.f32 %v134_v37, %v2621_v41 }
  0x45   :  { %6988 = vst [vmem:[#allocation73_spill] sm:$0xff] %v2796_v12  ;;  %6990 = vst [vmem:[#allocation74_spill] sm:$0xff] %v2809_v42  ;;  %v139_v3 = vld [vmem:[#allocation5 + $0xf8] sm:$0xff]  ;;  %v140_v56 = vld [vmem:[#allocation5 + $0x100] sm:$0xff]  ;;  %v2815_v12 = vmul.f32 %v130_v58, %v2610_v34  ;;  %v2828_v42 = vmul.f32 %v133_v1, %v2619_v40  ;;  %v6993_v58 = vmax.f32 %v2566_v6, 0.0  ;;  %v2844_v50 = vmul.f32 %v137_v32, %v2630_v47 }
  0x46   :  { %v2822_v30 = vsub.f32 %v6991_v63, %v241_v49  ;;  %v141_v29 = vld [vmem:[#allocation5 + $0x108] sm:$0xff]  ;;  %v142_v4 = vld [vmem:[#allocation5 + $0x110] sm:$0xff]  ;;  %v143_v38 = vld [vmem:[#allocation5 + $0x118] sm:$0xff]  ;;  %v2838_v63 = vmul.f32 %v135_v17, %v2626_v45  ;;  %v6996_v1 = vmax.f32 %v2568_v7, 0.0  ;;  %v2857_v17 = vmul.f32 %v140_v56, %v2639_v53 }
  0x47   :  { %v2835_v0 = vsub.f32 %v6993_v58, %v242_v62  ;;  %v144_v35 = vld [vmem:[#allocation5 + $0x120] sm:$0xff]  ;;  %v145_v5 = vld [vmem:[#allocation5 + $0x128] sm:$0xff]  ;;  %v146_v49 = vld [vmem:[#allocation5 + $0x130] sm:$0xff]  ;;  %6995 = vst [vmem:[#allocation77_spill] sm:$0xff] %v2844_v50  ;;  %v2851_v58 = vmul.f32 %v138_v23, %v2635_v51 }
  0x48   :  { %6992 = vst [vmem:[#allocation75_spill] sm:$0xff] %v2822_v30  ;;  %v2841_v30 = vmul.f32 %v136_v2, %v2628_v46  ;;  %v2848_v37 = vsub.f32 %v6996_v1, %v243_v19  ;;  %v147_v41 = vld [vmem:[#allocation5 + $0x138] sm:$0xff]  ;;  %v148_v6 = vld [vmem:[#allocation5 + $0x140] sm:$0xff]  ;;  %v149_v62 = vld [vmem:[#allocation5 + $0x148] sm:$0xff]  ;;  %v6999_v2 = vmax.f32 %v2570_v8, 0.0  ;;  %v2864_v1 = vmul.f32 %v141_v29, %v2644_v57 }
  0x49   :  { %6994 = vst [vmem:[#allocation76_spill] sm:$0xff] %v2835_v0  ;;  %v2854_v0 = vmul.f32 %v139_v3, %v2637_v52  ;;  %6998 = vst [vmem:[#allocation79_spill] sm:$0xff] %v2857_v17  ;;  %v150_v47 = vld [vmem:[#allocation5 + $0x150] sm:$0xff]  ;;  %v151_v7 = vld [vmem:[#allocation5 + $0x158] sm:$0xff]  ;;  %v7004_v3 = vmax.f32 %v2572_v9, 0.0 }
  0x4a   :  { %6997 = vst [vmem:[#allocation78_spill] sm:$0xff] %v2848_v37  ;;  %v2861_v32 = vsub.f32 %v6999_v2, %v244_v61  ;;  %v152_v19 = vld [vmem:[#allocation5 + $0x160] sm:$0xff]  ;;  %v7001_v37 = vld [vmem:[#allocation40_spill] sm:$0xff]  ;;  %v153_v53 = vld [vmem:[#allocation5 + $0x168] sm:$0xff] }
  0x4b   :  { %v2867_v50 = vmul.f32 %v142_v4, %v7001_v37  ;;  %v7002_v23 = vld [vmem:[#allocation41_spill] sm:$0xff]  ;;  %v2874_v56 = vsub.f32 %v7004_v3, %v245_v48  ;;  %v154_v8 = vld [vmem:[#allocation5 + $0x170] sm:$0xff]  ;;  %v155_v61 = vld [vmem:[#allocation5 + $0x178] sm:$0xff]  ;;  %v7011_v4 = vmax.f32 %v2574_v10, 0.0 }
  0x4c   :  { %7000 = vst [vmem:[#allocation80_spill] sm:$0xff] %v2861_v32  ;;  %v2870_v51 = vmul.f32 %v143_v38, %v7002_v23  ;;  %v7006_v2 = vld [vmem:[#allocation42_spill] sm:$0xff]  ;;  %v7007_v17 = vld [vmem:[#allocation43_spill] sm:$0xff]  ;;  %v7009_v29 = vld [vmem:[#allocation44_spill] sm:$0xff] }
  0x4d   :  { %7005 = vst [vmem:[#allocation81_spill] sm:$0xff] %v2874_v56  ;;  %v2877_v32 = vmul.f32 %v144_v35, %v7006_v2  ;;  %v2880_v52 = vmul.f32 %v145_v5, %v7007_v17  ;;  %v2883_v57 = vmul.f32 %v146_v49, %v7009_v29  ;;  %v2888_v38 = vsub.f32 %v7011_v4, %v2763_v55  ;;  %v156_v9 = vld [vmem:[#allocation5 + $0x180] sm:$0xff]  ;;  %v157_v48 = vld [vmem:[#allocation5 + $0x188] sm:$0xff]  ;;  %v158_v3 = vld [vmem:[#allocation5 + $0x190] sm:$0xff] }
  0x4e   :  { %7003 = vst [vmem:[#allocation40_spill] sm:$0xff] %v2870_v51  ;;  %v7013_v56 = vld [vmem:[#allocation45_spill] sm:$0xff]  ;;  %v7014_v51 = vld [vmem:[#allocation46_spill] sm:$0xff]  ;;  %v7015_v2 = vld [vmem:[#allocation47_spill] sm:$0xff]  ;;  %v7017_v49 = vmax.f32 %v2576_v11, 0.0 }
  0x4f   :  { %7008 = vst [vmem:[#allocation82_spill] sm:$0xff] %v2880_v52  ;;  %7010 = vst [vmem:[#allocation83_spill] sm:$0xff] %v2883_v57  ;;  %v2891_v23 = vmul.f32 %v147_v41, %v7013_v56  ;;  %v2894_v35 = vmul.f32 %v148_v6, %v7014_v51  ;;  %v2897_v5 = vmul.f32 %v149_v62, %v7015_v2  ;;  %v159_v10 = vld [vmem:[#allocation5 + $0x198] sm:$0xff]  ;;  %v160_v55 = vld [vmem:[#allocation5 + $0x1a0] sm:$0xff]  ;;  %v7023_v6 = vmax.f32 %v2581_v15, 0.0 }
  0x50   :  { %7012 = vst [vmem:[#allocation84_spill] sm:$0xff] %v2888_v38  ;;  %v2902_v29 = vsub.f32 %v7017_v49, %v2766_v59  ;;  %v161_v4 = vld [vmem:[#allocation5 + $0x1a8] sm:$0xff]  ;;  %v7019_v38 = vld [vmem:[#allocation48_spill] sm:$0xff]  ;;  %v7020_v17 = vld [vmem:[#allocation49_spill] sm:$0xff] }
  0x51   :  { %7016 = vst [vmem:[#allocation85_spill] sm:$0xff] %v2897_v5  ;;  %v278_v57 = vmul.f32 %v150_v47, %v7019_v38  ;;  %v2906_v52 = vmul.f32 %v151_v7, %v7020_v17  ;;  %v7021_v41 = vld [vmem:[#allocation50_spill] sm:$0xff]  ;;  %v2914_v62 = vsub.f32 %v7023_v6, %v2773_v43  ;;  %v162_v2 = vld [vmem:[#allocation5 + $0x1b0] sm:$0xff]  ;;  %v163_v11 = vld [vmem:[#allocation5 + $0x1b8] sm:$0xff] }
  0x52   :  { %7018 = vst [vmem:[#allocation86_spill] sm:$0xff] %v2902_v29  ;;  %v2909_v56 = vmul.f32 %v152_v19, %v7021_v41  ;;  %v164_v59 = vld [vmem:[#allocation5 + $0x1c0] sm:$0xff]  ;;  %v7025_v49 = vld [vmem:[#allocation51_spill] sm:$0xff]  ;;  %v7026_v5 = vld [vmem:[#allocation52_spill] sm:$0xff]  ;;  %v7030_v19 = vmax.f32 %v2583_v16, 0.0 }
  0x53   :  { %7024 = vst [vmem:[#allocation87_spill] sm:$0xff] %v2914_v62  ;;  %v2917_v29 = vmul.f32 %v153_v53, %v7025_v49  ;;  %v2920_v51 = vmul.f32 %v154_v8, %v7026_v5  ;;  %v7028_v47 = vld [vmem:[#allocation53_spill] sm:$0xff]  ;;  %v165_v15 = vld [vmem:[#allocation5 + $0x1c8] sm:$0xff]  ;;  %v166_v43 = vld [vmem:[#allocation5 + $0x1d0] sm:$0xff] }
  0x54   :  { %7022 = vst [vmem:[#allocation48_spill] sm:$0xff] %v2909_v56  ;;  %v2923_v7 = vmul.f32 %v155_v61, %v7028_v47  ;;  %v2928_v41 = vsub.f32 %v7030_v19, %v2776_v44  ;;  %v167_v6 = vld [vmem:[#allocation5 + $0x1d8] sm:$0xff]  ;;  %v7032_v62 = vld [vmem:[#allocation54_spill] sm:$0xff]  ;;  %v7033_v17 = vld [vmem:[#allocation55_spill] sm:$0xff] }
  0x55   :  { %7027 = vst [vmem:[#allocation88_spill] sm:$0xff] %v2920_v51  ;;  %v2931_v56 = vmul.f32 %v156_v9, %v7032_v62  ;;  %v2934_v53 = vmul.f32 %v157_v48, %v7033_v17  ;;  %v7034_v49 = vld [vmem:[#allocation56_spill] sm:$0xff]  ;;  %v7036_v61 = vld [vmem:[#allocation29_spill] sm:$0xff]  ;;  %v169_v44 = vld [vmem:[#allocation5 + $0x1e8] sm:$0xff] }
  0x56   :  { %7029 = vst [vmem:[#allocation89_spill] sm:$0xff] %v2923_v7  ;;  %7031 = vst [vmem:[#allocation90_spill] sm:$0xff] %v2928_v41  ;;  %v2937_v8 = vmul.f32 %v158_v3, %v7034_v49  ;;  %v7037_v47 = vmax.f32 %v7036_v61, 0.0  ;;  %v168_v5 = vld [vmem:[#allocation5 + $0x1e0] sm:$0xff]  ;;  %v170_v19 = vld [vmem:[#allocation5 + $0x1f0] sm:$0xff]  ;;  %v7043_v3 = vmax.f32 %v2590_v21, 0.0 }
  0x57   :  { %v7039_v41 = vld [vmem:[#allocation57_spill] sm:$0xff]  ;;  %v7040_v16 = vld [vmem:[#allocation58_spill] sm:$0xff]  ;;  %v7041_v62 = vld [vmem:[#allocation59_spill] sm:$0xff] }
  0x58   :  { %7035 = vst [vmem:[#allocation91_spill] sm:$0xff] %v2937_v8  ;;  %v2942_v7 = vsub.f32 %v7037_v47, %v2779_v14  ;;  %v2945_v51 = vmul.f32 %v159_v10, %v7039_v41  ;;  %v2948_v9 = vmul.f32 %v160_v55, %v7040_v16  ;;  %v2951_v48 = vmul.f32 %v161_v4, %v7041_v62  ;;  %v171_v8 = vld [vmem:[#allocation5 + $0x1f8] sm:$0xff]  ;;  %v7048_v10 = vld [vmem:[#allocation62_spill] sm:$0xff]  ;;  %v7052_v62 = vld [vmem:[#allocation63_spill] sm:$0xff] }
  0x59   :  { %v2956_v49 = vsub.f32 %v7043_v3, %v2786_v20  ;;  %v7045_v14 = vld [vmem:[#allocation60_spill] sm:$0xff]  ;;  %v2965_v41 = vmul.f32 %v164_v59, %v7048_v10  ;;  %v7050_v55 = vmax.f32 %v2592_v22, 0.0  ;;  %v7058_v59 = vld [vmem:[#allocation66_spill] sm:$0xff] }
  0x5a   :  { %7038 = vst [vmem:[#allocation29_spill] sm:$0xff] %v2942_v7  ;;  %7042 = vst [vmem:[#allocation92_spill] sm:$0xff] %v2951_v48  ;;  %v2959_v47 = vmul.f32 %v162_v2, %v7045_v14  ;;  %v7046_v7 = vld [vmem:[#allocation61_spill] sm:$0xff]  ;;  %v2973_v48 = vmul.f32 %v165_v15, %v7052_v62  ;;  %v7053_v20 = vld [vmem:[#allocation64_spill] sm:$0xff]  ;;  %v2987_v10 = vmul.f32 %v168_v5, %v7058_v59 }
  0x5b   :  { %7044 = vst [vmem:[#allocation93_spill] sm:$0xff] %v2956_v49  ;;  %v2962_v17 = vmul.f32 %v163_v11, %v7046_v7  ;;  %7049 = vst [vmem:[#allocation95_spill] sm:$0xff] %v2965_v41  ;;  %v2970_v4 = vsub.f32 %v7050_v55, %v2789_v24  ;;  %v2976_v3 = vmul.f32 %v166_v43, %v7053_v20  ;;  %v7054_v49 = vld [vmem:[#allocation65_spill] sm:$0xff]  ;;  %v7055_v11 = vld [vmem:[#allocation30_spill] sm:$0xff]  ;;  %v7063_v43 = vmax.f32 %v2599_v27, 0.0 }
  0x5c   :  { %v2979_v2 = vmul.f32 %v167_v6, %v7054_v49  ;;  %v7056_v7 = vmax.f32 %v7055_v11, 0.0  ;;  %v7059_v41 = vld [vmem:[#allocation67_spill] sm:$0xff]  ;;  %v7061_v55 = vld [vmem:[#allocation68_spill] sm:$0xff]  ;;  %v7065_v6 = vld [vmem:[#allocation69_spill] sm:$0xff] }
  0x5d   :  { %7047 = vst [vmem:[#allocation94_spill] sm:$0xff] %v2962_v17  ;;  %7051 = vst [vmem:[#allocation96_spill] sm:$0xff] %v2970_v4  ;;  %v2990_v24 = vmul.f32 %v169_v44, %v7059_v41  ;;  %v2993_v15 = vmul.f32 %v170_v19, %v7061_v55  ;;  %v2998_v4 = vsub.f32 %v7063_v43, %v2799_v18  ;;  %v7069_v5 = vld [vmem:[#allocation32_spill] sm:$0xff]  ;;  %v7072_v19 = vmax.f32 %v2608_v33, 0.0  ;;  %v7076_v43 = vld [vmem:[#allocation33_spill] sm:$0xff] }
  0x5e   :  { %v2984_v17 = vsub.f32 %v7056_v7, %v2792_v31  ;;  %v3001_v49 = vmul.f32 %v171_v8, %v7065_v6  ;;  %v7067_v31 = vmax.f32 %v2601_v28, 0.0  ;;  %v7070_v44 = vmax.f32 %v7069_v5, 0.0  ;;  %v7156_v41 = vld [vmem:[#allocation27_spill] sm:$0xff]  ;;  %v7158_v59 = vld [vmem:[#allocation88_spill] sm:$0xff]  ;;  %v7217_v6 = vld [vmem:[#allocation17_spill] sm:$0xff] }
  0x5f   :  { %7060 = vst [vmem:[#allocation97_spill] sm:$0xff] %v2990_v24  ;;  %7062 = vst [vmem:[#allocation98_spill] sm:$0xff] %v2993_v15  ;;  %v3016_v55 = vsub.f32 %v7072_v19, %v2812_v60  ;;  %v7074_v18 = vmax.f32 %v2610_v34, 0.0  ;;  %v7083_v19 = vld [vmem:[#allocation34_spill] sm:$0xff]  ;;  %v7145_v24 = vld [vmem:[#allocation48_spill] sm:$0xff] }
  0x60   :  { %7057 = vst [vmem:[#allocation30_spill] sm:$0xff] %v2984_v17  ;;  %7064 = vst [vmem:[#allocation99_spill] sm:$0xff] %v2998_v4  ;;  %v3006_v7 = vsub.f32 %v7067_v31, %v2802_v13  ;;  %v3011_v17 = vsub.f32 %v7070_v44, %v2805_v36  ;;  %v7079_v31 = vmax.f32 %v2617_v39, 0.0  ;;  %v7081_v44 = vmax.f32 %v2619_v40, 0.0  ;;  %v7172_v28 = vld [vmem:[#allocation91_spill] sm:$0xff] }
  0x61   :  { %7066 = vst [vmem:[#allocation100_spill] sm:$0xff] %v3001_v49  ;;  %7073 = vst [vmem:[#allocation102_spill] sm:$0xff] %v3016_v55  ;;  %v3021_v8 = vsub.f32 %v7074_v18, %v2815_v12  ;;  %v7077_v49 = vmax.f32 %v7076_v43, 0.0  ;;  %v7084_v55 = vmax.f32 %v7083_v19, 0.0  ;;  %v7086_v18 = vmax.f32 %v2626_v45, 0.0 }
  0x62   :  { %7068 = vst [vmem:[#allocation101_spill] sm:$0xff] %v3006_v7  ;;  %7071 = vst [vmem:[#allocation32_spill] sm:$0xff] %v3011_v17  ;;  %v3031_v36 = vsub.f32 %v7079_v31, %v2825_v25  ;;  %v3036_v60 = vsub.f32 %v7081_v44, %v2828_v42  ;;  %v7090_v31 = vld [vmem:[#allocation77_spill] sm:$0xff]  ;;  %v7094_v44 = vld [vmem:[#allocation36_spill] sm:$0xff] }
  0x63   :  { %7075 = vst [vmem:[#allocation103_spill] sm:$0xff] %v3021_v8  ;;  %v3026_v13 = vsub.f32 %v7077_v49, %v2818_v26  ;;  %v3041_v12 = vsub.f32 %v7084_v55, %v2831_v54  ;;  %v3046_v26 = vsub.f32 %v7086_v18, %v2838_v63  ;;  %v7088_v49 = vmax.f32 %v2628_v46, 0.0  ;;  %v7097_v55 = vld [vmem:[#allocation37_spill] sm:$0xff]  ;;  %v7100_v18 = vld [vmem:[#allocation79_spill] sm:$0xff] }
  0x64   :  { %7080 = vst [vmem:[#allocation104_spill] sm:$0xff] %v3031_v36  ;;  %7082 = vst [vmem:[#allocation105_spill] sm:$0xff] %v3036_v60  ;;  %v7091_v36 = vld [vmem:[#allocation35_spill] sm:$0xff]  ;;  %v7095_v60 = vmax.f32 %v7094_v44, 0.0 }
  0x65   :  { %7078 = vst [vmem:[#allocation33_spill] sm:$0xff] %v3026_v13  ;;  %7085 = vst [vmem:[#allocation34_spill] sm:$0xff] %v3041_v12  ;;  %v3051_v25 = vsub.f32 %v7088_v49, %v2841_v30  ;;  %v7092_v13 = vmax.f32 %v7091_v36, 0.0  ;;  %v7098_v12 = vmax.f32 %v7097_v55, 0.0  ;;  %v7104_v49 = vld [vmem:[#allocation39_spill] sm:$0xff] }
  0x66   :  { %7087 = vst [vmem:[#allocation106_spill] sm:$0xff] %v3046_v26  ;;  %v3061_v54 = vsub.f32 %v7095_v60, %v2851_v58  ;;  %v7101_v26 = vld [vmem:[#allocation38_spill] sm:$0xff]  ;;  %v7109_v60 = vld [vmem:[#allocation40_spill] sm:$0xff] }
  0x67   :  { %7089 = vst [vmem:[#allocation107_spill] sm:$0xff] %v3051_v25  ;;  %v3056_v42 = vsub.f32 %v7092_v13, %v7090_v31  ;;  %v3066_v63 = vsub.f32 %v7098_v12, %v2854_v0  ;;  %v7102_v8 = vmax.f32 %v7101_v26, 0.0  ;;  %v7105_v25 = vmax.f32 %v7104_v49, 0.0  ;;  %v7113_v12 = vld [vmem:[#allocation42_spill] sm:$0xff] }
  0x68   :  { %7096 = vst [vmem:[#allocation35_spill] sm:$0xff] %v3061_v54  ;;  %v7107_v31 = vmax.f32 %v7001_v37, 0.0  ;;  %v7110_v54 = vld [vmem:[#allocation41_spill] sm:$0xff] }
  0x69   :  { %7093 = vst [vmem:[#allocation77_spill] sm:$0xff] %v3056_v42  ;;  %7099 = vst [vmem:[#allocation36_spill] sm:$0xff] %v3066_v63  ;;  %v3071_v30 = vsub.f32 %v7102_v8, %v7100_v18  ;;  %v3076_v13 = vsub.f32 %v7105_v25, %v2864_v1  ;;  %v7111_v42 = vmax.f32 %v7110_v54, 0.0  ;;  %v7114_v63 = vmax.f32 %v7113_v12, 0.0  ;;  %v7116_v18 = vld [vmem:[#allocation82_spill] sm:$0xff]  ;;  %v7120_v25 = vld [vmem:[#allocation83_spill] sm:$0xff] }
  0x6a   :  { %v3081_v58 = vsub.f32 %v7107_v31, %v2867_v50  ;;  %v7124_v31 = vld [vmem:[#allocation45_spill] sm:$0xff] }
  0x6b   :  { %7103 = vst [vmem:[#allocation37_spill] sm:$0xff] %v3071_v30  ;;  %7106 = vst [vmem:[#allocation79_spill] sm:$0xff] %v3076_v13  ;;  %v3086_v0 = vsub.f32 %v7111_v42, %v7109_v60  ;;  %v3091_v8 = vsub.f32 %v7114_v63, %v2877_v32  ;;  %v7117_v30 = vld [vmem:[#allocation43_spill] sm:$0xff]  ;;  %v7121_v13 = vld [vmem:[#allocation44_spill] sm:$0xff] }
  0x6c   :  { %7108 = vst [vmem:[#allocation38_spill] sm:$0xff] %v3081_v58  ;;  %v7118_v17 = vmax.f32 %v7117_v30, 0.0  ;;  %v7122_v7 = vmax.f32 %v7121_v13, 0.0  ;;  %v7125_v58 = vmax.f32 %v7124_v31, 0.0  ;;  %v7127_v60 = vld [vmem:[#allocation46_spill] sm:$0xff]  ;;  %v7130_v63 = vld [vmem:[#allocation85_spill] sm:$0xff] }
  0x6d   :  { %7112 = vst [vmem:[#allocation39_spill] sm:$0xff] %v3086_v0  ;;  %7115 = vst [vmem:[#allocation40_spill] sm:$0xff] %v3091_v8  ;;  %v7128_v0 = vmax.f32 %v7127_v60, 0.0  ;;  %v7131_v8 = vld [vmem:[#allocation47_spill] sm:$0xff] }
  0x6e   :  { %v3096_v1 = vsub.f32 %v7118_v17, %v7116_v18  ;;  %v3101_v50 = vsub.f32 %v7122_v7, %v7120_v25  ;;  %v3106_v42 = vsub.f32 %v7125_v58, %v2891_v23  ;;  %v7132_v4 = vmax.f32 %v7131_v8, 0.0  ;;  %v7149_v25 = vld [vmem:[#allocation23_spill] sm:$0xff]  ;;  %v7162_v23 = vld [vmem:[#allocation89_spill] sm:$0xff] }
  0x6f   :  { %v3111_v32 = vsub.f32 %v7128_v0, %v2894_v35  ;;  %v7134_v18 = vmax.f32 %v7019_v38, 0.0  ;;  %v7191_v30 = vld [vmem:[#allocation95_spill] sm:$0xff] }
  0x70   :  { %7119 = vst [vmem:[#allocation41_spill] sm:$0xff] %v3096_v1  ;;  %7123 = vst [vmem:[#allocation42_spill] sm:$0xff] %v3101_v50  ;;  %v3116_v17 = vsub.f32 %v7132_v4, %v7130_v63  ;;  %v7150_v50 = vld [vmem:[#allocation24_spill] sm:$0xff]  ;;  %v7205_v58 = vld [vmem:[#allocation15_spill] sm:$0xff] }
  0x71   :  { %7126 = vst [vmem:[#allocation82_spill] sm:$0xff] %v3106_v42  ;;  %7129 = vst [vmem:[#allocation83_spill] sm:$0xff] %v3111_v32  ;;  %v3120_v1 = vsub.f32 %v7134_v18, %v278_v57  ;;  %v7139_v42 = vld [vmem:[#allocation49_spill] sm:$0xff]  ;;  %v7146_v57 = vld [vmem:[#allocation50_spill] sm:$0xff] }
  0x72   :  { %7133 = vst [vmem:[#allocation44_spill] sm:$0xff] %v3116_v17  ;;  %v7140_v15 = vmax.f32 %v7139_v42, 0.0  ;;  %v7147_v18 = vmax.f32 %v7146_v57, 0.0  ;;  %v7155_v32 = vld [vmem:[#allocation26_spill] sm:$0xff]  ;;  %v7157_v63 = vld [vmem:[#allocation28_spill] sm:$0xff] }
  0x73   :  { %7135 = vst [vmem:[#allocation45_spill] sm:$0xff] %v3120_v1  ;;  %v7220_v4 = vld [vmem:[#allocation18_spill] sm:$0xff] }
  0x74   :  { %v3128_v35 = vsub.f32 %v7140_v15, %v2906_v52  ;;  %v3136_v1 = vsub.f32 %v7147_v18, %v7145_v24  ;;  %v7152_v52 = vld [vmem:[#allocation51_spill] sm:$0xff]  ;;  %v7159_v24 = vld [vmem:[#allocation52_spill] sm:$0xff] }
  0x75   :  { %v7153_v15 = vmax.f32 %v7152_v52, 0.0  ;;  %v7160_v18 = vmax.f32 %v7159_v24, 0.0 }
  0x76   :  { %7141 = vst [vmem:[#allocation46_spill] sm:$0xff] %v3128_v35  ;;  %7148 = vst [vmem:[#allocation85_spill] sm:$0xff] %v3136_v1 }
  0x77   :  { %v3144_v35 = vsub.f32 %v7153_v15, %v2917_v29  ;;  %v3152_v1 = vsub.f32 %v7160_v18, %v7158_v59  ;;  %v7163_v29 = vld [vmem:[#allocation53_spill] sm:$0xff]  ;;  %v7166_v59 = vld [vmem:[#allocation54_spill] sm:$0xff] }
  0x78   :  { %v7164_v15 = vmax.f32 %v7163_v29, 0.0  ;;  %v7167_v18 = vmax.f32 %v7166_v59, 0.0 }
  0x79   :  { %7154 = vst [vmem:[#allocation47_spill] sm:$0xff] %v3144_v35  ;;  %7161 = vst [vmem:[#allocation49_spill] sm:$0xff] %v3152_v1 }
  0x7a   :  { %v3160_v35 = vsub.f32 %v7164_v15, %v7162_v23  ;;  %v3168_v1 = vsub.f32 %v7167_v18, %v2931_v56  ;;  %v7169_v23 = vld [vmem:[#allocation55_spill] sm:$0xff]  ;;  %v7173_v56 = vld [vmem:[#allocation56_spill] sm:$0xff] }
  0x7b   :  { %v7170_v15 = vmax.f32 %v7169_v23, 0.0  ;;  %v7174_v18 = vmax.f32 %v7173_v56, 0.0 }
  0x7c   :  { %7165 = vst [vmem:[#allocation48_spill] sm:$0xff] %v3160_v35  ;;  %7168 = vst [vmem:[#allocation50_spill] sm:$0xff] %v3168_v1 }
  0x7d   :  { %v3176_v35 = vsub.f32 %v7170_v15, %v2934_v53  ;;  %v3184_v1 = vsub.f32 %v7174_v18, %v7172_v28  ;;  %v7176_v53 = vld [vmem:[#allocation57_spill] sm:$0xff]  ;;  %v7179_v28 = vmax.f32 %v7040_v16, 0.0  ;;  %v7224_v16 = vld [vmem:[#allocation20_spill] sm:$0xff] }
  0x7e   :  { %v7177_v15 = vmax.f32 %v7176_v53, 0.0 }
  0x7f   :  { %7171 = vst [vmem:[#allocation23_spill] sm:$0xff] %v3176_v35  ;;  %7175 = vst [vmem:[#allocation24_spill] sm:$0xff] %v3184_v1  ;;  %v3200_v18 = vsub.f32 %v7179_v28, %v2948_v9  ;;  %v7181_v1 = vld [vmem:[#allocation92_spill] sm:$0xff]  ;;  %v7185_v9 = vmax.f32 %v7045_v14, 0.0 }
  0x80   :  { %v3192_v35 = vsub.f32 %v7177_v15, %v2945_v51  ;;  %v7182_v51 = vld [vmem:[#allocation59_spill] sm:$0xff] }
  0x81   :  { %7180 = vst [vmem:[#allocation26_spill] sm:$0xff] %v3200_v18  ;;  %v7183_v15 = vmax.f32 %v7182_v51, 0.0  ;;  %v3216_v28 = vsub.f32 %v7185_v9, %v2959_v47  ;;  %v7187_v18 = vld [vmem:[#allocation94_spill] sm:$0xff] }
  0x82   :  { %7178 = vst [vmem:[#allocation51_spill] sm:$0xff] %v3192_v35  ;;  %v7192_v47 = vld [vmem:[#allocation62_spill] sm:$0xff] }
  0x83   :  { %v3208_v35 = vsub.f32 %v7183_v15, %v7181_v1  ;;  %7186 = vst [vmem:[#allocation28_spill] sm:$0xff] %v3216_v28  ;;  %v7188_v1 = vld [vmem:[#allocation61_spill] sm:$0xff]  ;;  %v7193_v9 = vmax.f32 %v7192_v47, 0.0 }
  0x84   :  { %v7189_v15 = vmax.f32 %v7188_v1, 0.0  ;;  %v7211_v1 = vld [vmem:[#allocation16_spill] sm:$0xff] }
  0x85   :  { %7184 = vst [vmem:[#allocation27_spill] sm:$0xff] %v3208_v35  ;;  %v3232_v28 = vsub.f32 %v7193_v9, %v7191_v30  ;;  %v7197_v30 = vmax.f32 %v7053_v20, 0.0  ;;  %v7212_v14 = vand.u32 2147483647, %v7211_v1 }
  0x86   :  { %v3224_v35 = vsub.f32 %v7189_v15, %v7187_v18  ;;  %v7195_v18 = vmax.f32 %v7052_v62, 0.0  ;;  %v7218_v62 = vand.u32 2147483647, %v7217_v6 }
  0x87   :  { %7194 = vst [vmem:[#allocation52_spill] sm:$0xff] %v3232_v28  ;;  %v3248_v9 = vsub.f32 %v7197_v30, %v2976_v3  ;;  %v7202_v3 = vld [vmem:[#allocation66_spill] sm:$0xff]  ;;  %v7206_v28 = vand.u32 2147483647, %v7205_v58 }
  0x88   :  { %7190 = vst [vmem:[#allocation88_spill] sm:$0xff] %v3224_v35  ;;  %v3240_v15 = vsub.f32 %v7195_v18, %v2973_v48  ;;  %v7199_v48 = vld [vmem:[#allocation65_spill] sm:$0xff]  ;;  %v7203_v30 = vmax.f32 %v7202_v3, 0.0 }
  0x89   :  { %7198 = vst [vmem:[#allocation53_spill] sm:$0xff] %v3248_v9  ;;  %v7200_v18 = vmax.f32 %v7199_v48, 0.0  ;;  %v428_v35 = vsub.f32 0.0, %v7206_v28  ;;  %v7221_v48 = vand.u32 2147483647, %v7220_v4  ;;  %v7228_v28 = vld [vmem:[#allocation22_spill] sm:$0xff] }
  0x8a   :  { %7196 = vst [vmem:[#allocation89_spill] sm:$0xff] %v3240_v15  ;;  %v3264_v9 = vsub.f32 %v7203_v30, %v2987_v10  ;;  %v429_v10 = vsub.f32 0.0, %v7212_v14  ;;  %v7213_v30 = vld [vmem:[#allocation98_spill] sm:$0xff]  ;;  %v7222_v14 = vld [vmem:[#allocation19_spill] sm:$0xff] }
  0x8b   :  { %v3256_v15 = vsub.f32 %v7200_v18, %v2979_v2  ;;  %v7207_v2 = vld [vmem:[#allocation97_spill] sm:$0xff]  ;;  %v7208_v18 = vld [vmem:[#allocation67_spill] sm:$0xff]  ;;  %v431_v1 = vsub.f32 0.0, %v7221_v48  ;;  %v7223_v20 = vand.u32 2147483647, %v7222_v14 }
  0x8c   :  { %7204 = vst [vmem:[#allocation55_spill] sm:$0xff] %v3264_v9  ;;  %v7214_v9 = vld [vmem:[#allocation68_spill] sm:$0xff]  ;;  %v7232_v48 = vld [vmem:[#allocation25_spill] sm:$0xff] }
  0x8d   :  { %7201 = vst [vmem:[#allocation54_spill] sm:$0xff] %v3256_v15  ;;  %v7209_v15 = vmax.f32 %v7208_v18, 0.0  ;;  %v7215_v7 = vmax.f32 %v7214_v9, 0.0  ;;  %v432_v51 = vsub.f32 0.0, %v7223_v20  ;;  %v7229_v18 = vand.u32 2147483647, %v7228_v28 }
  0x8e   :  { %v7233_v0 = vand.u32 2147483647, %v7232_v48  ;;  %v494_v20 = vmul.f32 1.442695, %v429_v10  ;;  %v7236_v28 = vand.u32 2147483647, %v7157_v63 }
  0x8f   :  { %v3273_v17 = vsub.f32 %v7209_v15, %v7207_v2  ;;  %v3282_v47 = vsub.f32 %v7215_v7, %v7213_v30  ;;  %v430_v15 = vsub.f32 0.0, %v7218_v62  ;;  %v7225_v7 = vand.u32 2147483647, %v7224_v16 }
  0x90   :  { %v435_v6 = vsub.f32 0.0, %v7229_v18  ;;  %v492_v62 = vmul.f32 1.442695, %v428_v35  ;;  %v7230_v2 = vand.u32 2147483647, %v7149_v25  ;;  %v438_v14 = vsub.f32 0.0, %v7233_v0 }
  0x91   :  { %7210 = vst [vmem:[#allocation91_spill] sm:$0xff] %v3273_v17  ;;  %7216 = vst [vmem:[#allocation56_spill] sm:$0xff] %v3282_v47  ;;  %v433_v30 = vsub.f32 0.0, %v7225_v7  ;;  %v7226_v47 = vld [vmem:[#allocation21_spill] sm:$0xff]  ;;  %v7231_v17 = vand.u32 2147483647, %v7150_v50 }
  0x92   :  { %v7227_v58 = vand.u32 2147483647, %v7226_v47  ;;  %v436_v9 = vsub.f32 0.0, %v7230_v2  ;;  %v7234_v16 = vand.u32 2147483647, %v7155_v32  ;;  %v441_v18 = vsub.f32 0.0, %v7236_v28 }
  0x93   :  { %v437_v4 = vsub.f32 0.0, %v7231_v17  ;;  %v7235_v47 = vand.u32 2147483647, %v7156_v41  ;;  %v496_v35 = vmul.f32 1.442695, %v430_v15  ;;  %2017 = vpow2.f32 %v492_v62  ;;  %v7242_v28 = vld [vmem:[#allocation31_spill] sm:$0xff] }
  0x94   :  { %v434_v3 = vsub.f32 0.0, %v7227_v58  ;;  %v439_v7 = vsub.f32 0.0, %v7234_v16  ;;  %v7237_v25 = vand.u32 2147483647, %v7036_v61  ;;  %v7238_v50 = vand.u32 2147483647, %v2590_v21 }
  0x95   :  { %v440_v58 = vsub.f32 0.0, %v7235_v47  ;;  %v7239_v48 = vand.u32 2147483647, %v2592_v22  ;;  %v498_v10 = vmul.f32 1.442695, %v431_v1  ;;  %2019 = vpow2.f32 %v494_v20 }
  0x96   :  { %v442_v2 = vsub.f32 0.0, %v7237_v25  ;;  %v443_v17 = vsub.f32 0.0, %v7238_v50  ;;  %v7240_v32 = vand.u32 2147483647, %v7055_v11  ;;  %v7241_v41 = vand.u32 2147483647, %v2599_v27 }
  0x97   :  { %v444_v0 = vsub.f32 0.0, %v7239_v48  ;;  %v500_v63 = vmul.f32 1.442695, %v432_v51  ;;  %v7243_v15 = vand.u32 2147483647, %v7242_v28  ;;  %2021 = vpow2.f32 %v496_v35 }
  0x98   :  { %v445_v16 = vsub.f32 0.0, %v7240_v32  ;;  %v446_v47 = vsub.f32 0.0, %v7241_v41  ;;  %v7244_v61 = vand.u32 2147483647, %v7069_v5  ;;  %v502_v21 = vmul.f32 1.442695, %v433_v30 }
  0x99   :  { %v447_v53 = vsub.f32 0.0, %v7243_v15  ;;  %v7245_v22 = vand.u32 2147483647, %v2608_v33  ;;  %v7246_v11 = vand.u32 2147483647, %v2610_v34  ;;  %2023 = vpow2.f32 %v498_v10 }
  0x9a   :  { %v3326_v25 = vsub.f32 0.0, %v7244_v61  ;;  %v504_v27 = vmul.f32 1.442695, %v434_v3  ;;  %v7247_v51 = vand.u32 2147483647, %v7076_v43  ;;  %2025 = vpow2.f32 %v500_v63 }
  0x9b   :  { %v3330_v1 = vsub.f32 0.0, %v7245_v22  ;;  %v3334_v50 = vsub.f32 0.0, %v7246_v11  ;;  %v7248_v5 = vand.u32 2147483647, %v2617_v39  ;;  %v506_v30 = vmul.f32 1.442695, %v435_v6 }
  0x9c   :  { %v3338_v62 = vsub.f32 0.0, %v7247_v51  ;;  %v7249_v33 = vand.u32 2147483647, %v2619_v40  ;;  %v7250_v34 = vand.u32 2147483647, %v7083_v19  ;;  %2027 = vpow2.f32 %v502_v21 }
  0x9d   :  { %v3342_v48 = vsub.f32 0.0, %v7248_v5  ;;  %v508_v3 = vmul.f32 1.442695, %v436_v9  ;;  %v7251_v43 = vand.u32 2147483647, %v2626_v45  ;;  %2029 = vpow2.f32 %v504_v27  ;;  %v7261_v27 = vld [vmem:[#allocation43_spill] sm:$0xff] }
  0x9e   :  { %v3346_v20 = vsub.f32 0.0, %v7249_v33  ;;  %v3350_v32 = vsub.f32 0.0, %v7250_v34  ;;  %v7252_v39 = vand.u32 2147483647, %v2628_v46  ;;  %v510_v6 = vmul.f32 1.442695, %v437_v4 }
  0x9f   :  { %v3354_v35 = vsub.f32 0.0, %v7251_v43  ;;  %v7253_v40 = vand.u32 2147483647, %v7091_v36  ;;  %v7254_v19 = vand.u32 2147483647, %v7094_v44  ;;  %2031 = vpow2.f32 %v506_v30 }
  0xa0   :  { %v3358_v41 = vsub.f32 0.0, %v7252_v39  ;;  %v512_v9 = vmul.f32 1.442695, %v438_v14  ;;  %v7255_v45 = vand.u32 2147483647, %v7097_v55  ;;  %2033 = vpow2.f32 %v508_v3  ;;  %v3416_v39 = vpop.eup %2017 }
  0xa1   :  { %v3362_v10 = vsub.f32 0.0, %v7253_v40  ;;  %v3366_v28 = vsub.f32 0.0, %v7254_v19  ;;  %v7256_v46 = vand.u32 2147483647, %v7101_v26  ;;  %v514_v4 = vmul.f32 1.442695, %v439_v7 }
  0xa2   :  { %v3370_v63 = vsub.f32 0.0, %v7255_v45  ;;  %v7257_v36 = vand.u32 2147483647, %v7104_v49  ;;  %v7258_v44 = vand.u32 2147483647, %v7001_v37  ;;  %2035 = vpow2.f32 %v510_v6 }
  0xa3   :  { %v3374_v15 = vsub.f32 0.0, %v7256_v46  ;;  %v516_v14 = vmul.f32 1.442695, %v440_v58  ;;  %v7259_v55 = vand.u32 2147483647, %v7110_v54  ;;  %2037 = vpow2.f32 %v512_v9 }
  0xa4   :  { %v3378_v61 = vsub.f32 0.0, %v7257_v36  ;;  %v3382_v21 = vsub.f32 0.0, %v7258_v44  ;;  %v7260_v26 = vand.u32 2147483647, %v7113_v12  ;;  %v518_v7 = vmul.f32 1.442695, %v441_v18 }
  0xa5   :  { %v3386_v22 = vsub.f32 0.0, %v7259_v55  ;;  %v7262_v49 = vand.u32 2147483647, %v7261_v27  ;;  %v7263_v37 = vand.u32 2147483647, %v7121_v13  ;;  %2039 = vpow2.f32 %v514_v4 }
  0xa6   :  { %v3390_v11 = vsub.f32 0.0, %v7260_v26  ;;  %v520_v58 = vmul.f32 1.442695, %v442_v2  ;;  %v7264_v54 = vand.u32 2147483647, %v7124_v31  ;;  %2041 = vpow2.f32 %v516_v14 }
  0xa7   :  { %v3394_v51 = vsub.f32 0.0, %v7262_v49  ;;  %v3398_v5 = vsub.f32 0.0, %v7263_v37  ;;  %v7265_v12 = vand.u32 2147483647, %v7127_v60  ;;  %v522_v18 = vmul.f32 1.442695, %v443_v17  ;;  %v3426_v17 = vpop.eup %2019 }
  0xa8   :  { %v3402_v30 = vsub.f32 0.0, %v7264_v54  ;;  %v7266_v34 = vand.u32 2147483647, %v7131_v8  ;;  %v7267_v13 = vand.u32 2147483647, %v7019_v38  ;;  %2043 = vpow2.f32 %v518_v7  ;;  %v3436_v45 = vpop.eup %2021 }
  0xa9   :  { %v3406_v33 = vsub.f32 0.0, %v7265_v12  ;;  %v524_v2 = vmul.f32 1.442695, %v444_v0  ;;  %v7268_v31 = vand.u32 2147483647, %v7139_v42  ;;  %2045 = vpow2.f32 %v520_v58  ;;  %v3446_v36 = vpop.eup %2023 }
  0xaa   :  { %v3410_v3 = vsub.f32 0.0, %v7266_v34  ;;  %v3414_v43 = vsub.f32 0.0, %v7267_v13  ;;  %v7269_v60 = vand.u32 2147483647, %v7146_v57  ;;  %v526_v8 = vmul.f32 1.442695, %v445_v16  ;;  %v3457_v55 = vpop.eup %2025 }
  0xab   :  { %v3420_v6 = vsub.f32 0.0, %v7268_v31  ;;  %v7270_v38 = vand.u32 2147483647, %v7152_v52  ;;  %v7271_v0 = vand.u32 2147483647, %v7159_v24  ;;  %2047 = vpow2.f32 %v522_v18  ;;  %v3468_v37 = vpop.eup %2027 }
  0xac   :  { %v3424_v40 = vsub.f32 0.0, %v7269_v60  ;;  %v528_v42 = vmul.f32 1.442695, %v446_v47  ;;  %v7272_v57 = vand.u32 2147483647, %v7163_v29  ;;  %2049 = vpow2.f32 %v524_v2  ;;  %v3479_v13 = vpop.eup %2029  ;;  %v7284_v2 = vld [vmem:[#allocation61_spill] sm:$0xff] }
  0xad   :  { %v3430_v19 = vsub.f32 0.0, %v7270_v38  ;;  %v3434_v9 = vsub.f32 0.0, %v7271_v0  ;;  %v7273_v16 = vand.u32 2147483647, %v7166_v59  ;;  %v530_v52 = vmul.f32 1.442695, %v447_v53 }
  0xae   :  { %v3440_v46 = vsub.f32 0.0, %v7272_v57  ;;  %v7274_v24 = vand.u32 2147483647, %v7169_v23  ;;  %v7275_v47 = vand.u32 2147483647, %v7173_v56  ;;  %v7276_v59 = vld [vmem:[#allocation57_spill] sm:$0xff]  ;;  %2051 = vpow2.f32 %v526_v8  ;;  %v3490_v57 = vpop.eup %2031 }
  0xaf   :  { %v3444_v4 = vsub.f32 0.0, %v7273_v16  ;;  %v532_v29 = vmul.f32 1.442695, %v3326_v25  ;;  %v7277_v26 = vand.u32 2147483647, %v7276_v59  ;;  %v7278_v53 = vld [vmem:[#allocation58_spill] sm:$0xff]  ;;  %2053 = vpow2.f32 %v528_v42 }
  0xb0   :  { %v3450_v44 = vsub.f32 0.0, %v7274_v24  ;;  %v3454_v14 = vsub.f32 0.0, %v7275_v47  ;;  %v7279_v27 = vand.u32 2147483647, %v7278_v53  ;;  %v534_v23 = vmul.f32 1.442695, %v3330_v1  ;;  %v3501_v53 = vpop.eup %2033 }
  0xb1   :  { %v3461_v7 = vsub.f32 0.0, %v7277_v26  ;;  %v7280_v56 = vld [vmem:[#allocation59_spill] sm:$0xff]  ;;  %v7282_v25 = vld [vmem:[#allocation60_spill] sm:$0xff]  ;;  %v536_v34 = vmul.f32 1.442695, %v3334_v50  ;;  %v7286_v1 = vld [vmem:[#allocation62_spill] sm:$0xff]  ;;  %2055 = vpow2.f32 %v530_v52 }
  0xb2   :  { %v3465_v49 = vsub.f32 0.0, %v7279_v27  ;;  %v7281_v58 = vand.u32 2147483647, %v7280_v56  ;;  %v7283_v12 = vand.u32 2147483647, %v7282_v25  ;;  %v7288_v16 = vld [vmem:[#allocation63_spill] sm:$0xff]  ;;  %2057 = vpow2.f32 %v532_v29 }
  0xb3   :  { %v7285_v31 = vand.u32 2147483647, %v7284_v2  ;;  %v7287_v8 = vand.u32 2147483647, %v7286_v1  ;;  %v538_v0 = vmul.f32 1.442695, %v3338_v62  ;;  %2059 = vpow2.f32 %v534_v23  ;;  %v3512_v2 = vpop.eup %2035 }
  0xb4   :  { %v3472_v54 = vsub.f32 0.0, %v7281_v58  ;;  %v3476_v18 = vsub.f32 0.0, %v7283_v12  ;;  %v7289_v24 = vand.u32 2147483647, %v7288_v16  ;;  %v7290_v50 = vld [vmem:[#allocation64_spill] sm:$0xff]  ;;  %v7292_v27 = vld [vmem:[#allocation65_spill] sm:$0xff]  ;;  %2061 = vpow2.f32 %v536_v34 }
  0xb5   :  { %v3483_v60 = vsub.f32 0.0, %v7285_v31  ;;  %v3487_v38 = vsub.f32 0.0, %v7287_v8  ;;  %v7291_v47 = vand.u32 2147483647, %v7290_v50  ;;  %v540_v26 = vmul.f32 1.442695, %v3342_v48  ;;  %v3523_v50 = vpop.eup %2037 }
  0xb6   :  { %v3494_v42 = vsub.f32 0.0, %v7289_v24  ;;  %v7293_v56 = vand.u32 2147483647, %v7292_v27  ;;  %v7294_v62 = vld [vmem:[#allocation66_spill] sm:$0xff]  ;;  %v542_v12 = vmul.f32 1.442695, %v3346_v20  ;;  %2063 = vpow2.f32 %v538_v0 }
  0xb7   :  { %v3498_v59 = vsub.f32 0.0, %v7291_v47  ;;  %v7295_v58 = vand.u32 2147483647, %v7294_v62  ;;  %v7296_v31 = vld [vmem:[#allocation67_spill] sm:$0xff]  ;;  %v7298_v48 = vld [vmem:[#allocation68_spill] sm:$0xff]  ;;  %v7300_v47 = vld [vmem:[#allocation69_spill] sm:$0xff]  ;;  %v3531_v62 = vpop.eup %2039  ;;  %2065 = vpow2.f32 %v540_v26 }
  0xb8   :  { %v3505_v52 = vsub.f32 0.0, %v7293_v56  ;;  %v7297_v1 = vand.u32 2147483647, %v7296_v31  ;;  %v7299_v8 = vand.u32 2147483647, %v7298_v48  ;;  %v3536_v31 = vpop.eup %2041  ;;  %2067 = vpow2.f32 %v542_v12 }
  0xb9   :  { %v3509_v25 = vsub.f32 0.0, %v7295_v58  ;;  %v544_v24 = vmul.f32 1.442695, %v3350_v32  ;;  %v7301_v27 = vand.u32 2147483647, %v7300_v47  ;;  %v3541_v48 = vpop.eup %2043  ;;  %v659_v47 = vmul.f32 -0.5, %v3457_v55 }
  0xba   :  { %v3516_v29 = vsub.f32 0.0, %v7297_v1  ;;  %v3520_v16 = vsub.f32 0.0, %v7299_v8  ;;  %v546_v20 = vmul.f32 1.442695, %v3354_v35  ;;  %v548_v56 = vmul.f32 1.442695, %v3358_v41  ;;  %v3546_v26 = vpop.eup %2045 }
  0xbb   :  { %v3527_v23 = vsub.f32 0.0, %v7301_v27  ;;  %v550_v58 = vmul.f32 1.442695, %v3362_v10  ;;  %v552_v34 = vmul.f32 1.442695, %v3366_v28  ;;  %2069 = vpow2.f32 %v544_v24  ;;  %v3551_v12 = vpop.eup %2047 }
  0xbc   :  { %v554_v32 = vmul.f32 1.442695, %v3370_v63  ;;  %v556_v1 = vmul.f32 1.442695, %v3374_v15  ;;  %v558_v0 = vmul.f32 1.442695, %v3378_v61  ;;  %2071 = vpow2.f32 %v546_v20 }
  0xbd   :  { %v560_v35 = vmul.f32 1.442695, %v3382_v21  ;;  %v562_v41 = vmul.f32 1.442695, %v3386_v22  ;;  %v564_v10 = vmul.f32 1.442695, %v3390_v11  ;;  %2073 = vpow2.f32 %v548_v56 }
  0xbe   :  { %v566_v28 = vmul.f32 1.442695, %v3394_v51  ;;  %v568_v63 = vmul.f32 1.442695, %v3398_v5  ;;  %v570_v15 = vmul.f32 1.442695, %v3402_v30  ;;  %v3562_v51 = vpop.eup %2049  ;;  %2075 = vpow2.f32 %v550_v58 }
  0xbf   :  { %v572_v61 = vmul.f32 1.442695, %v3406_v33  ;;  %v3554_v21 = vmul.f32 1.442695, %v3410_v3  ;;  %v3557_v22 = vmul.f32 1.442695, %v3414_v43  ;;  %v3573_v3 = vpop.eup %2051  ;;  %2077 = vpow2.f32 %v552_v34 }
  0xc0   :  { %v3560_v11 = vmul.f32 1.442695, %v3420_v6  ;;  %v3565_v5 = vmul.f32 1.442695, %v3424_v40  ;;  %v3568_v30 = vmul.f32 1.442695, %v3430_v19  ;;  %v3584_v40 = vpop.eup %2053  ;;  %2079 = vpow2.f32 %v554_v32 }
  0xc1   :  { %v3571_v33 = vmul.f32 1.442695, %v3434_v9  ;;  %v3576_v43 = vmul.f32 1.442695, %v3440_v46  ;;  %v3579_v6 = vmul.f32 1.442695, %v3444_v4  ;;  %v3595_v46 = vpop.eup %2055  ;;  %2081 = vpow2.f32 %v556_v1 }
  0xc2   :  { %v3582_v8 = vmul.f32 1.442695, %v3450_v44  ;;  %v3587_v19 = vmul.f32 1.442695, %v3454_v14  ;;  %v3590_v9 = vmul.f32 1.442695, %v3461_v7  ;;  %v3604_v20 = vpop.eup %2057  ;;  %2083 = vpow2.f32 %v558_v0 }
  0xc3   :  { %v3593_v24 = vmul.f32 1.442695, %v3465_v49  ;;  %v3598_v4 = vmul.f32 1.442695, %v3472_v54  ;;  %v3601_v44 = vmul.f32 1.442695, %v3476_v18  ;;  %v3613_v56 = vpop.eup %2059  ;;  %2085 = vpow2.f32 %v560_v35 }
  0xc4   :  { %v623_v27 = vmul.f32 -0.5, %v3416_v39  ;;  %v3607_v14 = vmul.f32 1.442695, %v3483_v60  ;;  %v3610_v7 = vmul.f32 1.442695, %v3487_v38  ;;  %v632_v49 = vmul.f32 -0.5, %v3426_v17  ;;  %v3622_v34 = vpop.eup %2061 }
  0xc5   :  { %v3616_v54 = vmul.f32 1.442695, %v3494_v42  ;;  %v3619_v18 = vmul.f32 1.442695, %v3498_v59  ;;  %v641_v58 = vmul.f32 -0.5, %v3436_v45  ;;  %2087 = vpow2.f32 %v562_v41  ;;  %v3633_v1 = vpop.eup %2063 }
  0xc6   :  { %v3625_v60 = vmul.f32 1.442695, %v3505_v52  ;;  %v3628_v38 = vmul.f32 1.442695, %v3509_v25  ;;  %v3631_v32 = vmul.f32 1.442695, %v3516_v29  ;;  %2089 = vpow2.f32 %v564_v10  ;;  %v3641_v35 = vpop.eup %2065 }
  0xc7   :  { %7302 = vst [vmem:[#allocation92_spill] sm:$0xff] %v3633_v1  ;;  %v3636_v42 = vmul.f32 1.442695, %v3520_v16  ;;  %v3639_v59 = vmul.f32 1.442695, %v3527_v23  ;;  %v624_v0 = vadd.f32 1.0, %v623_v27  ;;  %2091 = vpow2.f32 %v566_v28  ;;  %v3647_v41 = vpop.eup %2067 }
  0xc8   :  { %7303 = vst [vmem:[#allocation94_spill] sm:$0xff] %v3641_v35  ;;  %v3644_v52 = vadd.f32 1.0, %v3416_v39  ;;  %v633_v25 = vadd.f32 1.0, %v632_v49  ;;  %v650_v29 = vmul.f32 -0.5, %v3446_v36  ;;  %7304 = vst [vmem:[#allocation95_spill] sm:$0xff] %v3647_v41  ;;  %2093 = vpow2.f32 %v568_v63  ;;  %v3651_v23 = vpop.eup %2069 }
  0xc9   :  { %v642_v16 = vadd.f32 1.0, %v641_v58  ;;  %7305 = vst [vmem:[#allocation15_spill] sm:$0xff] %v3651_v23  ;;  %2095 = vpow2.f32 %v570_v15  ;;  %v3654_v27 = vadd.f32 1.0, %v3426_v17  ;;  %v3658_v49 = vadd.f32 1.0, %v3436_v45  ;;  %v3660_v35 = vpop.eup %2071 }
  0xca   :  { %7306 = vst [vmem:[#allocation97_spill] sm:$0xff] %v3660_v35  ;;  %2097 = vpow2.f32 %v572_v61  ;;  %v3663_v63 = vmul.f32 %v3416_v39, %v624_v0  ;;  %v668_v10 = vmul.f32 -0.5, %v3468_v37  ;;  %v3667_v23 = vpop.eup %2073  ;;  %v3671_v15 = vmul.f32 %v3426_v17, %v633_v25 }
  0xcb   :  { %2099 = vpow2.f32 %v3554_v21  ;;  %v3674_v28 = vadd.f32 1.0, %v3446_v36  ;;  %v651_v41 = vadd.f32 1.0, %v650_v29  ;;  %v3676_v35 = vpop.eup %2075  ;;  %v3680_v61 = vmul.f32 %v3436_v45, %v642_v16 }
  0xcc   :  { %7307 = vst [vmem:[#allocation16_spill] sm:$0xff] %v3663_v63  ;;  %7308 = vst [vmem:[#allocation98_spill] sm:$0xff] %v3671_v15  ;;  %2101 = vpow2.f32 %v3557_v22  ;;  %v660_v0 = vadd.f32 1.0, %v659_v47  ;;  %v677_v58 = vmul.f32 -0.5, %v3479_v13  ;;  %v3683_v63 = vpop.eup %2077  ;;  %v3688_v25 = vadd.f32 1.0, %v3457_v55 }
  0xcd   :  { %7309 = vst [vmem:[#allocation17_spill] sm:$0xff] %v3680_v61  ;;  %7310 = vst [vmem:[#allocation18_spill] sm:$0xff] %v3683_v63  ;;  %2103 = vpow2.f32 %v3560_v11  ;;  %v686_v29 = vmul.f32 -0.5, %v3490_v57  ;;  %v3691_v15 = vpop.eup %2079  ;;  %v669_v47 = vadd.f32 1.0, %v668_v10  ;;  %v695_v16 = vmul.f32 -0.5, %v3501_v53 }
  0xce   :  { %7311 = vst [vmem:[#allocation19_spill] sm:$0xff] %v3691_v15  ;;  %2105 = vpow2.f32 %v3565_v5  ;;  %v3696_v61 = vpop.eup %2081  ;;  %v3700_v11 = vmul.f32 %v3446_v36, %v651_v41  ;;  %v3703_v21 = vadd.f32 1.0, %v3468_v37  ;;  %v3710_v5 = vmul.f32 %v3457_v55, %v660_v0 }
  0xcf   :  { %7312 = vst [vmem:[#allocation20_spill] sm:$0xff] %v3696_v61  ;;  %2107 = vpow2.f32 %v3568_v30  ;;  %v3706_v15 = vpop.eup %2083  ;;  %v3713_v10 = vadd.f32 1.0, %v3479_v13  ;;  %v678_v22 = vadd.f32 1.0, %v677_v58  ;;  %v687_v61 = vadd.f32 1.0, %v686_v29 }
  0xd0   :  { %7313 = vst [vmem:[#allocation21_spill] sm:$0xff] %v3700_v11  ;;  %7314 = vst [vmem:[#allocation22_spill] sm:$0xff] %v3706_v15  ;;  %2109 = vpow2.f32 %v3571_v33  ;;  %v3715_v30 = vpop.eup %2085  ;;  %v704_v63 = vmul.f32 -0.5, %v3512_v2  ;;  %v3724_v33 = vmul.f32 %v3468_v37, %v669_v47  ;;  %v696_v0 = vadd.f32 1.0, %v695_v16 }
  0xd1   :  { %7315 = vst [vmem:[#allocation25_spill] sm:$0xff] %v3715_v30  ;;  %2111 = vpow2.f32 %v3576_v43  ;;  %v713_v15 = vmul.f32 -0.5, %v3523_v50  ;;  %v3731_v43 = vadd.f32 1.0, %v3490_v57  ;;  %v3735_v41 = vadd.f32 1.0, %v3501_v53 }
  0xd2   :  { %v3720_v11 = vpop.eup %2087  ;;  %2113 = vpow2.f32 %v3579_v6  ;;  %v3741_v6 = vmul.f32 %v3479_v13, %v678_v22  ;;  %v722_v16 = vmul.f32 -0.5, %v3531_v62  ;;  %v3749_v29 = vmul.f32 %v3490_v57, %v687_v61 }
  0xd3   :  { %7316 = vst [vmem:[#allocation31_spill] sm:$0xff] %v3720_v11  ;;  %v3727_v58 = vpop.eup %2089  ;;  %2115 = vpow2.f32 %v3582_v8  ;;  %v714_v22 = vadd.f32 1.0, %v713_v15  ;;  %v731_v47 = vmul.f32 -0.5, %v3536_v31  ;;  %v3766_v61 = vadd.f32 1.0, %v3523_v50 }
  0xd4   :  { %7317 = vst [vmem:[#allocation43_spill] sm:$0xff] %v3727_v58  ;;  %v3737_v11 = vpop.eup %2091  ;;  %2117 = vpow2.f32 %v3587_v19  ;;  %7319 = vst [vmem:[#allocation58_spill] sm:$0xff] %v3741_v6  ;;  %v3752_v58 = vadd.f32 1.0, %v3512_v2  ;;  %v3758_v19 = vmul.f32 %v3501_v53, %v696_v0  ;;  %v723_v15 = vadd.f32 1.0, %v722_v16 }
  0xd5   :  { %7318 = vst [vmem:[#allocation57_spill] sm:$0xff] %v3737_v11  ;;  %v3745_v8 = vpop.eup %2093  ;;  %2119 = vpow2.f32 %v3590_v9  ;;  %v705_v11 = vadd.f32 1.0, %v704_v63  ;;  %v740_v63 = vmul.f32 -0.5, %v3541_v48  ;;  %v749_v0 = vmul.f32 -0.5, %v3546_v26 }
  0xd6   :  { %7320 = vst [vmem:[#allocation59_spill] sm:$0xff] %v3745_v8  ;;  %v3754_v30 = vpop.eup %2095  ;;  %2121 = vpow2.f32 %v3593_v24  ;;  %7322 = vst [vmem:[#allocation61_spill] sm:$0xff] %v3758_v19  ;;  %v3781_v9 = vadd.f32 1.0, %v3531_v62  ;;  %v3791_v16 = vadd.f32 1.0, %v3536_v31  ;;  %v732_v24 = vadd.f32 1.0, %v731_v47 }
  0xd7   :  { %7321 = vst [vmem:[#allocation60_spill] sm:$0xff] %v3754_v30  ;;  %v3761_v8 = vpop.eup %2097  ;;  %2123 = vpow2.f32 %v3598_v4  ;;  %v3778_v4 = vmul.f32 %v3512_v2, %v705_v11  ;;  %v3813_v11 = vadd.f32 1.0, %v3546_v26  ;;  %v7475_v6 = vld [vmem:[#allocation22_spill] sm:$0xff] }
  0xd8   :  { %7323 = vst [vmem:[#allocation62_spill] sm:$0xff] %v3761_v8  ;;  %v3769_v30 = vpop.eup %2099  ;;  %2125 = vpow2.f32 %v3601_v44  ;;  %v3788_v44 = vmul.f32 %v3523_v50, %v714_v22  ;;  %v758_v8 = vmul.f32 -0.5, %v3551_v12  ;;  %v750_v22 = vadd.f32 1.0, %v749_v0 }
  0xd9   :  { %7324 = vst [vmem:[#allocation63_spill] sm:$0xff] %v3769_v30  ;;  %v3774_v19 = vpop.eup %2101  ;;  %2127 = vpow2.f32 %v3607_v14  ;;  %7326 = vst [vmem:[#allocation65_spill] sm:$0xff] %v3778_v4  ;;  %v776_v0 = vmul.f32 -0.5, %v3573_v3 }
  0xda   :  { %7325 = vst [vmem:[#allocation64_spill] sm:$0xff] %v3774_v19  ;;  %v3784_v30 = vpop.eup %2103  ;;  %2129 = vpow2.f32 %v3610_v7  ;;  %7328 = vst [vmem:[#allocation67_spill] sm:$0xff] %v3788_v44  ;;  %v741_v19 = vadd.f32 1.0, %v740_v63  ;;  %v3802_v7 = vmul.f32 %v3531_v62, %v723_v15  ;;  %v785_v15 = vmul.f32 -0.5, %v3584_v40 }
  0xdb   :  { %7327 = vst [vmem:[#allocation66_spill] sm:$0xff] %v3784_v30  ;;  %v3793_v14 = vpop.eup %2105  ;;  %2131 = vpow2.f32 %v3616_v54  ;;  %v767_v30 = vmul.f32 -0.5, %v3562_v51  ;;  %v3809_v54 = vadd.f32 1.0, %v3541_v48 }
  0xdc   :  { %7329 = vst [vmem:[#allocation68_spill] sm:$0xff] %v3793_v14  ;;  %v3798_v4 = vpop.eup %2107  ;;  %2133 = vpow2.f32 %v3619_v18  ;;  %7331 = vst [vmem:[#allocation109_spill] sm:$0xff] %v3802_v7  ;;  %v3819_v18 = vmul.f32 %v3536_v31, %v732_v24  ;;  %v3827_v63 = vmul.f32 %v3541_v48, %v741_v19  ;;  %v3844_v19 = vadd.f32 1.0, %v3562_v51 }
  0xdd   :  { %7330 = vst [vmem:[#allocation108_spill] sm:$0xff] %v3798_v4  ;;  %v3805_v47 = vpop.eup %2109  ;;  %2135 = vpow2.f32 %v3625_v60  ;;  %v768_v24 = vadd.f32 1.0, %v767_v30  ;;  %v777_v30 = vadd.f32 1.0, %v776_v0  ;;  %v3869_v0 = vadd.f32 1.0, %v3584_v40 }
  0xde   :  { %7332 = vst [vmem:[#allocation110_spill] sm:$0xff] %v3805_v47  ;;  %v3815_v4 = vpop.eup %2111  ;;  %2137 = vpow2.f32 %v3628_v38  ;;  %7334 = vst [vmem:[#allocation112_spill] sm:$0xff] %v3819_v18  ;;  %v3830_v47 = vadd.f32 1.0, %v3551_v12  ;;  %v3836_v38 = vmul.f32 %v3546_v26, %v750_v22  ;;  %v803_v22 = vmul.f32 -0.5, %v3604_v20 }
  0xdf   :  { %7333 = vst [vmem:[#allocation111_spill] sm:$0xff] %v3815_v4  ;;  %v3823_v60 = vpop.eup %2113  ;;  %2139 = vpow2.f32 %v3631_v32  ;;  %7336 = vst [vmem:[#allocation114_spill] sm:$0xff] %v3827_v63  ;;  %v759_v4 = vadd.f32 1.0, %v758_v8  ;;  %v794_v8 = vmul.f32 -0.5, %v3595_v46  ;;  %v3859_v32 = vadd.f32 1.0, %v3573_v3 }
  0xe0   :  { %7335 = vst [vmem:[#allocation113_spill] sm:$0xff] %v3823_v60  ;;  %v3832_v14 = vpop.eup %2115  ;;  %2141 = vpow2.f32 %v3636_v42  ;;  %7338 = vst [vmem:[#allocation116_spill] sm:$0xff] %v3836_v38  ;;  %v786_v42 = vadd.f32 1.0, %v785_v15  ;;  %v7381_v63 = vand.u32 2147483647, %v3457_v55  ;;  %v7503_v7 = vmov 0 }
  0xe1   :  { %7337 = vst [vmem:[#allocation115_spill] sm:$0xff] %v3832_v14  ;;  %v3839_v60 = vpop.eup %2117  ;;  %2143 = vpow2.f32 %v3639_v59  ;;  %v3856_v59 = vmul.f32 %v3551_v12, %v759_v4  ;;  %v3891_v4 = vadd.f32 1.0, %v3604_v20  ;;  %v7389_v55 = vand.u32 2147483647, %v3479_v13 }
  0xe2   :  { %7339 = vst [vmem:[#allocation117_spill] sm:$0xff] %v3839_v60  ;;  %v3847_v14 = vpop.eup %2119  ;;  %2145 = vlog2.f32 %v3644_v52  ;;  %v3866_v52 = vmul.f32 %v3562_v51, %v768_v24  ;;  %v812_v60 = vmul.f32 -0.5, %v3613_v56  ;;  %v804_v24 = vadd.f32 1.0, %v803_v22 }
  0xe3   :  { %7340 = vst [vmem:[#allocation118_spill] sm:$0xff] %v3847_v14  ;;  %v3852_v38 = vpop.eup %2121  ;;  %2147 = vlog2.f32 %v3654_v27  ;;  %7342 = vst [vmem:[#allocation120_spill] sm:$0xff] %v3856_v59  ;;  %v830_v22 = vmul.f32 -0.5, %v3633_v1  ;;  %vm3993_vm4 = vcmp.lt.f32.partialorder %v7381_v63, 0.0004427343  ;;  %v7390_v63 = vmov 0 }
  0xe4   :  { %7341 = vst [vmem:[#allocation119_spill] sm:$0xff] %v3852_v38  ;;  %v3862_v14 = vpop.eup %2123  ;;  %2149 = vlog2.f32 %v3658_v49  ;;  %7344 = vst [vmem:[#allocation122_spill] sm:$0xff] %v3866_v52  ;;  %v795_v38 = vadd.f32 1.0, %v794_v8  ;;  %v3880_v49 = vmul.f32 %v3573_v3, %v777_v30  ;;  %v7355_v30 = vld [vmem:[#allocation94_spill] sm:$0xff]  ;;  %v7374_v52 = vmov 0 }
  0xe5   :  { %7343 = vst [vmem:[#allocation121_spill] sm:$0xff] %v3862_v14  ;;  %v3871_v27 = vpop.eup %2125  ;;  %2151 = vlog2.f32 %v3674_v28  ;;  %v821_v14 = vmul.f32 -0.5, %v3622_v34  ;;  %v3887_v28 = vadd.f32 1.0, %v3595_v46  ;;  %vm4010_vm6 = vcmp.lt.f32.partialorder %v7389_v55, 0.0004427343 }
  0xe6   :  { %7345 = vst [vmem:[#allocation123_spill] sm:$0xff] %v3871_v27  ;;  %v3876_v59 = vpop.eup %2127  ;;  %2153 = vlog2.f32 %v3688_v25  ;;  %7347 = vst [vmem:[#allocation125_spill] sm:$0xff] %v3880_v49  ;;  %v3897_v25 = vmul.f32 %v3584_v40, %v786_v42  ;;  %v3905_v8 = vmul.f32 %v3595_v46, %v795_v38  ;;  %v3922_v38 = vadd.f32 1.0, %v3622_v34 }
  0xe7   :  { %7346 = vst [vmem:[#allocation124_spill] sm:$0xff] %v3876_v59  ;;  %v3883_v15 = vpop.eup %2129  ;;  %2155 = vlog2.f32 %v3703_v21  ;;  %v822_v42 = vadd.f32 1.0, %v821_v14  ;;  %v831_v14 = vadd.f32 1.0, %v830_v22  ;;  %v7364_v22 = vmov 0 }
  0xe8   :  { %7348 = vst [vmem:[#allocation126_spill] sm:$0xff] %v3883_v15  ;;  %v3893_v59 = vpop.eup %2131  ;;  %2157 = vlog2.f32 %v3713_v10  ;;  %7350 = vst [vmem:[#allocation128_spill] sm:$0xff] %v3897_v25  ;;  %v3908_v15 = vadd.f32 1.0, %v3613_v56  ;;  %v3914_v10 = vmul.f32 %v3604_v20, %v804_v24  ;;  %v839_v25 = vmul.f32 -0.5, %v7355_v30  ;;  %v7359_v24 = vld [vmem:[#allocation15_spill] sm:$0xff] }
  0xe9   :  { %7349 = vst [vmem:[#allocation127_spill] sm:$0xff] %v3893_v59  ;;  %v3901_v21 = vpop.eup %2133  ;;  %2159 = vlog2.f32 %v3731_v43  ;;  %7352 = vst [vmem:[#allocation130_spill] sm:$0xff] %v3905_v8  ;;  %v813_v59 = vadd.f32 1.0, %v812_v60  ;;  %v7357_v60 = vld [vmem:[#allocation95_spill] sm:$0xff]  ;;  %v3937_v43 = vadd.f32 1.0, %v3633_v1  ;;  %v7391_v63 = vsel %vm4010_vm6, 4294967295, %v7390_v63 }
  0xea   :  { %7351 = vst [vmem:[#allocation129_spill] sm:$0xff] %v3901_v21  ;;  %v3910_v27 = vpop.eup %2135  ;;  %2161 = vlog2.f32 %v3735_v41  ;;  %7354 = vst [vmem:[#allocation132_spill] sm:$0xff] %v3914_v10  ;;  %v848_v8 = vmul.f32 -0.5, %v7357_v60  ;;  %v857_v10 = vmul.f32 -0.5, %v7359_v24  ;;  %v840_v41 = vadd.f32 1.0, %v839_v25 }
  0xeb   :  { %7353 = vst [vmem:[#allocation131_spill] sm:$0xff] %v3910_v27  ;;  %v3917_v21 = vpop.eup %2137  ;;  %2163 = vlog2.f32 %v3752_v58  ;;  %v3934_v58 = vmul.f32 %v3613_v56, %v813_v59  ;;  %v3953_v59 = vadd.f32 1.0, %v7355_v30  ;;  %7392 = vst [vmem:[#allocation143_spill] sm:$0xff] %v7391_v63  ;;  %v872_v13 = vadd.f32 1.0, %v3667_v23 }
  0xec   :  { %7356 = vst [vmem:[#allocation94_spill] sm:$0xff] %v3917_v21  ;;  %v3925_v27 = vpop.eup %2139  ;;  %2165 = vlog2.f32 %v3766_v61  ;;  %v7363_v61 = vand.u32 2147483647, %v3416_v39  ;;  %v7368_v21 = vand.u32 2147483647, %v3426_v17  ;;  %v3972_v17 = vmul.f32 %v3633_v1, %v831_v14 }
  0xed   :  { %7358 = vst [vmem:[#allocation133_spill] sm:$0xff] %v3925_v27  ;;  %v3930_v49 = vpop.eup %2141  ;;  %2167 = vlog2.f32 %v3781_v9  ;;  %7361 = vst [vmem:[#allocation135_spill] sm:$0xff] %v3934_v58  ;;  %v3950_v9 = vmul.f32 %v3622_v34, %v822_v42  ;;  %v858_v25 = vadd.f32 1.0, %v857_v10  ;;  %v7378_v39 = vmov 0 }
  0xee   :  { %7360 = vst [vmem:[#allocation134_spill] sm:$0xff] %v3930_v49  ;;  %v3940_v27 = vpop.eup %2143  ;;  %vm3944_vm0 = vcmp.lt.f32.partialorder %v7363_v61, 0.0004427343  ;;  %2169 = vlog2.f32 %v3791_v16  ;;  %vm3957_vm1 = vcmp.lt.f32.partialorder %v7368_v21, 0.0004427343  ;;  %v849_v61 = vadd.f32 1.0, %v848_v8 }
  0xef   :  { %7362 = vst [vmem:[#allocation136_spill] sm:$0xff] %v3940_v27  ;;  %v7365_v22 = vsel %vm3944_vm0, 4294967295, %v7364_v22  ;;  %7367 = vst [vmem:[#allocation138_spill] sm:$0xff] %v3950_v9  ;;  %v2146_v49 = vpop.eup %2145  ;;  %v7369_v27 = vmov 0  ;;  %2171 = vlog2.f32 %v3809_v54  ;;  %v7372_v16 = vld [vmem:[#allocation97_spill] sm:$0xff]  ;;  %v875_v54 = vmul.f32 -0.5, %v3667_v23 }
  0xf0   :  { %7366 = vst [vmem:[#allocation137_spill] sm:$0xff] %v7365_v22  ;;  %v7370_v27 = vsel %vm3957_vm1, 4294967295, %v7369_v27  ;;  %v866_v58 = vmul.f32 -0.5, %v7372_v16  ;;  %v2148_v42 = vpop.eup %2147  ;;  %v7373_v9 = vand.u32 2147483647, %v3436_v45  ;;  %2173 = vlog2.f32 %v3813_v11  ;;  %7376 = vst [vmem:[#allocation97_spill] sm:$0xff] %v3972_v17 }
  0xf1   :  { %7371 = vst [vmem:[#allocation139_spill] sm:$0xff] %v7370_v27  ;;  %v2150_v21 = vpop.eup %2149  ;;  %v7377_v8 = vand.u32 2147483647, %v3446_v36  ;;  %2175 = vlog2.f32 %v3830_v47  ;;  %v845_v45 = vadd.f32 1.0, %v7357_v60  ;;  %v884_v11 = vmul.f32 -0.5, %v3676_v35  ;;  %v7427_v27 = vld [vmem:[#allocation21_spill] sm:$0xff] }
  0xf2   :  { %vm3966_vm2 = vcmp.lt.f32.partialorder %v7373_v9, 0.0004427343  ;;  %v2152_v14 = vpop.eup %2151  ;;  %2177 = vlog2.f32 %v3844_v19  ;;  %v3987_v10 = vmul.f32 %v7355_v30, %v840_v41  ;;  %v854_v36 = vadd.f32 1.0, %v7359_v24 }
  0xf3   :  { %v7375_v52 = vsel %vm3966_vm2, 4294967295, %v7374_v52  ;;  %vm3977_vm3 = vcmp.lt.f32.partialorder %v7377_v8, 0.0004427343  ;;  %v2154_v17 = vpop.eup %2153  ;;  %v7382_v47 = vmov 0  ;;  %v7384_v9 = vand.u32 2147483647, %v3468_v37 }
  0xf4   :  { %v7379_v39 = vsel %vm3977_vm3, 4294967295, %v7378_v39  ;;  %7380 = vst [vmem:[#allocation140_spill] sm:$0xff] %v3987_v10  ;;  %v7383_v47 = vsel %vm3993_vm4, 4294967295, %v7382_v47  ;;  %v7385_v1 = vmov 0  ;;  %2179 = vlog2.f32 %v3859_v32  ;;  %v2156_v10 = vpop.eup %2155 }
  0xf5   :  { %vm3999_vm5 = vcmp.lt.f32.partialorder %v7384_v9, 0.0004427343  ;;  %v4005_v19 = vmul.f32 %v7357_v60, %v849_v61  ;;  %v863_v41 = vadd.f32 1.0, %v7372_v16  ;;  %v867_v8 = vadd.f32 1.0, %v866_v58  ;;  %v2158_v61 = vpop.eup %2157 }
  0xf6   :  { %v7386_v1 = vsel %vm3999_vm5, 4294967295, %v7385_v1  ;;  %2181 = vlog2.f32 %v3869_v0  ;;  %v4016_v37 = vmul.f32 %v7359_v24, %v858_v25  ;;  %v876_v9 = vadd.f32 1.0, %v875_v54  ;;  %v2160_v55 = vpop.eup %2159 }
  0xf7   :  { %7387 = vst [vmem:[#allocation141_spill] sm:$0xff] %v7386_v1  ;;  %7388 = vst [vmem:[#allocation142_spill] sm:$0xff] %v4005_v19  ;;  %v4019_v19 = vmul.f32 0.6931472, %v2146_v49  ;;  %v7395_v58 = vand.u32 2147483647, %v3490_v57  ;;  %2183 = vlog2.f32 %v3887_v28 }
  0xf8   :  { %7393 = vst [vmem:[#allocation144_spill] sm:$0xff] %v4016_v37  ;;  %v7396_v60 = vmov 0  ;;  %v885_v0 = vadd.f32 1.0, %v884_v11  ;;  %v4029_v25 = vmul.f32 0.6931472, %v2148_v42  ;;  %v7400_v54 = vmov 0  ;;  %v2162_v42 = vpop.eup %2161 }
  0xf9   :  { %7394 = vst [vmem:[#allocation145_spill] sm:$0xff] %v4019_v19  ;;  %vm4023_vm7 = vcmp.lt.f32.partialorder %v7395_v58, 0.0004427343  ;;  %v7399_v32 = vand.u32 2147483647, %v3501_v53  ;;  %v7404_v49 = vmov 0  ;;  %2185 = vlog2.f32 %v3891_v4 }
  0xfa   :  { %v7397_v60 = vsel %vm4023_vm7, 4294967295, %v7396_v60  ;;  %v7403_v57 = vand.u32 2147483647, %v3512_v2  ;;  %v881_v11 = vadd.f32 1.0, %v3676_v35  ;;  %v4046_v58 = vmul.f32 0.6931472, %v2150_v21 }
  0xfb   :  { %7398 = vst [vmem:[#allocation146_spill] sm:$0xff] %v7397_v60  ;;  %vm4033_vm8 = vcmp.lt.f32.partialorder %v7399_v32, 0.0004427343  ;;  %2187 = vlog2.f32 %v3908_v15  ;;  %v4050_v53 = vmul.f32 %v7372_v16, %v867_v8  ;;  %v7408_v32 = vld [vmem:[#allocation18_spill] sm:$0xff]  ;;  %v4053_v37 = vmul.f32 0.6931472, %v2152_v14 }
  0xfc   :  { %v7401_v54 = vsel %vm4033_vm8, 4294967295, %v7400_v54  ;;  %vm4039_vm9 = vcmp.lt.f32.partialorder %v7403_v57, 0.0004427343  ;;  %v893_v2 = vmul.f32 -0.5, %v7408_v32  ;;  %v2164_v57 = vpop.eup %2163  ;;  %v7410_v24 = vand.u32 2147483647, %v3523_v50 }
  0xfd   :  { %7402 = vst [vmem:[#allocation147_spill] sm:$0xff] %v7401_v54  ;;  %v7405_v49 = vsel %vm4039_vm9, 4294967295, %v7404_v49  ;;  %7407 = vst [vmem:[#allocation149_spill] sm:$0xff] %v4050_v53  ;;  %v7411_v4 = vmov 0  ;;  %2189 = vlog2.f32 %v3922_v38  ;;  %v4063_v21 = vmul.f32 %v3667_v23, %v876_v9  ;;  %v2166_v8 = vpop.eup %2165 }
  0xfe   :  { %7406 = vst [vmem:[#allocation148_spill] sm:$0xff] %v7405_v49  ;;  %7409 = vst [vmem:[#allocation18_spill] sm:$0xff] %v4053_v37  ;;  %vm4057_vm10 = vcmp.lt.f32.partialorder %v7410_v24, 0.0004427343  ;;  %v7415_v53 = vand.u32 2147483647, %v3531_v62  ;;  %2191 = vlog2.f32 %v3937_v43  ;;  %v4084_v9 = vmul.f32 %v3676_v35, %v885_v0  ;;  %v2168_v14 = vpop.eup %2167 }
  0xff   :  { %v7412_v4 = vsel %vm4057_vm10, 4294967295, %v7411_v4  ;;  %7413 = vst [vmem:[#allocation150_spill] sm:$0xff] %v4063_v21  ;;  %v7416_v50 = vmov 0  ;;  %v7419_v24 = vand.u32 2147483647, %v3536_v31  ;;  %v7420_v38 = vmov 0 }
 0x100   :  { %vm4072_vm11 = vcmp.lt.f32.partialorder %v7415_v53, 0.0004427343  ;;  %7423 = vst [vmem:[#allocation153_spill] sm:$0xff] %v4084_v9  ;;  %v890_v15 = vadd.f32 1.0, %v7408_v32  ;;  %v7424_v62 = vld [vmem:[#allocation98_spill] sm:$0xff]  ;;  %2193 = vlog2.f32 %v3953_v59  ;;  %v7425_v43 = vld [vmem:[#allocation17_spill] sm:$0xff] }
 0x101   :  { %v7417_v50 = vsel %vm4072_vm11, 4294967295, %v7416_v50  ;;  %vm4078_vm12 = vcmp.lt.f32.partialorder %v7419_v24, 0.0004427343  ;;  %v4091_v19 = vmul.f32 0.6931472, %v2154_v17  ;;  %v2170_v24 = vpop.eup %2169  ;;  %2195 = vlog2.f32 %v845_v45 }
 0x102   :  { %7418 = vst [vmem:[#allocation151_spill] sm:$0xff] %v7417_v50  ;;  %v7421_v38 = vsel %vm4078_vm12, 4294967295, %v7420_v38  ;;  %v4093_v31 = vmul.f32 0.6931472, %v2156_v10  ;;  %v4100_v28 = vmul.f32 0.6931472, %v2158_v61  ;;  %v2172_v9 = vpop.eup %2171  ;;  %2197 = vlog2.f32 %v854_v36 }
 0x103   :  { %7422 = vst [vmem:[#allocation152_spill] sm:$0xff] %v7421_v38  ;;  %v894_v22 = vadd.f32 1.0, %v893_v2  ;;  %v4106_v10 = vmul.f32 0.6931472, %v2160_v55  ;;  %v7428_v59 = vand.u32 2147483647, %v3541_v48  ;;  %v2174_v48 = vpop.eup %2173  ;;  %2199 = vlog2.f32 %v863_v41 }
 0x104   :  { %7426 = vst [vmem:[#allocation98_spill] sm:$0xff] %v4100_v28  ;;  %v7431_v0 = vand.u32 2147483647, %v3546_v26  ;;  %v7432_v61 = vmov 0  ;;  %v7435_v45 = vand.u32 2147483647, %v3551_v12  ;;  %v2176_v37 = vpop.eup %2175  ;;  %2201 = vlog2.f32 %v872_v13 }
 0x105   :  { %vm4110_vm13 = vcmp.lt.f32.partialorder %v7428_v59, 0.0004427343  ;;  %v7436_v2 = vmov 0  ;;  %v4127_v59 = vmul.f32 0.6931472, %v2162_v42  ;;  %v7445_v12 = vld [vmem:[#allocation19_spill] sm:$0xff]  ;;  %2203 = vlog2.f32 %v881_v11 }
 0x106   :  { %vm4116_vm14 = vcmp.lt.f32.partialorder %v7431_v0, 0.0004427343  ;;  %vm4122_vm15 = vcmp.lt.f32.partialorder %v7435_v45, 0.0004427343  ;;  %v4129_v17 = vmul.f32 0.6931472, %v2164_v57  ;;  %2205 = vlog2.f32 %v890_v15 }
 0x107   :  { %v7433_v61 = vsel %vm4116_vm14, 4294967295, %v7432_v61  ;;  %v7437_v2 = vsel %vm4122_vm15, 4294967295, %v7436_v2  ;;  %7439 = vst [vmem:[#allocation154_spill] sm:$0xff] %v4127_v59  ;;  %v7441_v26 = vand.u32 2147483647, %v3562_v51  ;;  %v7442_v0 = vmov 0 }
 0x108   :  { %7434 = vst [vmem:[#allocation17_spill] sm:$0xff] %v7433_v61  ;;  %7438 = vst [vmem:[#allocation21_spill] sm:$0xff] %v7437_v2  ;;  %v902_v45 = vmul.f32 -0.5, %v7445_v12  ;;  %v7446_v51 = vand.u32 2147483647, %v3573_v3  ;;  %v7447_v57 = vmov 0 }
 0x109   :  { %7440 = vst [vmem:[#allocation155_spill] sm:$0xff] %v4129_v17  ;;  %vm4133_vm3 = vcmp.lt.f32.partialorder %v7441_v26, 0.0004427343  ;;  %v899_v41 = vadd.f32 1.0, %v7445_v12  ;;  %v2178_v26 = vpop.eup %2177  ;;  %v4157_v55 = vmul.f32 0.6931472, %v2166_v8 }
 0x10a   :  { %v7443_v0 = vsel %vm4133_vm3, 4294967295, %v7442_v0  ;;  %vm4148_vm2 = vcmp.lt.f32.partialorder %v7446_v51, 0.0004427343  ;;  %v7450_v1 = vand.u32 2147483647, %v3584_v40  ;;  %v7454_v13 = vmov 0  ;;  %v2180_v63 = vpop.eup %2179 }
 0x10b   :  { %7444 = vst [vmem:[#allocation156_spill] sm:$0xff] %v7443_v0  ;;  %v7448_v57 = vsel %vm4148_vm2, 4294967295, %v7447_v57  ;;  %7449 = vst [vmem:[#allocation19_spill] sm:$0xff] %v4157_v55  ;;  %v7453_v3 = vand.u32 2147483647, %v3595_v46  ;;  %v4172_v51 = vmul.f32 %v7408_v32, %v894_v22  ;;  %v7460_v36 = vld [vmem:[#allocation20_spill] sm:$0xff]  ;;  %2207 = vlog2.f32 %v899_v41 }
 0x10c   :  { %vm4161_vm5 = vcmp.lt.f32.partialorder %v7450_v1, 0.0004427343  ;;  %v4178_v1 = vmul.f32 0.6931472, %v2168_v14  ;;  %v4180_v8 = vmul.f32 0.6931472, %v2170_v24 }
 0x10d   :  { %vm4167_vm4 = vcmp.lt.f32.partialorder %v7453_v3, 0.0004427343  ;;  %7457 = vst [vmem:[#allocation158_spill] sm:$0xff] %v4172_v51  ;;  %v908_v46 = vadd.f32 1.0, %v7460_v36  ;;  %v2182_v3 = vpop.eup %2181  ;;  %v7463_v60 = vand.u32 2147483647, %v3604_v20 }
 0x10e   :  { %v7455_v13 = vsel %vm4167_vm4, 4294967295, %v7454_v13  ;;  %7458 = vst [vmem:[#allocation159_spill] sm:$0xff] %v4178_v1  ;;  %7459 = vst [vmem:[#allocation160_spill] sm:$0xff] %v4180_v8  ;;  %v7464_v14 = vmov 0  ;;  %v7467_v24 = vand.u32 2147483647, %v3613_v56  ;;  %v2184_v11 = vpop.eup %2183 }
 0x10f   :  { %7456 = vst [vmem:[#allocation157_spill] sm:$0xff] %v7455_v13  ;;  %vm4193_vm7 = vcmp.lt.f32.partialorder %v7463_v60, 0.0004427343  ;;  %v7468_v40 = vmov 0  ;;  %v903_v54 = vadd.f32 1.0, %v902_v45  ;;  %v7472_v49 = vmov 0 }
 0x110   :  { %v7465_v14 = vsel %vm4193_vm7, 4294967295, %v7464_v14  ;;  %vm4199_vm6 = vcmp.lt.f32.partialorder %v7467_v24, 0.0004427343  ;;  %v7471_v59 = vand.u32 2147483647, %v3622_v34  ;;  %v911_v60 = vmul.f32 -0.5, %v7460_v36  ;;  %v2186_v24 = vpop.eup %2185 }
 0x111   :  { %7466 = vst [vmem:[#allocation20_spill] sm:$0xff] %v7465_v14  ;;  %v7469_v40 = vsel %vm4199_vm6, 4294967295, %v7468_v40  ;;  %v905_v20 = vand.u32 2147483647, %v7445_v12  ;;  %v917_v56 = vadd.f32 1.0, %v7475_v6  ;;  %v2188_v17 = vpop.eup %2187  ;;  %v7480_v15 = vld [vmem:[#allocation92_spill] sm:$0xff]  ;;  %2209 = vlog2.f32 %v908_v46 }
 0x112   :  { %7470 = vst [vmem:[#allocation161_spill] sm:$0xff] %v7469_v40  ;;  %vm4205_vm8 = vcmp.lt.f32.partialorder %v7471_v59, 0.0004427343  ;;  %v4216_v45 = vmul.f32 0.6931472, %v2172_v9  ;;  %v4243_v41 = vmul.f32 %v7445_v12, %v903_v54  ;;  %v7488_v1 = vld [vmem:[#allocation25_spill] sm:$0xff] }
 0x113   :  { %v7473_v49 = vsel %vm4205_vm8, 4294967295, %v7472_v49  ;;  %v4218_v34 = vmul.f32 0.6931472, %v2174_v48  ;;  %v4220_v59 = vmul.f32 0.6931472, %v2176_v37  ;;  %v7482_v48 = vmov 0  ;;  %v2190_v37 = vpop.eup %2189 }
 0x114   :  { %7474 = vst [vmem:[#allocation162_spill] sm:$0xff] %v7473_v49  ;;  %7476 = vst [vmem:[#allocation22_spill] sm:$0xff] %v4216_v45  ;;  %v4230_v28 = vmul.f32 0.6931472, %v2178_v26  ;;  %v7481_v9 = vand.u32 2147483647, %v7480_v15  ;;  %v2192_v22 = vpop.eup %2191  ;;  %2211 = vlog2.f32 %v917_v56 }
 0x115   :  { %7477 = vst [vmem:[#allocation163_spill] sm:$0xff] %v4218_v34  ;;  %7478 = vst [vmem:[#allocation164_spill] sm:$0xff] %v4220_v59  ;;  %v4238_v55 = vmul.f32 0.6931472, %v2180_v63  ;;  %v4240_v44 = vmul.f32 0.6931472, %v2182_v3  ;;  %v2194_v12 = vpop.eup %2193 }
 0x116   :  { %7479 = vst [vmem:[#allocation165_spill] sm:$0xff] %v4230_v28  ;;  %vm4234_vm10 = vcmp.lt.f32.partialorder %v7481_v9, 0.0004427343  ;;  %7487 = vst [vmem:[#allocation168_spill] sm:$0xff] %v4243_v41  ;;  %v926_v38 = vadd.f32 1.0, %v7488_v1  ;;  %v7491_v9 = vmov 0  ;;  %v2196_v18 = vpop.eup %2195 }
 0x117   :  { %v7483_v48 = vsel %vm4234_vm10, 4294967295, %v7482_v48  ;;  %7485 = vst [vmem:[#allocation166_spill] sm:$0xff] %v4238_v55  ;;  %7486 = vst [vmem:[#allocation167_spill] sm:$0xff] %v4240_v44  ;;  %v4246_v26 = vmul.f32 0.6931472, %v2184_v11  ;;  %v7493_v46 = vld [vmem:[#allocation95_spill] sm:$0xff]  ;;  %v2198_v0 = vpop.eup %2197 }
 0x118   :  { %7484 = vst [vmem:[#allocation92_spill] sm:$0xff] %v7483_v48  ;;  %v7490_v15 = vand.u32 2147483647, %v7355_v30  ;;  %v7494_v8 = vand.u32 2147483647, %v7493_v46  ;;  %v7495_v63 = vmov 0  ;;  %2213 = vlog2.f32 %v926_v38 }
 0x119   :  { %7489 = vst [vmem:[#allocation25_spill] sm:$0xff] %v4246_v26  ;;  %v912_v3 = vadd.f32 1.0, %v911_v60  ;;  %v920_v54 = vmul.f32 -0.5, %v7475_v6  ;;  %v7498_v11 = vld [vmem:[#allocation114_spill] sm:$0xff]  ;;  %v7501_v60 = vld [vmem:[#allocation15_spill] sm:$0xff]  ;;  %v7507_v30 = vmov 0 }
 0x11a   :  { %vm4250_vm12 = vcmp.lt.f32.partialorder %v7490_v15, 0.0004427343  ;;  %vm4256_vm11 = vcmp.lt.f32.partialorder %v7494_v8, 0.0004427343  ;;  %v7502_v56 = vand.u32 2147483647, %v7501_v60 }
 0x11b   :  { %v7492_v9 = vsel %vm4250_vm12, 4294967295, %v7491_v9  ;;  %v7496_v63 = vsel %vm4256_vm11, 4294967295, %v7495_v63  ;;  %v7506_v50 = vand.u32 2147483647, %v7372_v16  ;;  %v7510_v45 = vld [vmem:[#allocation31_spill] sm:$0xff]  ;;  %v7515_v16 = vmov 0 }
 0x11c   :  { %7497 = vst [vmem:[#allocation95_spill] sm:$0xff] %v7496_v63  ;;  %vm4275_vm9 = vcmp.lt.f32.partialorder %v7502_v56, 0.0004427343  ;;  %v935_v61 = vadd.f32 1.0, %v7510_v45  ;;  %v4290_v59 = vmul.f32 0.6931472, %v2186_v24  ;;  %v4329_v38 = vmul.f32 %v7460_v36, %v912_v3 }
 0x11d   :  { %v7504_v7 = vsel %vm4275_vm9, 4294967295, %v7503_v7  ;;  %vm4281_vm1 = vcmp.lt.f32.partialorder %v7506_v50, 0.0004427343  ;;  %v4292_v60 = vmul.f32 0.6931472, %v2188_v17  ;;  %v7519_v8 = vmov 0 }
 0x11e   :  { %7505 = vst [vmem:[#allocation114_spill] sm:$0xff] %v7504_v7  ;;  %v7508_v30 = vsel %vm4281_vm1, 4294967295, %v7507_v30  ;;  %7512 = vst [vmem:[#allocation31_spill] sm:$0xff] %v4290_v59  ;;  %v7514_v56 = vand.u32 2147483647, %v3667_v23  ;;  %v929_v23 = vmul.f32 -0.5, %v7488_v1  ;;  %2215 = vlog2.f32 %v935_v61 }
 0x11f   :  { %7509 = vst [vmem:[#allocation15_spill] sm:$0xff] %v7508_v30  ;;  %7513 = vst [vmem:[#allocation169_spill] sm:$0xff] %v4292_v60  ;;  %v7518_v50 = vand.u32 2147483647, %v3676_v35  ;;  %v914_v2 = vand.u32 2147483647, %v7460_v36 }
 0x120   :  { %vm4296_vm15 = vcmp.lt.f32.partialorder %v7514_v56, 0.0004427343  ;;  %v4311_v46 = vmul.f32 0.6931472, %v2190_v37  ;;  %v2200_v56 = vpop.eup %2199  ;;  %v7526_v15 = vand.u32 2147483647, %v7408_v32 }
 0x121   :  { %v7516_v16 = vsel %vm4296_vm15, 4294967295, %v7515_v16  ;;  %vm4302_vm14 = vcmp.lt.f32.partialorder %v7518_v50, 0.0004427343  ;;  %v7527_v17 = vmov 0  ;;  %7530 = vst [vmem:[#allocation174_spill] sm:$0xff] %v4329_v38  ;;  %v921_v37 = vadd.f32 1.0, %v920_v54  ;;  %v2202_v55 = vpop.eup %2201 }
 0x122   :  { %7517 = vst [vmem:[#allocation170_spill] sm:$0xff] %v7516_v16  ;;  %v7520_v8 = vsel %vm4302_vm14, 4294967295, %v7519_v8  ;;  %7523 = vst [vmem:[#allocation172_spill] sm:$0xff] %v4311_v46  ;;  %vm4324_vm3 = vcmp.lt.f32.partialorder %v7526_v15, 0.0004427343  ;;  %v7532_v50 = vmov 0  ;;  %v2204_v15 = vpop.eup %2203 }
 0x123   :  { %7521 = vst [vmem:[#allocation171_spill] sm:$0xff] %v7520_v8  ;;  %v7528_v17 = vsel %vm4324_vm3, 4294967295, %v7527_v17  ;;  %v4331_v24 = vmul.f32 0.6931472, %v2192_v22  ;;  %vm4333_vm2 = vcmp.lt.f32.partialorder %v905_v20, 0.0004427343  ;;  %v2206_v40 = vpop.eup %2205  ;;  %v4366_v60 = vmul.f32 %v7475_v6, %v921_v37 }
 0x124   :  { %7529 = vst [vmem:[#allocation173_spill] sm:$0xff] %v7528_v17  ;;  %v7533_v50 = vsel %vm4333_vm2, 4294967295, %v7532_v50  ;;  %v923_v13 = vand.u32 2147483647, %v7475_v6  ;;  %v938_v32 = vmul.f32 -0.5, %v7510_v45  ;;  %v7538_v54 = vld [vmem:[#allocation43_spill] sm:$0xff]  ;;  %v2208_v61 = vpop.eup %2207 }
 0x125   :  { %7531 = vst [vmem:[#allocation175_spill] sm:$0xff] %v4331_v24  ;;  %7534 = vst [vmem:[#allocation176_spill] sm:$0xff] %v7533_v50  ;;  %v4347_v20 = vmul.f32 0.6931472, %v2194_v12  ;;  %v944_v26 = vadd.f32 1.0, %v7538_v54  ;;  %v7541_v35 = vmov 0  ;;  %v2210_v14 = vpop.eup %2209 }
 0x126   :  { %v4354_v44 = vmul.f32 0.6931472, %v2196_v18  ;;  %vm4356_vm4 = vcmp.lt.f32.partialorder %v914_v2, 0.0004427343  ;;  %v930_v36 = vadd.f32 1.0, %v929_v23  ;;  %7546 = vst [vmem:[#allocation181_spill] sm:$0xff] %v4366_v60 }
 0x127   :  { %7537 = vst [vmem:[#allocation177_spill] sm:$0xff] %v4347_v20  ;;  %v7542_v35 = vsel %vm4356_vm4, 4294967295, %v7541_v35  ;;  %v932_v59 = vand.u32 2147483647, %v7488_v1  ;;  %v4361_v22 = vmul.f32 0.6931472, %v2198_v0  ;;  %2217 = vlog2.f32 %v944_v26 }
 0x128   :  { %7540 = vst [vmem:[#allocation43_spill] sm:$0xff] %v4354_v44  ;;  %7543 = vst [vmem:[#allocation178_spill] sm:$0xff] %v7542_v35  ;;  %v4363_v12 = vmul.f32 0.6931472, %v2200_v56  ;;  %v7547_v3 = vld [vmem:[#allocation57_spill] sm:$0xff]  ;;  %v7551_v0 = vmov 0 }
 0x129   :  { %7544 = vst [vmem:[#allocation179_spill] sm:$0xff] %v4361_v22  ;;  %v953_v49 = vadd.f32 1.0, %v7547_v3  ;;  %v4373_v46 = vmul.f32 0.6931472, %v2202_v55  ;;  %v4375_v23 = vmul.f32 0.6931472, %v2204_v15 }
 0x12a   :  { %7545 = vst [vmem:[#allocation180_spill] sm:$0xff] %v4363_v12  ;;  %vm4377_vm8 = vcmp.lt.f32.partialorder %v923_v13, 0.0004427343  ;;  %v939_v56 = vadd.f32 1.0, %v938_v32  ;;  %v941_v6 = vand.u32 2147483647, %v7510_v45  ;;  %v4395_v32 = vmul.f32 %v7488_v1, %v930_v36 }
 0x12b   :  { %7549 = vst [vmem:[#allocation57_spill] sm:$0xff] %v4373_v46  ;;  %7550 = vst [vmem:[#allocation182_spill] sm:$0xff] %v4375_v23  ;;  %v7552_v0 = vsel %vm4377_vm8, 4294967295, %v7551_v0  ;;  %v947_v37 = vmul.f32 -0.5, %v7538_v54  ;;  %v7554_v28 = vld [vmem:[#allocation59_spill] sm:$0xff]  ;;  %v7555_v48 = vld [vmem:[#allocation140_spill] sm:$0xff]  ;;  %2219 = vlog2.f32 %v953_v49 }
 0x12c   :  { %7553 = vst [vmem:[#allocation183_spill] sm:$0xff] %v7552_v0  ;;  %v962_v34 = vadd.f32 1.0, %v7554_v28  ;;  %v4392_v2 = vmul.f32 0.6931472, %v2206_v40  ;;  %7558 = vst [vmem:[#allocation140_spill] sm:$0xff] %v4395_v32  ;;  %v7562_v63 = vmov 0  ;;  %v2212_v40 = vpop.eup %2211  ;;  %v4420_v55 = vmul.f32 %v7510_v45, %v939_v56 }
 0x12d   :  { %v4405_v20 = vmul.f32 0.6931472, %v2208_v61  ;;  %vm4407_vm12 = vcmp.lt.f32.partialorder %v932_v59, 0.0004427343  ;;  %v7567_v61 = vld [vmem:[#allocation60_spill] sm:$0xff]  ;;  %v7569_v49 = vmov 0  ;;  %v2214_v23 = vpop.eup %2213 }
 0x12e   :  { %7557 = vst [vmem:[#allocation59_spill] sm:$0xff] %v4392_v2  ;;  %v7563_v63 = vsel %vm4407_vm12, 4294967295, %v7562_v63  ;;  %7566 = vst [vmem:[#allocation186_spill] sm:$0xff] %v4420_v55  ;;  %v971_v59 = vadd.f32 1.0, %v7567_v61  ;;  %v4423_v13 = vmul.f32 0.6931472, %v2210_v14  ;;  %2221 = vlog2.f32 %v962_v34  ;;  %v2216_v46 = vpop.eup %2215 }
 0x12f   :  { %7561 = vst [vmem:[#allocation184_spill] sm:$0xff] %v4405_v20  ;;  %7564 = vst [vmem:[#allocation185_spill] sm:$0xff] %v7563_v63  ;;  %vm4425_vm1 = vcmp.lt.f32.partialorder %v941_v6, 0.0004427343  ;;  %v948_v12 = vadd.f32 1.0, %v947_v37  ;;  %v956_v16 = vmul.f32 -0.5, %v7547_v3 }
 0x130   :  { %7568 = vst [vmem:[#allocation60_spill] sm:$0xff] %v4423_v13  ;;  %v7570_v49 = vsel %vm4425_vm1, 4294967295, %v7569_v49  ;;  %v950_v45 = vand.u32 2147483647, %v7538_v54  ;;  %v965_v56 = vmul.f32 -0.5, %v7554_v28  ;;  %v7572_v1 = vld [vmem:[#allocation62_spill] sm:$0xff]  ;;  %2223 = vlog2.f32 %v971_v59 }
 0x131   :  { %7571 = vst [vmem:[#allocation187_spill] sm:$0xff] %v7570_v49  ;;  %v980_v14 = vadd.f32 1.0, %v7572_v1  ;;  %v4441_v37 = vmul.f32 0.6931472, %v2212_v40  ;;  %v974_v34 = vmul.f32 -0.5, %v7567_v61  ;;  %v7574_v36 = vld [vmem:[#allocation63_spill] sm:$0xff]  ;;  %v4453_v40 = vmul.f32 %v7538_v54, %v948_v12 }
 0x132   :  { %v989_v8 = vadd.f32 1.0, %v7574_v36  ;;  %v959_v24 = vand.u32 2147483647, %v7547_v3  ;;  %v983_v2 = vmul.f32 -0.5, %v7572_v1  ;;  %v7575_v51 = vld [vmem:[#allocation64_spill] sm:$0xff]  ;;  %v957_v6 = vadd.f32 1.0, %v956_v16 }
 0x133   :  { %7573 = vst [vmem:[#allocation62_spill] sm:$0xff] %v4441_v37  ;;  %v998_v17 = vadd.f32 1.0, %v7575_v51  ;;  %7576 = vst [vmem:[#allocation63_spill] sm:$0xff] %v4453_v40  ;;  %v7577_v20 = vld [vmem:[#allocation66_spill] sm:$0xff]  ;;  %v4456_v21 = vmul.f32 0.6931472, %v2214_v23  ;;  %2225 = vlog2.f32 %v980_v14 }
 0x134   :  { %v1007_v41 = vadd.f32 1.0, %v7577_v20  ;;  %vm4458_vm2 = vcmp.lt.f32.partialorder %v950_v45, 0.0004427343  ;;  %v7579_v59 = vmov 0  ;;  %v966_v18 = vadd.f32 1.0, %v965_v56  ;;  %v7582_v16 = vld [vmem:[#allocation68_spill] sm:$0xff]  ;;  %v2218_v50 = vpop.eup %2217 }
 0x135   :  { %7578 = vst [vmem:[#allocation64_spill] sm:$0xff] %v4456_v21  ;;  %v7580_v59 = vsel %vm4458_vm2, 4294967295, %v7579_v59  ;;  %v968_v30 = vand.u32 2147483647, %v7554_v28  ;;  %v975_v54 = vadd.f32 1.0, %v974_v34  ;;  %2227 = vlog2.f32 %v989_v8  ;;  %v7588_v34 = vld [vmem:[#allocation108_spill] sm:$0xff] }
 0x136   :  { %7581 = vst [vmem:[#allocation66_spill] sm:$0xff] %v7580_v59  ;;  %v1016_v12 = vadd.f32 1.0, %v7582_v16  ;;  %v4468_v13 = vmul.f32 0.6931472, %v2216_v46  ;;  %vm4470_vm4 = vcmp.lt.f32.partialorder %v959_v24, 0.0004427343  ;;  %2229 = vlog2.f32 %v998_v17 }
 0x137   :  { %v7584_v23 = vmov 0  ;;  %v984_v45 = vadd.f32 1.0, %v983_v2  ;;  %v992_v56 = vmul.f32 -0.5, %v7574_v36  ;;  %v4476_v14 = vmul.f32 %v7547_v3, %v957_v6  ;;  %v5295_v40 = vld [vmem:[#allocation5 + $0xe8] sm:$0xff]  ;;  %v5329_v59 = vld [vmem:[#allocation5 + $0xf8] sm:$0xff] }
 0x138   :  { %7583 = vst [vmem:[#allocation68_spill] sm:$0xff] %v4468_v13  ;;  %v7585_v23 = vsel %vm4470_vm4, 4294967295, %v7584_v23  ;;  %v977_v0 = vand.u32 2147483647, %v7567_v61  ;;  %2231 = vlog2.f32 %v1007_v41  ;;  %v1025_v8 = vadd.f32 1.0, %v7588_v34  ;;  %v2220_v37 = vpop.eup %2219 }
 0x139   :  { %7586 = vst [vmem:[#allocation188_spill] sm:$0xff] %v7585_v23  ;;  %7587 = vst [vmem:[#allocation189_spill] sm:$0xff] %v4476_v14  ;;  %v4485_v24 = vmul.f32 %v7554_v28, %v966_v18  ;;  %vm4487_vm8 = vcmp.lt.f32.partialorder %v968_v30, 0.0004427343  ;;  %v7590_v2 = vmov 0  ;;  %v1001_v17 = vmul.f32 -0.5, %v7575_v51 }
 0x13a   :  { %v7591_v2 = vsel %vm4487_vm8, 4294967295, %v7590_v2  ;;  %v4493_v3 = vmul.f32 %v7567_v61, %v975_v54  ;;  %v986_v41 = vand.u32 2147483647, %v7572_v1  ;;  %v1010_v6 = vmul.f32 -0.5, %v7577_v20 }
 0x13b   :  { %7589 = vst [vmem:[#allocation108_spill] sm:$0xff] %v4485_v24  ;;  %7592 = vst [vmem:[#allocation190_spill] sm:$0xff] %v7591_v2  ;;  %2233 = vlog2.f32 %v1016_v12  ;;  %v4502_v30 = vmul.f32 %v7572_v1, %v984_v45  ;;  %v993_v18 = vadd.f32 1.0, %v992_v56  ;;  %v995_v46 = vand.u32 2147483647, %v7574_v36  ;;  %v7599_v12 = vld [vmem:[#allocation110_spill] sm:$0xff]  ;;  %v2222_v63 = vpop.eup %2221 }
 0x13c   :  { %7593 = vst [vmem:[#allocation191_spill] sm:$0xff] %v4493_v3  ;;  %v4505_v21 = vmul.f32 0.6931472, %v2218_v50  ;;  %vm4507_vm12 = vcmp.lt.f32.partialorder %v977_v0, 0.0004427343  ;;  %v7596_v61 = vmov 0  ;;  %2235 = vlog2.f32 %v1025_v8 }
 0x13d   :  { %7594 = vst [vmem:[#allocation192_spill] sm:$0xff] %v4502_v30  ;;  %v7597_v61 = vsel %vm4507_vm12, 4294967295, %v7596_v61  ;;  %v1019_v54 = vmul.f32 -0.5, %v7582_v16  ;;  %v1034_v32 = vadd.f32 1.0, %v7599_v12  ;;  %v1002_v49 = vadd.f32 1.0, %v1001_v17  ;;  %v7600_v45 = vld [vmem:[#allocation111_spill] sm:$0xff] }
 0x13e   :  { %7595 = vst [vmem:[#allocation193_spill] sm:$0xff] %v4505_v21  ;;  %7598 = vst [vmem:[#allocation194_spill] sm:$0xff] %v7597_v61  ;;  %v1004_v28 = vand.u32 2147483647, %v7575_v51  ;;  %v1028_v1 = vmul.f32 -0.5, %v7588_v34  ;;  %v1043_v56 = vadd.f32 1.0, %v7600_v45  ;;  %v4525_v38 = vmul.f32 %v7574_v36, %v993_v18 }
 0x13f   :  { %v4516_v13 = vmul.f32 0.6931472, %v2220_v37  ;;  %vm4518_vm1 = vcmp.lt.f32.partialorder %v986_v41, 0.0004427343  ;;  %v7602_v50 = vmov 0  ;;  %v1011_v0 = vadd.f32 1.0, %v1010_v6  ;;  %v2224_v41 = vpop.eup %2223 }
 0x140   :  { %v7603_v50 = vsel %vm4518_vm1, 4294967295, %v7602_v50  ;;  %v1013_v55 = vand.u32 2147483647, %v7577_v20  ;;  %v7605_v8 = vld [vmem:[#allocation113_spill] sm:$0xff]  ;;  %vm4527_vm3 = vcmp.lt.f32.partialorder %v995_v46, 0.0004427343  ;;  %2237 = vlog2.f32 %v1034_v32  ;;  %v2226_v15 = vpop.eup %2225 }
 0x141   :  { %7601 = vst [vmem:[#allocation110_spill] sm:$0xff] %v4516_v13  ;;  %7604 = vst [vmem:[#allocation111_spill] sm:$0xff] %v7603_v50  ;;  %v1052_v60 = vadd.f32 1.0, %v7605_v8  ;;  %v7607_v17 = vmov 0  ;;  %v1022_v35 = vand.u32 2147483647, %v7582_v16  ;;  %v4540_v36 = vmul.f32 %v7575_v51, %v1002_v49 }
 0x142   :  { %7606 = vst [vmem:[#allocation113_spill] sm:$0xff] %v4525_v38  ;;  %v7608_v17 = vsel %vm4527_vm3, 4294967295, %v7607_v17  ;;  %v7610_v37 = vld [vmem:[#allocation115_spill] sm:$0xff]  ;;  %v4537_v26 = vmul.f32 0.6931472, %v2222_v63  ;;  %v1020_v7 = vadd.f32 1.0, %v1019_v54  ;;  %2239 = vlog2.f32 %v1043_v56  ;;  %v2228_v32 = vpop.eup %2227 }
 0x143   :  { %7609 = vst [vmem:[#allocation195_spill] sm:$0xff] %v7608_v17  ;;  %v1061_v22 = vadd.f32 1.0, %v7610_v37  ;;  %7612 = vst [vmem:[#allocation196_spill] sm:$0xff] %v4540_v36  ;;  %vm4542_vm14 = vcmp.lt.f32.partialorder %v1004_v28, 0.0004427343  ;;  %v7613_v46 = vmov 0  ;;  %v4552_v54 = vmul.f32 %v7577_v20, %v1011_v0  ;;  %v2230_v63 = vpop.eup %2229 }
 0x144   :  { %7611 = vst [vmem:[#allocation115_spill] sm:$0xff] %v4537_v26  ;;  %v7614_v46 = vsel %vm4542_vm14, 4294967295, %v7613_v46  ;;  %v1029_v18 = vadd.f32 1.0, %v1028_v1  ;;  %v1037_v44 = vmul.f32 -0.5, %v7599_v12  ;;  %vm4554_vm2 = vcmp.lt.f32.partialorder %v1013_v55, 0.0004427343 }
 0x145   :  { %7615 = vst [vmem:[#allocation197_spill] sm:$0xff] %v7614_v46  ;;  %7616 = vst [vmem:[#allocation198_spill] sm:$0xff] %v4552_v54  ;;  %v7617_v51 = vmov 0  ;;  %2241 = vlog2.f32 %v1052_v60  ;;  %v4558_v49 = vmul.f32 0.6931472, %v2224_v41  ;;  %v7621_v28 = vmov 0  ;;  %v2232_v41 = vpop.eup %2231 }
 0x146   :  { %v7618_v51 = vsel %vm4554_vm2, 4294967295, %v7617_v51  ;;  %vm4560_vm15 = vcmp.lt.f32.partialorder %v1022_v35, 0.0004427343  ;;  %v1031_v1 = vand.u32 2147483647, %v7588_v34  ;;  %v1046_v56 = vmul.f32 -0.5, %v7600_v45 }
 0x147   :  { %7619 = vst [vmem:[#allocation199_spill] sm:$0xff] %v7618_v51  ;;  %7620 = vst [vmem:[#allocation200_spill] sm:$0xff] %v4558_v49  ;;  %v7622_v28 = vsel %vm4560_vm15, 4294967295, %v7621_v28  ;;  %2243 = vlog2.f32 %v1061_v22  ;;  %v4571_v60 = vmul.f32 %v7582_v16, %v1020_v7  ;;  %v1055_v55 = vmul.f32 -0.5, %v7605_v8  ;;  %v7625_v35 = vld [vmem:[#allocation117_spill] sm:$0xff]  ;;  %v7646_v61 = vld [vmem:[#allocation118_spill] sm:$0xff] }
 0x148   :  { %7623 = vst [vmem:[#allocation201_spill] sm:$0xff] %v7622_v28  ;;  %v1070_v0 = vadd.f32 1.0, %v7625_v35  ;;  %v4575_v6 = vmul.f32 0.6931472, %v2226_v15  ;;  %v4578_v13 = vmul.f32 %v7588_v34, %v1029_v18  ;;  %v1038_v22 = vadd.f32 1.0, %v1037_v44  ;;  %v2234_v26 = vpop.eup %2233  ;;  %v7656_v54 = vld [vmem:[#allocation123_spill] sm:$0xff] }
 0x149   :  { %7624 = vst [vmem:[#allocation202_spill] sm:$0xff] %v4571_v60  ;;  %v1040_v14 = vand.u32 2147483647, %v7599_v12  ;;  %v4581_v23 = vmul.f32 0.6931472, %v2228_v32  ;;  %v1064_v7 = vmul.f32 -0.5, %v7610_v37  ;;  %v2236_v21 = vpop.eup %2235 }
 0x14a   :  { %7626 = vst [vmem:[#allocation117_spill] sm:$0xff] %v4575_v6  ;;  %7627 = vst [vmem:[#allocation203_spill] sm:$0xff] %v4578_v13  ;;  %v1049_v20 = vand.u32 2147483647, %v7600_v45  ;;  %v1073_v16 = vmul.f32 -0.5, %v7625_v35  ;;  %v7629_v34 = vmov 0  ;;  %2245 = vlog2.f32 %v1070_v0 }
 0x14b   :  { %7628 = vst [vmem:[#allocation204_spill] sm:$0xff] %v4581_v23  ;;  %vm4590_vm8 = vcmp.lt.f32.partialorder %v1031_v1, 0.0004427343  ;;  %v1047_v44 = vadd.f32 1.0, %v1046_v56  ;;  %v1058_v18 = vand.u32 2147483647, %v7605_v8  ;;  %v4604_v1 = vmul.f32 %v7599_v12, %v1038_v22 }
 0x14c   :  { %v7630_v34 = vsel %vm4590_vm8, 4294967295, %v7629_v34  ;;  %v4595_v32 = vmul.f32 0.6931472, %v2230_v63  ;;  %v4597_v24 = vmul.f32 0.6931472, %v2232_v41  ;;  %v1056_v2 = vadd.f32 1.0, %v1055_v55 }
 0x14d   :  { %7631 = vst [vmem:[#allocation205_spill] sm:$0xff] %v7630_v34  ;;  %7634 = vst [vmem:[#allocation208_spill] sm:$0xff] %v4604_v1  ;;  %vm4606_vm12 = vcmp.lt.f32.partialorder %v1040_v14, 0.0004427343  ;;  %v7635_v15 = vmov 0  ;;  %v7639_v0 = vmov 0  ;;  %v4622_v14 = vmul.f32 %v7600_v45, %v1047_v44 }
 0x14e   :  { %7632 = vst [vmem:[#allocation206_spill] sm:$0xff] %v4595_v32  ;;  %7633 = vst [vmem:[#allocation207_spill] sm:$0xff] %v4597_v24  ;;  %v7636_v15 = vsel %vm4606_vm12, 4294967295, %v7635_v15  ;;  %v1067_v63 = vand.u32 2147483647, %v7610_v37  ;;  %v1065_v41 = vadd.f32 1.0, %v1064_v7  ;;  %v4641_v7 = vmul.f32 %v7605_v8, %v1056_v2 }
 0x14f   :  { %7637 = vst [vmem:[#allocation209_spill] sm:$0xff] %v7636_v15  ;;  %v4615_v55 = vmul.f32 0.6931472, %v2234_v26  ;;  %vm4617_vm4 = vcmp.lt.f32.partialorder %v1049_v20, 0.0004427343  ;;  %v1074_v12 = vadd.f32 1.0, %v1073_v16  ;;  %v2238_v16 = vpop.eup %2237 }
 0x150   :  { %v7640_v0 = vsel %vm4617_vm4, 4294967295, %v7639_v0  ;;  %7642 = vst [vmem:[#allocation212_spill] sm:$0xff] %v4622_v14  ;;  %vm4624_vm1 = vcmp.lt.f32.partialorder %v1058_v18, 0.0004427343  ;;  %v7643_v22 = vmov 0  ;;  %v1079_v6 = vadd.f32 1.0, %v7646_v61  ;;  %v2240_v36 = vpop.eup %2239 }
 0x151   :  { %7638 = vst [vmem:[#allocation210_spill] sm:$0xff] %v4615_v55  ;;  %7641 = vst [vmem:[#allocation211_spill] sm:$0xff] %v7640_v0  ;;  %v7644_v22 = vsel %vm4624_vm1, 4294967295, %v7643_v22  ;;  %v1082_v17 = vmul.f32 -0.5, %v7646_v61  ;;  %v4638_v45 = vmul.f32 0.6931472, %v2236_v21  ;;  %v4655_v2 = vmul.f32 %v7610_v37, %v1065_v41 }
 0x152   :  { %7645 = vst [vmem:[#allocation213_spill] sm:$0xff] %v7644_v22  ;;  %7648 = vst [vmem:[#allocation215_spill] sm:$0xff] %v4641_v7  ;;  %vm4643_vm3 = vcmp.lt.f32.partialorder %v1067_v63, 0.0004427343  ;;  %v7649_v44 = vmov 0  ;;  %v7652_v56 = vld [vmem:[#allocation119_spill] sm:$0xff]  ;;  %v4658_v8 = vmul.f32 %v7625_v35, %v1074_v12  ;;  %v2242_v20 = vpop.eup %2241  ;;  %2247 = vlog2.f32 %v1079_v6 }
 0x153   :  { %7647 = vst [vmem:[#allocation214_spill] sm:$0xff] %v4638_v45  ;;  %v7650_v44 = vsel %vm4643_vm3, 4294967295, %v7649_v44  ;;  %v1091_v46 = vmul.f32 -0.5, %v7652_v56  ;;  %v7653_v26 = vld [vmem:[#allocation121_spill] sm:$0xff]  ;;  %7654 = vst [vmem:[#allocation217_spill] sm:$0xff] %v4655_v2  ;;  %v1088_v63 = vadd.f32 1.0, %v7652_v56  ;;  %vm7680_vm1 = vnez %v7375_v52 }
 0x154   :  { %7651 = vst [vmem:[#allocation216_spill] sm:$0xff] %v7650_v44  ;;  %v1100_v32 = vmul.f32 -0.5, %v7653_v26  ;;  %7655 = vst [vmem:[#allocation218_spill] sm:$0xff] %v4658_v8  ;;  %v1083_v18 = vadd.f32 1.0, %v1082_v17  ;;  %v1109_v51 = vmul.f32 -0.5, %v7656_v54  ;;  %v2244_v23 = vpop.eup %2243  ;;  %v1097_v41 = vadd.f32 1.0, %v7653_v26 }
 0x155   :  { %v4667_v37 = vmul.f32 0.6931472, %v2238_v16  ;;  %v7658_v12 = vld [vmem:[#allocation124_spill] sm:$0xff]  ;;  %v4671_v60 = vmul.f32 0.6931472, %v2240_v36  ;;  %v1092_v6 = vadd.f32 1.0, %v1091_v46  ;;  %2249 = vlog2.f32 %v1088_v63 }
 0x156   :  { %v1118_v55 = vmul.f32 -0.5, %v7658_v12  ;;  %v1101_v17 = vadd.f32 1.0, %v1100_v32  ;;  %v1106_v24 = vadd.f32 1.0, %v7656_v54  ;;  %v4674_v28 = vmul.f32 0.6931472, %v2242_v20  ;;  %v7663_v13 = vld [vmem:[#allocation126_spill] sm:$0xff] }
 0x157   :  { %7657 = vst [vmem:[#allocation219_spill] sm:$0xff] %v4667_v37  ;;  %7659 = vst [vmem:[#allocation220_spill] sm:$0xff] %v4671_v60  ;;  %v1115_v34 = vadd.f32 1.0, %v7658_v12  ;;  %v4678_v21 = vmul.f32 0.6931472, %v2244_v23  ;;  %v4681_v16 = vmul.f32 %v7646_v61, %v1083_v18  ;;  %v1110_v45 = vadd.f32 1.0, %v1109_v51  ;;  %v2246_v63 = vpop.eup %2245 }
 0x158   :  { %7660 = vst [vmem:[#allocation221_spill] sm:$0xff] %v4674_v28  ;;  %v1124_v36 = vadd.f32 1.0, %v7663_v13  ;;  %2251 = vlog2.f32 %v1097_v41  ;;  %v1119_v20 = vadd.f32 1.0, %v1118_v55  ;;  %v4694_v18 = vmul.f32 %v7652_v56, %v1092_v6  ;;  %v7670_v46 = vld [vmem:[#allocation70_spill] sm:$0xff]  ;;  %v7672_v32 = vld [vmem:[#allocation16_spill] sm:$0xff]  ;;  %v7673_v38 = vld [vmem:[#allocation145_spill] sm:$0xff] }
 0x159   :  { %7661 = vst [vmem:[#allocation222_spill] sm:$0xff] %v4678_v21  ;;  %7662 = vst [vmem:[#allocation223_spill] sm:$0xff] %v4681_v16  ;;  %v4697_v51 = vmul.f32 %v7653_v26, %v1101_v17  ;;  %2253 = vlog2.f32 %v1106_v24  ;;  %v4710_v23 = vmul.f32 %v7656_v54, %v1110_v45  ;;  %v4713_v24 = vmul.f32 -0.5, %v7663_v13  ;;  %v7675_v45 = vld [vmem:[#allocation71_spill] sm:$0xff]  ;;  %v7679_v2 = vld [vmem:[#allocation72_spill] sm:$0xff] }
 0x15a   :  { %7664 = vst [vmem:[#allocation224_spill] sm:$0xff] %v4694_v18  ;;  %2255 = vlog2.f32 %v1115_v34  ;;  %v4715_v17 = vmul.f32 0.6931472, %v2246_v63  ;;  %v4718_v41 = vmul.f32 %v7658_v12, %v1119_v20  ;;  %v7674_v6 = vsel %vm3944_vm0, %v7672_v32, %v7673_v38  ;;  %v7684_v38 = vld [vmem:[#allocation18_spill] sm:$0xff]  ;;  %v7689_v52 = vld [vmem:[#allocation75_spill] sm:$0xff]  ;;  %v7690_v55 = vld [vmem:[#allocation141_spill] sm:$0xff] }
 0x15b   :  { %7665 = vst [vmem:[#allocation225_spill] sm:$0xff] %v4697_v51  ;;  %7666 = vst [vmem:[#allocation226_spill] sm:$0xff] %v4710_v23  ;;  %2257 = vlog2.f32 %v1124_v36  ;;  %v1196_v21 = vadd.f32 %v7674_v6, %v7670_v46  ;;  %v7676_v23 = vld [vmem:[#allocation139_spill] sm:$0xff]  ;;  %v7681_v20 = vsel %vm7680_vm1, %v7425_v43, %v4046_v58  ;;  %vm7683_vm4 = vnez %v7379_v39  ;;  %v7693_v43 = vld [vmem:[#allocation76_spill] sm:$0xff] }
 0x15c   :  { %7667 = vst [vmem:[#allocation227_spill] sm:$0xff] %v4713_v24  ;;  %7668 = vst [vmem:[#allocation228_spill] sm:$0xff] %v4715_v17  ;;  %vm7677_vm3 = vnez %v7676_v23  ;;  %v1198_v34 = vadd.f32 %v7681_v20, %v7679_v2  ;;  %v7685_v46 = vsel %vm7683_vm4, %v7427_v27, %v7684_v38  ;;  %v7686_v23 = vld [vmem:[#allocation74_spill] sm:$0xff]  ;;  %vm7687_vm0 = vnez %v7383_v47  ;;  %v7694_v27 = vld [vmem:[#allocation143_spill] sm:$0xff] }
 0x15d   :  { %7669 = vst [vmem:[#allocation229_spill] sm:$0xff] %v4718_v41  ;;  %v7678_v36 = vsel %vm7677_vm3, %v7424_v62, %v4029_v25  ;;  %v7682_v41 = vld [vmem:[#allocation73_spill] sm:$0xff]  ;;  %v7688_v25 = vsel %vm7687_vm0, %v3710_v5, %v4091_v19  ;;  %vm7691_vm1 = vnez %v7690_v55  ;;  %vm7695_vm3 = vnez %v7694_v27  ;;  %v7696_v2 = vld [vmem:[#allocation58_spill] sm:$0xff]  ;;  %v7703_v20 = vld [vmem:[#allocation80_spill] sm:$0xff] }
 0x15e   :  { %v1197_v63 = vadd.f32 %v7678_v36, %v7675_v45  ;;  %v4745_v32 = vadd.f32 %v7685_v46, %v7682_v41  ;;  %v4753_v62 = vadd.f32 %v7688_v25, %v7686_v23  ;;  %v7692_v58 = vsel %vm7691_vm1, %v3724_v33, %v4093_v31  ;;  %v7697_v41 = vld [vmem:[#allocation98_spill] sm:$0xff]  ;;  %v7704_v33 = vld [vmem:[#allocation147_spill] sm:$0xff]  ;;  %v7706_v31 = vld [vmem:[#allocation61_spill] sm:$0xff] }
 0x15f   :  { %v4761_v39 = vadd.f32 %v7692_v58, %v7689_v52  ;;  %v7698_v6 = vsel %vm7695_vm3, %v7696_v2, %v7697_v41  ;;  %v7699_v45 = vld [vmem:[#allocation78_spill] sm:$0xff]  ;;  %vm7705_vm0 = vnez %v7704_v33  ;;  %v7709_v25 = vld [vmem:[#allocation81_spill] sm:$0xff]  ;;  %v7710_v52 = vld [vmem:[#allocation148_spill] sm:$0xff]  ;;  %vm7716_vm3 = vnez %v7412_v4 }
 0x160   :  { %v4769_v47 = vadd.f32 %v7698_v6, %v7693_v43  ;;  %v7700_v5 = vld [vmem:[#allocation146_spill] sm:$0xff]  ;;  %vm7711_vm1 = vnez %v7710_v52  ;;  %v7712_v55 = vld [vmem:[#allocation65_spill] sm:$0xff]  ;;  %v7713_v58 = vld [vmem:[#allocation155_spill] sm:$0xff] }
 0x161   :  { %vm7701_vm4 = vnez %v7700_v5  ;;  %v7707_v38 = vld [vmem:[#allocation154_spill] sm:$0xff]  ;;  %v7714_v43 = vsel %vm7711_vm1, %v7712_v55, %v7713_v58  ;;  %v7715_v2 = vld [vmem:[#allocation84_spill] sm:$0xff]  ;;  %v7721_v5 = vld [vmem:[#allocation151_spill] sm:$0xff]  ;;  %v4819_v58 = vpop.eup %2247 }
 0x162   :  { %v7702_v19 = vsel %vm7701_vm4, %v3749_v29, %v4106_v10  ;;  %v7708_v46 = vsel %vm7705_vm0, %v7706_v31, %v7707_v38  ;;  %v4793_v27 = vadd.f32 %v7714_v43, %v7709_v25  ;;  %v7717_v29 = vld [vmem:[#allocation67_spill] sm:$0xff]  ;;  %vm7722_vm4 = vnez %v7721_v5  ;;  %v7729_v25 = vld [vmem:[#allocation112_spill] sm:$0xff]  ;;  %7732 = vst [vmem:[#allocation70_spill] sm:$0xff] %v4819_v58  ;;  %v7733_v43 = vld [vmem:[#allocation90_spill] sm:$0xff] }
 0x163   :  { %v4777_v36 = vadd.f32 %v7702_v19, %v7699_v45  ;;  %v4785_v23 = vadd.f32 %v7708_v46, %v7703_v20  ;;  %v7718_v10 = vld [vmem:[#allocation19_spill] sm:$0xff]  ;;  %v7720_v45 = vld [vmem:[#allocation86_spill] sm:$0xff]  ;;  %v7723_v19 = vld [vmem:[#allocation109_spill] sm:$0xff] }
 0x164   :  { %v7719_v41 = vsel %vm7716_vm3, %v7717_v29, %v7718_v10  ;;  %v7724_v20 = vld [vmem:[#allocation159_spill] sm:$0xff]  ;;  %v7727_v46 = vld [vmem:[#allocation152_spill] sm:$0xff]  ;;  %v7754_v28 = vld [vmem:[#allocation30_spill] sm:$0xff] }
 0x165   :  { %v4801_v6 = vadd.f32 %v7719_v41, %v7715_v2  ;;  %v7725_v33 = vsel %vm7722_vm4, %v7723_v19, %v7724_v20  ;;  %v7726_v38 = vld [vmem:[#allocation87_spill] sm:$0xff]  ;;  %vm7728_vm0 = vnez %v7727_v46  ;;  %v7730_v52 = vld [vmem:[#allocation160_spill] sm:$0xff]  ;;  %v7734_v2 = vld [vmem:[#allocation22_spill] sm:$0xff]  ;;  %vm7755_vm4 = vnez %v7448_v57 }
 0x166   :  { %v4809_v31 = vadd.f32 %v7725_v33, %v7720_v45  ;;  %v7731_v55 = vsel %vm7728_vm0, %v7729_v25, %v7730_v52  ;;  %v7735_v29 = vsel %vm4110_vm13, %v7498_v11, %v7734_v2  ;;  %v7736_v41 = vld [vmem:[#allocation29_spill] sm:$0xff]  ;;  %v7739_v5 = vld [vmem:[#allocation116_spill] sm:$0xff]  ;;  %v7740_v19 = vld [vmem:[#allocation163_spill] sm:$0xff] }
 0x167   :  { %v4817_v4 = vadd.f32 %v7731_v55, %v7726_v38  ;;  %v4827_v10 = vadd.f32 %v7735_v29, %v7733_v43  ;;  %v7737_v45 = vld [vmem:[#allocation17_spill] sm:$0xff]  ;;  %v7745_v25 = vld [vmem:[#allocation120_spill] sm:$0xff]  ;;  %v7751_v43 = vld [vmem:[#allocation122_spill] sm:$0xff] }
 0x168   :  { %vm7738_vm1 = vnez %v7737_v45  ;;  %v7742_v38 = vld [vmem:[#allocation93_spill] sm:$0xff]  ;;  %v7746_v52 = vld [vmem:[#allocation164_spill] sm:$0xff]  ;;  %v7774_v22 = vld [vmem:[#allocation102_spill] sm:$0xff] }
 0x169   :  { %v7741_v20 = vsel %vm7738_vm1, %v7739_v5, %v7740_v19  ;;  %v7743_v46 = vld [vmem:[#allocation21_spill] sm:$0xff]  ;;  %v7748_v44 = vld [vmem:[#allocation96_spill] sm:$0xff]  ;;  %v7757_v5 = vld [vmem:[#allocation166_spill] sm:$0xff] }
 0x16a   :  { %v4835_v33 = vadd.f32 %v7741_v20, %v7736_v41  ;;  %vm7744_vm3 = vnez %v7743_v46  ;;  %v7749_v11 = vld [vmem:[#allocation156_spill] sm:$0xff]  ;;  %v7752_v2 = vld [vmem:[#allocation165_spill] sm:$0xff]  ;;  %v7759_v46 = vld [vmem:[#allocation99_spill] sm:$0xff] }
 0x16b   :  { %v7747_v55 = vsel %vm7744_vm3, %v7745_v25, %v7746_v52  ;;  %vm7750_vm13 = vnez %v7749_v11  ;;  %v7756_v41 = vld [vmem:[#allocation125_spill] sm:$0xff]  ;;  %v7761_v25 = vld [vmem:[#allocation167_spill] sm:$0xff]  ;;  %v7769_v7 = vld [vmem:[#allocation32_spill] sm:$0xff] }
 0x16c   :  { %v4843_v53 = vadd.f32 %v7747_v55, %v7742_v38  ;;  %v7753_v29 = vsel %vm7750_vm13, %v7751_v43, %v7752_v2  ;;  %v7758_v19 = vsel %vm7755_vm4, %v7756_v41, %v7757_v5  ;;  %v7760_v38 = vld [vmem:[#allocation128_spill] sm:$0xff]  ;;  %v7763_v11 = vld [vmem:[#allocation101_spill] sm:$0xff]  ;;  %v7772_v5 = vld [vmem:[#allocation31_spill] sm:$0xff] }
 0x16d   :  { %v4851_v45 = vadd.f32 %v7753_v29, %v7748_v44  ;;  %v4859_v20 = vadd.f32 %v7758_v19, %v7754_v28  ;;  %v7762_v52 = vsel %vm4161_vm5, %v7760_v38, %v7761_v25  ;;  %v7764_v43 = vld [vmem:[#allocation157_spill] sm:$0xff]  ;;  %v7766_v44 = vld [vmem:[#allocation130_spill] sm:$0xff]  ;;  %v7771_v28 = vld [vmem:[#allocation132_spill] sm:$0xff] }
 0x16e   :  { %v4867_v55 = vadd.f32 %v7762_v52, %v7759_v46  ;;  %vm7765_vm0 = vnez %v7764_v43  ;;  %v7767_v2 = vld [vmem:[#allocation25_spill] sm:$0xff]  ;;  %v7773_v19 = vsel %vm4193_vm7, %v7771_v28, %v7772_v5  ;;  %v7776_v46 = vld [vmem:[#allocation135_spill] sm:$0xff]  ;;  %v7790_v0 = vld [vmem:[#allocation104_spill] sm:$0xff] }
 0x16f   :  { %v7768_v29 = vsel %vm7765_vm0, %v7766_v44, %v7767_v2  ;;  %v4883_v42 = vadd.f32 %v7773_v19, %v7769_v7  ;;  %v7777_v25 = vld [vmem:[#allocation169_spill] sm:$0xff]  ;;  %v7779_v60 = vld [vmem:[#allocation103_spill] sm:$0xff]  ;;  %v7780_v44 = vld [vmem:[#allocation162_spill] sm:$0xff] }
 0x170   :  { %v4875_v57 = vadd.f32 %v7768_v29, %v7763_v11  ;;  %v7778_v52 = vsel %vm4199_vm6, %v7776_v46, %v7777_v25  ;;  %vm7781_vm5 = vnez %v7780_v44  ;;  %v7782_v11 = vld [vmem:[#allocation138_spill] sm:$0xff]  ;;  %v7783_v2 = vld [vmem:[#allocation172_spill] sm:$0xff]  ;;  %v7785_v14 = vld [vmem:[#allocation33_spill] sm:$0xff]  ;;  %vm7791_vm6 = vnez %v7492_v9 }
 0x171   :  { %v4891_v43 = vadd.f32 %v7778_v52, %v7774_v22  ;;  %v7784_v29 = vsel %vm7781_vm5, %v7782_v11, %v7783_v2  ;;  %v7787_v7 = vld [vmem:[#allocation97_spill] sm:$0xff]  ;;  %v7788_v5 = vld [vmem:[#allocation175_spill] sm:$0xff]  ;;  %v4917_v52 = vpop.eup %2249  ;;  %v7797_v11 = vld [vmem:[#allocation142_spill] sm:$0xff] }
 0x172   :  { %v4899_v41 = vadd.f32 %v7784_v29, %v7779_v60  ;;  %v7789_v19 = vsel %vm4234_vm10, %v7787_v7, %v7788_v5  ;;  %v7792_v22 = vld [vmem:[#allocation177_spill] sm:$0xff]  ;;  %7794 = vst [vmem:[#allocation137_spill] sm:$0xff] %v4917_v52  ;;  %v7798_v2 = vld [vmem:[#allocation43_spill] sm:$0xff]  ;;  %v7802_v5 = vld [vmem:[#allocation144_spill] sm:$0xff]  ;;  %v4967_v16 = vpop.eup %2251 }
 0x173   :  { %v4907_v38 = vadd.f32 %v7789_v19, %v7785_v14  ;;  %v7793_v46 = vsel %vm7791_vm6, %v7555_v48, %v7792_v22  ;;  %v7795_v60 = vld [vmem:[#allocation105_spill] sm:$0xff]  ;;  %v7799_v29 = vsel %vm4256_vm11, %v7797_v11, %v7798_v2  ;;  %v7800_v14 = vld [vmem:[#allocation34_spill] sm:$0xff]  ;;  %v7803_v9 = vld [vmem:[#allocation179_spill] sm:$0xff]  ;;  %7829 = vst [vmem:[#allocation16_spill] sm:$0xff] %v4967_v16 }
 0x174   :  { %v4915_v25 = vadd.f32 %v7793_v46, %v7790_v0  ;;  %v4925_v28 = vadd.f32 %v7799_v29, %v7795_v60  ;;  %v7804_v19 = vsel %vm4275_vm9, %v7802_v5, %v7803_v9  ;;  %v2273_v48 = vld [vmem:[#allocation5] sm:$0xff]  ;;  %v2274_v0 = vld [vmem:[#allocation5 + $0x8] sm:$0xff]  ;;  %v7806_v46 = vld [vmem:[#allocation15_spill] sm:$0xff] }
 0x175   :  { %v4933_v12 = vadd.f32 %v7804_v19, %v7800_v14  ;;  %vm1260_vm7 = vcmp.ne.f32.partialorder %v2273_v48, -1e+30  ;;  %vm1261_vm10 = vcmp.ne.f32.partialorder %v2274_v0, -1e+30  ;;  %v7805_v22 = vld [vmem:[#allocation106_spill] sm:$0xff]  ;;  %vm7807_vm1 = vnez %v7806_v46  ;;  %v7808_v44 = vld [vmem:[#allocation149_spill] sm:$0xff] }
 0x176   :  { %v7809_v37 = vld [vmem:[#allocation180_spill] sm:$0xff]  ;;  %v7811_v2 = vld [vmem:[#allocation107_spill] sm:$0xff]  ;;  %v7812_v29 = vld [vmem:[#allocation170_spill] sm:$0xff] }
 0x177   :  { %v7810_v11 = vsel %vm7807_vm1, %v7808_v44, %v7809_v37  ;;  %vm7813_vm11 = vnez %v7812_v29  ;;  %v7814_v7 = vld [vmem:[#allocation150_spill] sm:$0xff]  ;;  %v7815_v1 = vld [vmem:[#allocation57_spill] sm:$0xff]  ;;  %v7818_v19 = vld [vmem:[#allocation171_spill] sm:$0xff] }
 0x178   :  { %v4941_v60 = vadd.f32 %v7810_v11, %v7805_v22  ;;  %v7816_v5 = vsel %vm7813_vm11, %v7814_v7, %v7815_v1  ;;  %v7817_v9 = vld [vmem:[#allocation77_spill] sm:$0xff]  ;;  %vm7819_vm9 = vnez %v7818_v19  ;;  %v7821_v51 = vld [vmem:[#allocation182_spill] sm:$0xff]  ;;  %v7823_v18 = vld [vmem:[#allocation35_spill] sm:$0xff] }
 0x179   :  { %v4949_v14 = vadd.f32 %v7816_v5, %v7811_v2  ;;  %v7820_v15 = vld [vmem:[#allocation153_spill] sm:$0xff]  ;;  %v7826_v22 = vld [vmem:[#allocation158_spill] sm:$0xff]  ;;  %v7827_v44 = vld [vmem:[#allocation59_spill] sm:$0xff] }
 0x17a   :  { %v7822_v54 = vsel %vm7819_vm9, %v7820_v15, %v7821_v51  ;;  %v7824_v37 = vld [vmem:[#allocation173_spill] sm:$0xff]  ;;  %v7830_v1 = vld [vmem:[#allocation36_spill] sm:$0xff]  ;;  %v7838_v15 = vld [vmem:[#allocation178_spill] sm:$0xff]  ;;  %vm1325_vm9 = vcmp.ne.f32.partialorder %v2274_v0, 255.0 }
 0x17b   :  { %v4957_v46 = vadd.f32 %v7822_v54, %v7817_v9  ;;  %vm7825_vm3 = vnez %v7824_v37  ;;  %v7831_v2 = vld [vmem:[#allocation176_spill] sm:$0xff]  ;;  %v7837_v54 = vld [vmem:[#allocation37_spill] sm:$0xff]  ;;  %vm7839_vm4 = vnez %v7838_v15  ;;  %v7840_v51 = vld [vmem:[#allocation174_spill] sm:$0xff] }
 0x17c   :  { %v7828_v11 = vsel %vm7825_vm3, %v7826_v22, %v7827_v44  ;;  %vm7832_vm13 = vnez %v7831_v2  ;;  %v7833_v7 = vld [vmem:[#allocation168_spill] sm:$0xff]  ;;  %v7845_v22 = vld [vmem:[#allocation183_spill] sm:$0xff]  ;;  %v7847_v44 = vld [vmem:[#allocation181_spill] sm:$0xff]  ;;  %vm1324_vm3 = vcmp.ne.f32.partialorder %v2273_v48, 255.0 }
 0x17d   :  { %v4965_v29 = vadd.f32 %v7828_v11, %v7823_v18  ;;  %v7834_v5 = vld [vmem:[#allocation184_spill] sm:$0xff]  ;;  %v7844_v18 = vld [vmem:[#allocation79_spill] sm:$0xff]  ;;  %vm7846_vm0 = vnez %v7845_v22  ;;  %v7848_v11 = vld [vmem:[#allocation62_spill] sm:$0xff] }
 0x17e   :  { %v7835_v19 = vsel %vm7832_vm13, %v7833_v7, %v7834_v5  ;;  %v7841_v9 = vld [vmem:[#allocation60_spill] sm:$0xff]  ;;  %v7849_v16 = vsel %vm7846_vm0, %v7847_v44, %v7848_v11  ;;  %v2275_v30 = vld [vmem:[#allocation5 + $0x10] sm:$0xff]  ;;  %v4995_v5 = vld [vmem:[#allocation5 + $0x20] sm:$0xff] }
 0x17f   :  { %v4975_v26 = vadd.f32 %v7835_v19, %v7830_v1  ;;  %v7842_v37 = vsel %vm7839_vm4, %v7840_v51, %v7841_v9  ;;  %v4991_v2 = vadd.f32 %v7849_v16, %v7844_v18  ;;  %vm6850_vm5 = vcmp.ne.f32.partialorder %v2275_v30, -1e+30  ;;  %v4993_v1 = vpop.eup %2253  ;;  %v2276_v7 = vld [vmem:[#allocation5 + $0x18] sm:$0xff]  ;;  %v7853_v51 = vld [vmem:[#allocation38_spill] sm:$0xff]  ;;  %v7854_v9 = vld [vmem:[#allocation185_spill] sm:$0xff] }
 0x180   :  { %v4983_v52 = vadd.f32 %v7842_v37, %v7837_v54  ;;  %7851 = vst [vmem:[#allocation72_spill] sm:$0xff] %v4993_v1  ;;  %vm6852_vm6 = vcmp.ne.f32.partialorder %v2276_v7, -1e+30  ;;  %vm6853_vm1 = vcmp.ne.f32.partialorder %v4995_v5, -1e+30  ;;  %v1580_v19 = vsel %vm1260_vm7, %v1196_v21, 0.0  ;;  %v5000_v15 = vpop.eup %2255 }
 0x181   :  { %7836 = vst [vmem:[#allocation145_spill] sm:$0xff] %v4975_v26  ;;  %7850 = vst [vmem:[#allocation139_spill] sm:$0xff] %v4991_v2  ;;  %v1581_v54 = vsel %vm1261_vm10, %v1197_v63, 0.0  ;;  %vm7855_vm11 = vnez %v7854_v9  ;;  %v7856_v16 = vld [vmem:[#allocation140_spill] sm:$0xff]  ;;  %v5010_v44 = vld [vmem:[#allocation5 + $0x28] sm:$0xff]  ;;  %v5019_v63 = vpop.eup %2257  ;;  %v1582_v13 = vsel %vm6850_vm5, %v1198_v34, 0.0 }
 0x182   :  { %7843 = vst [vmem:[#allocation71_spill] sm:$0xff] %v4983_v52  ;;  %7852 = vst [vmem:[#allocation73_spill] sm:$0xff] %v5000_v15  ;;  %v7857_v37 = vld [vmem:[#allocation64_spill] sm:$0xff]  ;;  %v5013_v11 = vld [vmem:[#allocation5 + $0x30] sm:$0xff]  ;;  %vm1326_vm0 = vcmp.ne.f32.partialorder %v2275_v30, 255.0  ;;  %vm1327_vm5 = vcmp.ne.f32.partialorder %v2276_v7, 255.0 }
 0x183   :  { %v7858_v18 = vsel %vm7855_vm11, %v7856_v16, %v7857_v37  ;;  %v5016_v21 = vld [vmem:[#allocation5 + $0x38] sm:$0xff]  ;;  %7860 = vst [vmem:[#allocation74_spill] sm:$0xff] %v5019_v63  ;;  %v7861_v9 = vld [vmem:[#allocation39_spill] sm:$0xff]  ;;  %v7864_v16 = vld [vmem:[#allocation186_spill] sm:$0xff]  ;;  %v6856_v63 = vmov 0.0  }
 0x184   :  { %v5008_v22 = vadd.f32 %v7858_v18, %v7853_v51  ;;  %v7862_v15 = vld [vmem:[#allocation187_spill] sm:$0xff]  ;;  %v7865_v51 = vld [vmem:[#allocation68_spill] sm:$0xff]  ;;  %v5029_v1 = vld [vmem:[#allocation5 + $0x40] sm:$0xff] }
 0x185   :  { %vm7863_vm4 = vnez %v7862_v15  ;;  %v5032_v50 = vld [vmem:[#allocation5 + $0x48] sm:$0xff]  ;;  %v5036_v49 = vld [vmem:[#allocation5 + $0x50] sm:$0xff]  ;;  %v1644_v15 = vadd.f32 %v1581_v54, %v1580_v19  ;;  %vm1388_vm11 = vmand %vm1260_vm7, %vm1324_vm3  ;;  %vm7868_vm3 = vcmp.ne.f32.partialorder %v2275_v30, -1e+30  ;;  %vm7889_vm7 = vcmp.ne.f32.partialorder %v5029_v1, -1e+30 }
 0x186   :  { %7859 = vst [vmem:[#allocation18_spill] sm:$0xff] %v5008_v22  ;;  %v7866_v37 = vsel %vm7863_vm4, %v7864_v16, %v7865_v51  ;;  %v5039_v16 = vld [vmem:[#allocation5 + $0x58] sm:$0xff]  ;;  %v1584_v51 = vsel %vm6853_vm1, %v4753_v62, 0.0  ;;  %v5048_v34 = vld [vmem:[#allocation5 + $0x60] sm:$0xff]  ;;  %v1945_v3 = vsel %vm1388_vm11, 1.0, %v6856_v63  ;;  %vm1389_vm4 = vmand %vm1261_vm10, %vm1325_vm9  ;;  %vm1329_vm1 = vcmp.ne.f32.partialorder %v5010_v44, 255.0 }
 0x187   :  { %v5027_v18 = vadd.f32 %v7866_v37, %v7861_v9  ;;  %v1583_v9 = vsel %vm6852_vm6, %v4745_v32, 0.0  ;;  %v1645_v19 = vadd.f32 %v1644_v15, %v1582_v13  ;;  %v2286_v54 = vld [vmem:[#allocation2] sm:$0xff]  ;;  %vm1328_vm6 = vcmp.ne.f32.partialorder %v4995_v5, 255.0  ;;  %v5055_v32 = vld [vmem:[#allocation5 + $0x68] sm:$0xff]  ;;  %vm1390_vm13 = vmand %vm7868_vm3, %vm1326_vm0 }
 0x188   :  { %v1452_v37 = vsel %vm1388_vm11, %v2286_v54, inf  ;;  %v2288_v62 = vld [vmem:[#allocation2 + $0x8] sm:$0xff]  ;;  %v1946_v58 = vsel %vm1389_vm4, 1.0, %v6856_v63  ;;  %vm1330_vm11 = vcmp.ne.f32.partialorder %v5013_v11, 255.0  ;;  %v5063_v13 = vld [vmem:[#allocation5 + $0x70] sm:$0xff]  ;;  %v5069_v30 = vld [vmem:[#allocation5 + $0x78] sm:$0xff] }
 0x189   :  { %7867 = vst [vmem:[#allocation75_spill] sm:$0xff] %v5027_v18  ;;  %1516 = vst [vmem:[#allocation7] sm:$0xff] %v1452_v37  ;;  %v1453_v48 = vsel %vm1389_vm4, %v2288_v62, inf  ;;  %v1646_v0 = vadd.f32 %v1645_v19, %v1583_v9  ;;  %v1836_v15 = vadd.f32 %v1946_v58, %v1945_v3  ;;  %v2290_v54 = vld [vmem:[#allocation2 + $0x10] sm:$0xff]  ;;  %v1947_v62 = vsel %vm1390_vm13, 1.0, %v6856_v63  ;;  %v2292_v17 = vld [vmem:[#allocation2 + $0x18] sm:$0xff] }
 0x18a   :  { %1517 = vst [vmem:[#allocation7 + $0x8] sm:$0xff] %v1453_v48  ;;  %v1454_v37 = vsel %vm1390_vm13, %v2290_v54, inf  ;;  %vm7869_vm9 = vcmp.ne.f32.partialorder %v2276_v7, -1e+30  ;;  %vm7870_vm3 = vcmp.ne.f32.partialorder %v5010_v44, -1e+30 }
 0x18b   :  { %vm1391_vm4 = vmand %vm7869_vm9, %vm1327_vm5  ;;  %v1585_v8 = vsel %vm7870_vm3, %v4761_v39, 0.0  ;;  %1518 = vst [vmem:[#allocation7 + $0x10] sm:$0xff] %v1454_v37  ;;  %vm7871_vm13 = vcmp.ne.f32.partialorder %v4995_v5, -1e+30  ;;  %vm1331_vm5 = vcmp.ne.f32.partialorder %v5016_v21, 255.0  ;;  %v5081_v58 = vld [vmem:[#allocation5 + $0x80] sm:$0xff]  ;;  %v1647_v7 = vadd.f32 %v1646_v0, %v1584_v51 }
 0x18c   :  { %v1455_v9 = vsel %vm1391_vm4, %v2292_v17, inf  ;;  %v1948_v3 = vsel %vm1391_vm4, 1.0, %v6856_v63  ;;  %vm1392_vm10 = vmand %vm7871_vm13, %vm1328_vm6  ;;  %v1837_v19 = vadd.f32 %v1947_v62, %v1836_v15  ;;  %v2294_v39 = vld [vmem:[#allocation2 + $0x20] sm:$0xff]  ;;  %vm1332_vm6 = vcmp.ne.f32.partialorder %v5029_v1, 255.0  ;;  %v5093_v5 = vld [vmem:[#allocation5 + $0x88] sm:$0xff] }
 0x18d   :  { %1519 = vst [vmem:[#allocation7 + $0x18] sm:$0xff] %v1455_v9  ;;  %v1456_v48 = vsel %vm1392_vm10, %v2294_v39, inf  ;;  %vm7872_vm4 = vmmov %vm7870_vm3  ;;  %vm7875_vm9 = vcmp.ne.f32.partialorder %v5013_v11, -1e+30  ;;  %v1949_v0 = vsel %vm1392_vm10, 1.0, %v6856_v63  ;;  %v2296_v15 = vld [vmem:[#allocation2 + $0x28] sm:$0xff] }
 0x18e   :  { %vm5088_vm3 = vmand %vm7872_vm4, %vm1329_vm1  ;;  %v1586_v51 = vsel %vm7875_vm9, %v4769_v47, 0.0  ;;  %1520 = vst [vmem:[#allocation7 + $0x20] sm:$0xff] %v1456_v48  ;;  %vm1333_vm13 = vcmp.ne.f32.partialorder %v5032_v50, 255.0  ;;  %v5111_v37 = vld [vmem:[#allocation5 + $0x90] sm:$0xff]  ;;  %v1648_v47 = vadd.f32 %v1647_v7, %v1585_v8  ;;  %v1838_v62 = vadd.f32 %v1948_v3, %v1837_v19  ;;  %v5125_v48 = vld [vmem:[#allocation5 + $0x98] sm:$0xff] }
 0x18f   :  { %v1457_v44 = vsel %vm5088_vm3, %v2296_v15, inf  ;;  %vm7876_vm1 = vmmov %vm7875_vm9  ;;  %v2298_v9 = vld [vmem:[#allocation2 + $0x30] sm:$0xff]  ;;  %v1950_v3 = vsel %vm5088_vm3, 1.0, %v6856_v63  ;;  %v2300_v7 = vld [vmem:[#allocation2 + $0x38] sm:$0xff]  ;;  %vm1335_vm9 = vcmp.ne.f32.partialorder %v5039_v16, 255.0 }
 0x190   :  { %vm5106_vm4 = vmand %vm7876_vm1, %vm1330_vm11  ;;  %1521 = vst [vmem:[#allocation7 + $0x28] sm:$0xff] %v1457_v44  ;;  %vm7879_vm11 = vcmp.ne.f32.partialorder %v5016_v21, -1e+30  ;;  %vm1334_vm1 = vcmp.ne.f32.partialorder %v5036_v49, 255.0  ;;  %v1649_v21 = vadd.f32 %v1648_v47, %v1586_v51  ;;  %v1839_v17 = vadd.f32 %v1949_v0, %v1838_v62  ;;  %v2302_v44 = vld [vmem:[#allocation2 + $0x40] sm:$0xff]  ;;  %v2304_v47 = vld [vmem:[#allocation2 + $0x48] sm:$0xff] }
 0x191   :  { %v1458_v39 = vsel %vm5106_vm4, %v2298_v9, inf  ;;  %vm5120_vm10 = vmand %vm7879_vm11, %vm1331_vm5  ;;  %vm7883_vm5 = vcmp.ne.f32.partialorder %v5029_v1, -1e+30  ;;  %vm7886_vm3 = vcmp.ne.f32.partialorder %v5032_v50, -1e+30  ;;  %v1588_v51 = vsel %vm7889_vm7, %v4785_v23, 0.0 }
 0x192   :  { %vm7882_vm0 = vmmov %vm7879_vm11  ;;  %1522 = vst [vmem:[#allocation7 + $0x30] sm:$0xff] %v1458_v39  ;;  %v1459_v19 = vsel %vm5120_vm10, %v2300_v7, inf  ;;  %v5159_v7 = vld [vmem:[#allocation5 + $0xa8] sm:$0xff]  ;;  %v1951_v0 = vsel %vm5106_vm4, 1.0, %v6856_v63  ;;  %v5179_v23 = vld [vmem:[#allocation5 + $0xb0] sm:$0xff]  ;;  %v1840_v54 = vadd.f32 %v1950_v3, %v1839_v17  ;;  %v7897_v3 = vmov 0.0  }
 0x193   :  { %v1587_v8 = vsel %vm7882_vm0, %v4777_v36, 0.0  ;;  %vm5140_vm11 = vmand %vm7883_vm5, %vm1332_vm6  ;;  %v5145_v36 = vld [vmem:[#allocation5 + $0xa0] sm:$0xff]  ;;  %1523 = vst [vmem:[#allocation7 + $0x38] sm:$0xff] %v1459_v19  ;;  %vm1336_vm5 = vcmp.ne.f32.partialorder %v5048_v34, 255.0  ;;  %vm7893_vm4 = vcmp.ne.f32.partialorder %v5039_v16, -1e+30 }
 0x194   :  { %v1460_v9 = vsel %vm5140_vm11, %v2302_v44, inf  ;;  %vm5154_vm6 = vmand %vm7886_vm3, %vm1333_vm13  ;;  %vm7890_vm13 = vcmp.ne.f32.partialorder %v5036_v49, -1e+30  ;;  %v1650_v1 = vadd.f32 %v1649_v21, %v1587_v8  ;;  %v2306_v44 = vld [vmem:[#allocation2 + $0x50] sm:$0xff]  ;;  %v5193_v63 = vld [vmem:[#allocation5 + $0xb8] sm:$0xff]  ;;  %v1952_v21 = vsel %vm5120_vm10, 1.0, %v7897_v3 }
 0x195   :  { %1524 = vst [vmem:[#allocation7 + $0x40] sm:$0xff] %v1460_v9  ;;  %v1461_v62 = vsel %vm5154_vm6, %v2304_v47, inf  ;;  %vm5174_vm3 = vmand %vm7890_vm13, %vm1334_vm1  ;;  %vm7896_vm0 = vcmp.ne.f32.partialorder %v5032_v50, -1e+30  ;;  %v2308_v17 = vld [vmem:[#allocation2 + $0x58] sm:$0xff]  ;;  %v5213_v50 = vld [vmem:[#allocation5 + $0xc0] sm:$0xff]  ;;  %v1841_v11 = vadd.f32 %v1951_v0, %v1840_v54 }
 0x196   :  { %1525 = vst [vmem:[#allocation7 + $0x48] sm:$0xff] %v1461_v62  ;;  %v1462_v9 = vsel %vm5174_vm3, %v2306_v44, inf  ;;  %vm5188_vm1 = vmand %vm7893_vm4, %vm1335_vm9  ;;  %v1589_v8 = vsel %vm7896_vm0, %v4793_v27, 0.0  ;;  %vm7898_vm9 = vcmp.ne.f32.partialorder %v5048_v34, -1e+30  ;;  %v1651_v27 = vadd.f32 %v1650_v1, %v1588_v51  ;;  %v5227_v56 = vld [vmem:[#allocation5 + $0xc8] sm:$0xff] }
 0x197   :  { %1526 = vst [vmem:[#allocation7 + $0x50] sm:$0xff] %v1462_v9  ;;  %v1463_v62 = vsel %vm5188_vm1, %v2308_v17, inf  ;;  %vm5208_vm4 = vmand %vm7898_vm9, %vm1336_vm5  ;;  %v2310_v9 = vld [vmem:[#allocation2 + $0x60] sm:$0xff]  ;;  %vm7901_vm10 = vcmp.ne.f32.partialorder %v5055_v32, 255.0  ;;  %vm7902_vm5 = vcmp.ne.f32.partialorder %v5055_v32, -1e+30  ;;  %v1842_v15 = vadd.f32 %v1952_v21, %v1841_v11 }
 0x198   :  { %1527 = vst [vmem:[#allocation7 + $0x58] sm:$0xff] %v1463_v62  ;;  %v1464_v17 = vsel %vm5208_vm4, %v2310_v9, inf  ;;  %vm5222_vm9 = vmand %vm7902_vm5, %vm7901_vm10  ;;  %v1590_v51 = vsel %vm7890_vm13, %v4801_v6, 0.0  ;;  %v1953_v0 = vsel %vm5140_vm11, 1.0, %v7897_v3  ;;  %v2312_v1 = vld [vmem:[#allocation2 + $0x68] sm:$0xff]  ;;  %vm7905_vm10 = vcmp.ne.f32.partialorder %v5063_v13, 255.0 }
 0x199   :  { %1528 = vst [vmem:[#allocation7 + $0x60] sm:$0xff] %v1464_v17  ;;  %v1465_v54 = vsel %vm5222_vm9, %v2312_v1, inf  ;;  %vm7906_vm5 = vcmp.ne.f32.partialorder %v5063_v13, -1e+30  ;;  %v5247_v49 = vld [vmem:[#allocation5 + $0xd0] sm:$0xff]  ;;  %v1652_v6 = vadd.f32 %v1651_v27, %v1589_v8  ;;  %vm7909_vm11 = vcmp.ne.f32.partialorder %v5069_v30, 255.0 }
 0x19a   :  { %vm5242_vm7 = vmand %vm7906_vm5, %vm7905_vm10  ;;  %1529 = vst [vmem:[#allocation7 + $0x68] sm:$0xff] %v1465_v54  ;;  %v2314_v9 = vld [vmem:[#allocation2 + $0x70] sm:$0xff]  ;;  %vm7910_vm10 = vcmp.ne.f32.partialorder %v5069_v30, -1e+30  ;;  %v5261_v22 = vld [vmem:[#allocation5 + $0xd8] sm:$0xff]  ;;  %v1954_v21 = vsel %vm5154_vm6, 1.0, %v7897_v3  ;;  %v1843_v39 = vadd.f32 %v1953_v0, %v1842_v15 }
 0x19b   :  { %v1466_v17 = vsel %vm5242_vm7, %v2314_v9, inf  ;;  %vm5256_vm5 = vmand %vm7910_vm10, %vm7909_vm11  ;;  %vm7913_vm12 = vcmp.ne.f32.partialorder %v5039_v16, -1e+30  ;;  %v2316_v27 = vld [vmem:[#allocation2 + $0x78] sm:$0xff]  ;;  %vm7914_vm11 = vcmp.ne.f32.partialorder %v5081_v58, 255.0  ;;  %v1653_v16 = vadd.f32 %v1652_v6, %v1590_v51  ;;  %v2318_v9 = vld [vmem:[#allocation2 + $0x80] sm:$0xff] }
 0x19c   :  { %v1591_v8 = vsel %vm7913_vm12, %v4809_v31, 0.0  ;;  %1530 = vst [vmem:[#allocation7 + $0x70] sm:$0xff] %v1466_v17  ;;  %v1467_v11 = vsel %vm5256_vm5, %v2316_v27, inf  ;;  %vm7915_vm10 = vcmp.ne.f32.partialorder %v5081_v58, -1e+30  ;;  %v5281_v31 = vld [vmem:[#allocation5 + $0xe0] sm:$0xff]  ;;  %v1844_v19 = vadd.f32 %v1954_v21, %v1843_v39 }
 0x19d   :  { %vm5276_vm0 = vmand %vm7915_vm10, %vm7914_vm11  ;;  %1531 = vst [vmem:[#allocation7 + $0x78] sm:$0xff] %v1467_v11  ;;  %vm7918_vm6 = vcmp.ne.f32.partialorder %v5093_v5, 255.0  ;;  %vm7919_vm11 = vcmp.ne.f32.partialorder %v5093_v5, -1e+30  ;;  %vm7922_vm8 = vcmp.ne.f32.partialorder %v5048_v34, -1e+30  ;;  %v1654_v34 = vadd.f32 %v1653_v16, %v1591_v8 }
 0x19e   :  { %v1468_v17 = vsel %vm5276_vm0, %v2318_v9, inf  ;;  %vm5290_vm10 = vmand %vm7919_vm11, %vm7918_vm6  ;;  %v1592_v51 = vsel %vm7922_vm8, %v4817_v4, 0.0  ;;  %v1955_v0 = vsel %vm5174_vm3, 1.0, %v7897_v3  ;;  %v2320_v6 = vld [vmem:[#allocation2 + $0x88] sm:$0xff]  ;;  %vm7923_vm6 = vcmp.ne.f32.partialorder %v5111_v37, 255.0  ;;  %v5315_v4 = vld [vmem:[#allocation5 + $0xf0] sm:$0xff] }
 0x19f   :  { %1532 = vst [vmem:[#allocation7 + $0x80] sm:$0xff] %v1468_v17  ;;  %v1469_v15 = vsel %vm5290_vm10, %v2320_v6, inf  ;;  %vm7924_vm11 = vcmp.ne.f32.partialorder %v5111_v37, -1e+30  ;;  %v2322_v9 = vld [vmem:[#allocation2 + $0x90] sm:$0xff]  ;;  %vm7927_vm3 = vcmp.ne.f32.partialorder %v5125_v48, 255.0  ;;  %v1845_v47 = vadd.f32 %v1955_v0, %v1844_v19 }
 0x1a0   :  { %vm5310_vm13 = vmand %vm7924_vm11, %vm7923_vm6  ;;  %1533 = vst [vmem:[#allocation7 + $0x88] sm:$0xff] %v1469_v15  ;;  %vm7928_vm6 = vcmp.ne.f32.partialorder %v5125_v48, -1e+30  ;;  %vm7931_vm15 = vcmp.ne.f32.partialorder %v5055_v32, -1e+30  ;;  %v1956_v21 = vsel %vm5188_vm1, 1.0, %v7897_v3  ;;  %v1655_v32 = vadd.f32 %v1654_v34, %v1592_v51 }
 0x1a1   :  { %v1470_v17 = vsel %vm5310_vm13, %v2322_v9, inf  ;;  %vm5324_vm11 = vmand %vm7928_vm6, %vm7927_vm3  ;;  %v1593_v8 = vsel %vm7931_vm15, %v4827_v10, 0.0  ;;  %v2324_v16 = vld [vmem:[#allocation2 + $0x98] sm:$0xff]  ;;  %vm7932_vm3 = vcmp.ne.f32.partialorder %v5145_v36, 255.0  ;;  %vm7933_vm6 = vcmp.ne.f32.partialorder %v5145_v36, -1e+30 }
 0x1a2   :  { %1534 = vst [vmem:[#allocation7 + $0x90] sm:$0xff] %v1470_v17  ;;  %v1471_v39 = vsel %vm5324_vm11, %v2324_v16, inf  ;;  %vm5344_vm12 = vmand %vm7933_vm6, %vm7932_vm3  ;;  %v5349_v10 = vld [vmem:[#allocation5 + $0x100] sm:$0xff]  ;;  %vm7936_vm1 = vcmp.ne.f32.partialorder %v5159_v7, 255.0  ;;  %vm7937_vm3 = vcmp.ne.f32.partialorder %v5159_v7, -1e+30  ;;  %v1846_v44 = vadd.f32 %v1956_v21, %v1845_v47 }
 0x1a3   :  { %1535 = vst [vmem:[#allocation7 + $0x98] sm:$0xff] %v1471_v39  ;;  %v2326_v9 = vld [vmem:[#allocation2 + $0xa0] sm:$0xff]  ;;  %vm5358_vm6 = vmand %vm7937_vm3, %vm7936_vm1  ;;  %v5363_v61 = vld [vmem:[#allocation5 + $0x108] sm:$0xff]  ;;  %vm7940_vm2 = vcmp.ne.f32.partialorder %v5063_v13, -1e+30  ;;  %v1957_v0 = vsel %vm5208_vm4, 1.0, %v7897_v3  ;;  %v1656_v13 = vadd.f32 %v1655_v32, %v1593_v8 }
 0x1a4   :  { %v1472_v17 = vsel %vm5344_vm12, %v2326_v9, inf  ;;  %v1594_v51 = vsel %vm7940_vm2, %v4835_v33, 0.0  ;;  %v2328_v34 = vld [vmem:[#allocation2 + $0xa8] sm:$0xff]  ;;  %vm7941_vm1 = vcmp.ne.f32.partialorder %v5179_v23, 255.0  ;;  %vm7942_vm3 = vcmp.ne.f32.partialorder %v5179_v23, -1e+30 }
 0x1a5   :  { %1536 = vst [vmem:[#allocation7 + $0xa0] sm:$0xff] %v1472_v17  ;;  %v1473_v19 = vsel %vm5358_vm6, %v2328_v34, inf  ;;  %vm5378_vm8 = vmand %vm7942_vm3, %vm7941_vm1  ;;  %v5383_v33 = vld [vmem:[#allocation5 + $0x110] sm:$0xff]  ;;  %vm7945_vm4 = vcmp.ne.f32.partialorder %v5193_v63, 255.0  ;;  %vm7946_vm1 = vcmp.ne.f32.partialorder %v5193_v63, -1e+30  ;;  %v1657_v18 = vadd.f32 %v1656_v13, %v1594_v51 }
 0x1a6   :  { %1537 = vst [vmem:[#allocation7 + $0xa8] sm:$0xff] %v1473_v19  ;;  %v2330_v9 = vld [vmem:[#allocation2 + $0xb0] sm:$0xff]  ;;  %vm5392_vm3 = vmand %vm7946_vm1, %vm7945_vm4  ;;  %v7947_v34 = vmov 0  ;;  %v5397_v24 = vld [vmem:[#allocation5 + $0x118] sm:$0xff]  ;;  %vm7949_vm14 = vcmp.ne.f32.partialorder %v5069_v30, -1e+30  ;;  %v1847_v30 = vadd.f32 %v1957_v0, %v1846_v44 }
 0x1a7   :  { %v1474_v17 = vsel %vm5378_vm8, %v2330_v9, inf  ;;  %v7948_v34 = vsel %vm5392_vm3, 4294967295, %v7947_v34  ;;  %v1595_v8 = vsel %vm7949_vm14, %v4843_v53, 0.0  ;;  %v1958_v21 = vsel %vm5222_vm9, 1.0, %v7897_v3  ;;  %v2332_v32 = vld [vmem:[#allocation2 + $0xb8] sm:$0xff]  ;;  %v5417_v53 = vld [vmem:[#allocation5 + $0x120] sm:$0xff] }
 0x1a8   :  { %1538 = vst [vmem:[#allocation7 + $0xb0] sm:$0xff] %v1474_v17  ;;  %v1475_v47 = vsel %vm5392_vm3, %v2332_v32, inf  ;;  %vm7950_vm4 = vcmp.ne.f32.partialorder %v5213_v50, 255.0  ;;  %vm7951_vm1 = vcmp.ne.f32.partialorder %v5213_v50, -1e+30  ;;  %v2334_v9 = vld [vmem:[#allocation2 + $0xc0] sm:$0xff]  ;;  %v1848_v62 = vadd.f32 %v1958_v21, %v1847_v30 }
 0x1a9   :  { %vm5412_vm15 = vmand %vm7951_vm1, %vm7950_vm4  ;;  %1539 = vst [vmem:[#allocation7 + $0xb8] sm:$0xff] %v1475_v47  ;;  %vm7954_vm9 = vcmp.ne.f32.partialorder %v5227_v56, 255.0  ;;  %vm7955_vm4 = vcmp.ne.f32.partialorder %v5227_v56, -1e+30  ;;  %v7956_v32 = vmov 0  ;;  %v5431_v2 = vld [vmem:[#allocation5 + $0x128] sm:$0xff] }
 0x1aa   :  { %v1476_v17 = vsel %vm5412_vm15, %v2334_v9, inf  ;;  %vm5426_vm1 = vmand %vm7955_vm4, %vm7954_vm9  ;;  %vm7958_vm3 = vcmp.ne.f32.partialorder %v5081_v58, -1e+30  ;;  %v1959_v0 = vsel %vm5242_vm7, 1.0, %v7897_v3  ;;  %v2336_v13 = vld [vmem:[#allocation2 + $0xc8] sm:$0xff]  ;;  %vm7959_vm9 = vcmp.ne.f32.partialorder %v5247_v49, 255.0 }
 0x1ab   :  { %v7957_v32 = vsel %vm5426_vm1, 4294967295, %v7956_v32  ;;  %v1596_v51 = vsel %vm7958_vm3, %v4851_v45, 0.0  ;;  %1540 = vst [vmem:[#allocation7 + $0xc0] sm:$0xff] %v1476_v17  ;;  %v1477_v44 = vsel %vm5426_vm1, %v2336_v13, inf  ;;  %vm7960_vm4 = vcmp.ne.f32.partialorder %v5247_v49, -1e+30 }
 0x1ac   :  { %vm5446_vm2 = vmand %vm7960_vm4, %vm7959_vm9  ;;  %v5451_v45 = vld [vmem:[#allocation5 + $0x130] sm:$0xff]  ;;  %v1658_v58 = vadd.f32 %v1657_v18, %v1595_v8  ;;  %1541 = vst [vmem:[#allocation7 + $0xc8] sm:$0xff] %v1477_v44  ;;  %vm7963_vm7 = vcmp.ne.f32.partialorder %v5261_v22, 255.0  ;;  %vm7964_vm9 = vcmp.ne.f32.partialorder %v5261_v22, -1e+30  ;;  %v7965_v13 = vmov 0 }
 0x1ad   :  { %v2338_v9 = vld [vmem:[#allocation2 + $0xd0] sm:$0xff]  ;;  %vm5460_vm4 = vmand %vm7964_vm9, %vm7963_vm7  ;;  %v5465_v52 = vld [vmem:[#allocation5 + $0x138] sm:$0xff]  ;;  %vm7967_vm1 = vcmp.ne.f32.partialorder %v5093_v5, -1e+30  ;;  %v1960_v21 = vsel %vm5256_vm5, 1.0, %v7897_v3  ;;  %vm7968_vm7 = vcmp.ne.f32.partialorder %v5281_v31, 255.0  ;;  %v1849_v1 = vadd.f32 %v1959_v0, %v1848_v62 }
 0x1ae   :  { %v1478_v17 = vsel %vm5446_vm2, %v2338_v9, inf  ;;  %v7966_v13 = vsel %vm5460_vm4, 4294967295, %v7965_v13  ;;  %v1597_v8 = vsel %vm7967_vm1, %v4859_v20, 0.0  ;;  %v2340_v18 = vld [vmem:[#allocation2 + $0xd8] sm:$0xff]  ;;  %vm7969_vm9 = vcmp.ne.f32.partialorder %v5281_v31, -1e+30 }
 0x1af   :  { %1542 = vst [vmem:[#allocation7 + $0xd0] sm:$0xff] %v1478_v17  ;;  %v1479_v30 = vsel %vm5460_vm4, %v2340_v18, inf  ;;  %vm5480_vm14 = vmand %vm7969_vm9, %vm7968_vm7  ;;  %v5485_v20 = vld [vmem:[#allocation5 + $0x140] sm:$0xff]  ;;  %v1659_v5 = vadd.f32 %v1658_v58, %v1596_v51  ;;  %vm7972_vm5 = vcmp.ne.f32.partialorder %v5295_v40, 255.0  ;;  %vm7973_vm7 = vcmp.ne.f32.partialorder %v5295_v40, -1e+30 }
 0x1b0   :  { %1543 = vst [vmem:[#allocation7 + $0xd8] sm:$0xff] %v1479_v30  ;;  %v2342_v9 = vld [vmem:[#allocation2 + $0xe0] sm:$0xff]  ;;  %vm5494_vm9 = vmand %vm7973_vm7, %vm7972_vm5  ;;  %v7974_v18 = vmov 0  ;;  %v5499_v26 = vld [vmem:[#allocation5 + $0x148] sm:$0xff]  ;;  %vm7977_vm4 = vcmp.ne.f32.partialorder %v5111_v37, -1e+30  ;;  %v1850_v54 = vadd.f32 %v1960_v21, %v1849_v1 }
 0x1b1   :  { %v1480_v17 = vsel %vm5480_vm14, %v2342_v9, inf  ;;  %v7975_v18 = vsel %vm5494_vm9, 4294967295, %v7974_v18  ;;  %v1598_v51 = vsel %vm7977_vm4, %v4867_v55, 0.0  ;;  %v1961_v0 = vsel %vm5276_vm0, 1.0, %v7897_v3  ;;  %v2344_v58 = vld [vmem:[#allocation2 + $0xe8] sm:$0xff]  ;;  %v5519_v55 = vld [vmem:[#allocation5 + $0x150] sm:$0xff] }
 0x1b2   :  { %7976 = vst [vmem:[#allocation141_spill] sm:$0xff] %v7975_v18  ;;  %1544 = vst [vmem:[#allocation7 + $0xe0] sm:$0xff] %v1480_v17  ;;  %v1481_v62 = vsel %vm5494_vm9, %v2344_v58, inf  ;;  %vm7978_vm5 = vcmp.ne.f32.partialorder %v5315_v4, 255.0  ;;  %vm7979_vm7 = vcmp.ne.f32.partialorder %v5315_v4, -1e+30  ;;  %v1660_v37 = vadd.f32 %v1659_v5, %v1597_v8 }
 0x1b3   :  { %vm5514_vm3 = vmand %vm7979_vm7, %vm7978_vm5  ;;  %1545 = vst [vmem:[#allocation7 + $0xe8] sm:$0xff] %v1481_v62  ;;  %v2346_v9 = vld [vmem:[#allocation2 + $0xf0] sm:$0xff]  ;;  %vm7982_vm0 = vcmp.ne.f32.partialorder %v5329_v59, 255.0  ;;  %vm7983_vm5 = vcmp.ne.f32.partialorder %v5329_v59, -1e+30  ;;  %v7984_v58 = vmov 0  ;;  %v1851_v27 = vadd.f32 %v1961_v0, %v1850_v54 }
 0x1b4   :  { %v1482_v17 = vsel %vm5514_vm3, %v2346_v9, inf  ;;  %vm5528_vm7 = vmand %vm7983_vm5, %vm7982_vm0  ;;  %v5533_v18 = vld [vmem:[#allocation5 + $0x158] sm:$0xff]  ;;  %vm7987_vm9 = vcmp.ne.f32.partialorder %v5125_v48, -1e+30  ;;  %v1962_v21 = vsel %vm5290_vm10, 1.0, %v7897_v3  ;;  %vm7988_vm0 = vcmp.ne.f32.partialorder %v5349_v10, 255.0 }
 0x1b5   :  { %v7985_v58 = vsel %vm5528_vm7, 4294967295, %v7984_v58  ;;  %v1599_v8 = vsel %vm7987_vm9, %v4875_v57, 0.0  ;;  %1546 = vst [vmem:[#allocation7 + $0xf0] sm:$0xff] %v1482_v17  ;;  %v2348_v5 = vld [vmem:[#allocation2 + $0xf8] sm:$0xff]  ;;  %vm7989_vm5 = vcmp.ne.f32.partialorder %v5349_v10, -1e+30  ;;  %v1661_v48 = vadd.f32 %v1660_v37, %v1598_v51 }
 0x1b6   :  { %7986 = vst [vmem:[#allocation76_spill] sm:$0xff] %v7985_v58  ;;  %v1483_v1 = vsel %vm5528_vm7, %v2348_v5, inf  ;;  %vm5548_vm1 = vmand %vm7989_vm5, %vm7988_vm0  ;;  %v5553_v57 = vld [vmem:[#allocation5 + $0x160] sm:$0xff]  ;;  %vm7992_vm10 = vcmp.ne.f32.partialorder %v5363_v61, 255.0  ;;  %vm7993_vm0 = vcmp.ne.f32.partialorder %v5363_v61, -1e+30  ;;  %v1852_v11 = vadd.f32 %v1962_v21, %v1851_v27 }
 0x1b7   :  { %1547 = vst [vmem:[#allocation7 + $0xf8] sm:$0xff] %v1483_v1  ;;  %v2350_v9 = vld [vmem:[#allocation2 + $0x100] sm:$0xff]  ;;  %vm5562_vm5 = vmand %vm7993_vm0, %vm7992_vm10  ;;  %v7994_v5 = vmov 0  ;;  %v5567_v58 = vld [vmem:[#allocation5 + $0x168] sm:$0xff]  ;;  %vm7997_vm7 = vcmp.ne.f32.partialorder %v5145_v36, -1e+30  ;;  %v1662_v36 = vadd.f32 %v1661_v48, %v1599_v8 }
 0x1b8   :  { %v1484_v17 = vsel %vm5548_vm1, %v2350_v9, inf  ;;  %v7995_v5 = vsel %vm5562_vm5, 4294967295, %v7994_v5  ;;  %v1600_v51 = vsel %vm7997_vm7, %v4883_v42, 0.0  ;;  %v1963_v0 = vsel %vm5310_vm13, 1.0, %v7897_v3  ;;  %v2352_v37 = vld [vmem:[#allocation2 + $0x108] sm:$0xff]  ;;  %v5587_v42 = vld [vmem:[#allocation5 + $0x170] sm:$0xff] }
 0x1b9   :  { %7996 = vst [vmem:[#allocation143_spill] sm:$0xff] %v7995_v5  ;;  %1548 = vst [vmem:[#allocation7 + $0x100] sm:$0xff] %v1484_v17  ;;  %v1485_v54 = vsel %vm5562_vm5, %v2352_v37, inf  ;;  %vm7998_vm10 = vcmp.ne.f32.partialorder %v5383_v33, 255.0  ;;  %vm7999_vm0 = vcmp.ne.f32.partialorder %v5383_v33, -1e+30  ;;  %v1853_v6 = vadd.f32 %v1963_v0, %v1852_v11 }
 0x1ba   :  { %vm5582_vm4 = vmand %vm7999_vm0, %vm7998_vm10  ;;  %1549 = vst [vmem:[#allocation7 + $0x108] sm:$0xff] %v1485_v54  ;;  %v2354_v9 = vld [vmem:[#allocation2 + $0x110] sm:$0xff]  ;;  %vm8002_vm13 = vcmp.ne.f32.partialorder %v5397_v24, 255.0  ;;  %vm8003_vm10 = vcmp.ne.f32.partialorder %v5397_v24, -1e+30  ;;  %v8004_v37 = vmov 0 }
 0x1bb   :  { %v1486_v17 = vsel %vm5582_vm4, %v2354_v9, inf  ;;  %vm5596_vm0 = vmand %vm8003_vm10, %vm8002_vm13  ;;  %v5601_v5 = vld [vmem:[#allocation5 + $0x178] sm:$0xff]  ;;  %vm8007_vm5 = vcmp.ne.f32.partialorder %v5159_v7, -1e+30  ;;  %v1964_v21 = vsel %vm5324_vm11, 1.0, %v7897_v3  ;;  %vm8008_vm13 = vcmp.ne.f32.partialorder %v5417_v53, 255.0 }
 0x1bc   :  { %v8005_v37 = vsel %vm5596_vm0, 4294967295, %v8004_v37  ;;  %v1601_v8 = vsel %vm8007_vm5, %v4891_v43, 0.0  ;;  %1550 = vst [vmem:[#allocation7 + $0x110] sm:$0xff] %v1486_v17  ;;  %v2356_v48 = vld [vmem:[#allocation2 + $0x118] sm:$0xff]  ;;  %vm8009_vm10 = vcmp.ne.f32.partialorder %v5417_v53, -1e+30  ;;  %v1663_v7 = vadd.f32 %v1662_v36, %v1600_v51 }
 0x1bd   :  { %8006 = vst [vmem:[#allocation58_spill] sm:$0xff] %v8005_v37  ;;  %v1487_v27 = vsel %vm5596_vm0, %v2356_v48, inf  ;;  %vm5616_vm9 = vmand %vm8009_vm10, %vm8008_vm13  ;;  %v5621_v43 = vld [vmem:[#allocation5 + $0x180] sm:$0xff]  ;;  %vm8012_vm11 = vcmp.ne.f32.partialorder %v5431_v2, 255.0  ;;  %vm8013_vm13 = vcmp.ne.f32.partialorder %v5431_v2, -1e+30  ;;  %v1854_v15 = vadd.f32 %v1964_v21, %v1853_v6 }
 0x1be   :  { %1551 = vst [vmem:[#allocation7 + $0x118] sm:$0xff] %v1487_v27  ;;  %v2358_v9 = vld [vmem:[#allocation2 + $0x120] sm:$0xff]  ;;  %vm5630_vm10 = vmand %vm8013_vm13, %vm8012_vm11  ;;  %v8014_v48 = vmov 0  ;;  %v5635_v37 = vld [vmem:[#allocation5 + $0x188] sm:$0xff]  ;;  %vm8017_vm0 = vcmp.ne.f32.partialorder %v5179_v23, -1e+30  ;;  %v1664_v23 = vadd.f32 %v1663_v7, %v1601_v8 }
 0x1bf   :  { %v1488_v17 = vsel %vm5616_vm9, %v2358_v9, inf  ;;  %v8015_v48 = vsel %vm5630_vm10, 4294967295, %v8014_v48  ;;  %v1602_v51 = vsel %vm8017_vm0, %v4899_v41, 0.0  ;;  %v1965_v0 = vsel %vm5344_vm12, 1.0, %v7897_v3  ;;  %v2360_v36 = vld [vmem:[#allocation2 + $0x128] sm:$0xff]  ;;  %v5655_v41 = vld [vmem:[#allocation5 + $0x190] sm:$0xff] }
 0x1c0   :  { %8016 = vst [vmem:[#allocation98_spill] sm:$0xff] %v8015_v48  ;;  %1552 = vst [vmem:[#allocation7 + $0x120] sm:$0xff] %v1488_v17  ;;  %v1489_v11 = vsel %vm5630_vm10, %v2360_v36, inf  ;;  %vm8018_vm11 = vcmp.ne.f32.partialorder %v5451_v45, 255.0  ;;  %vm8019_vm13 = vcmp.ne.f32.partialorder %v5451_v45, -1e+30  ;;  %v1855_v16 = vadd.f32 %v1965_v0, %v1854_v15 }
 0x1c1   :  { %vm5650_vm7 = vmand %vm8019_vm13, %vm8018_vm11  ;;  %1553 = vst [vmem:[#allocation7 + $0x128] sm:$0xff] %v1489_v11  ;;  %v2362_v9 = vld [vmem:[#allocation2 + $0x130] sm:$0xff]  ;;  %vm8022_vm12 = vcmp.ne.f32.partialorder %v5465_v52, 255.0  ;;  %vm8023_vm11 = vcmp.ne.f32.partialorder %v5465_v52, -1e+30  ;;  %v8024_v36 = vmov 0 }
 0x1c2   :  { %v1490_v17 = vsel %vm5650_vm7, %v2362_v9, inf  ;;  %vm5664_vm13 = vmand %vm8023_vm11, %vm8022_vm12  ;;  %v5669_v48 = vld [vmem:[#allocation5 + $0x198] sm:$0xff]  ;;  %vm8027_vm10 = vcmp.ne.f32.partialorder %v5193_v63, -1e+30  ;;  %v1966_v21 = vsel %vm5358_vm6, 1.0, %v7897_v3  ;;  %vm8028_vm12 = vcmp.ne.f32.partialorder %v5485_v20, 255.0 }
 0x1c3   :  { %v8025_v36 = vsel %vm5664_vm13, 4294967295, %v8024_v36  ;;  %v1603_v8 = vsel %vm8027_vm10, %v4907_v38, 0.0  ;;  %1554 = vst [vmem:[#allocation7 + $0x130] sm:$0xff] %v1490_v17  ;;  %v2364_v7 = vld [vmem:[#allocation2 + $0x138] sm:$0xff]  ;;  %vm8029_vm11 = vcmp.ne.f32.partialorder %v5485_v20, -1e+30  ;;  %v1665_v63 = vadd.f32 %v1664_v23, %v1602_v51 }
 0x1c4   :  { %8026 = vst [vmem:[#allocation78_spill] sm:$0xff] %v8025_v36  ;;  %v1491_v6 = vsel %vm5664_vm13, %v2364_v7, inf  ;;  %vm5684_vm5 = vmand %vm8029_vm11, %vm8028_vm12  ;;  %v5689_v38 = vld [vmem:[#allocation5 + $0x1a0] sm:$0xff]  ;;  %vm8032_vm6 = vcmp.ne.f32.partialorder %v5499_v26, 255.0  ;;  %vm8033_vm12 = vcmp.ne.f32.partialorder %v5499_v26, -1e+30  ;;  %v1856_v39 = vadd.f32 %v1966_v21, %v1855_v16 }
 0x1c5   :  { %1555 = vst [vmem:[#allocation7 + $0x138] sm:$0xff] %v1491_v6  ;;  %v2366_v9 = vld [vmem:[#allocation2 + $0x140] sm:$0xff]  ;;  %vm5698_vm11 = vmand %vm8033_vm12, %vm8032_vm6  ;;  %v8034_v7 = vmov 0  ;;  %v5703_v36 = vld [vmem:[#allocation5 + $0x1a8] sm:$0xff]  ;;  %vm8037_vm13 = vcmp.ne.f32.partialorder %v5213_v50, -1e+30  ;;  %v1666_v50 = vadd.f32 %v1665_v63, %v1603_v8 }
 0x1c6   :  { %v1492_v17 = vsel %vm5684_vm5, %v2366_v9, inf  ;;  %v8035_v7 = vsel %vm5698_vm11, 4294967295, %v8034_v7  ;;  %v1604_v51 = vsel %vm8037_vm13, %v4915_v25, 0.0  ;;  %v1967_v0 = vsel %vm5378_vm8, 1.0, %v7897_v3  ;;  %v2368_v23 = vld [vmem:[#allocation2 + $0x148] sm:$0xff]  ;;  %v5723_v25 = vld [vmem:[#allocation5 + $0x1b0] sm:$0xff] }
 0x1c7   :  { %8036 = vst [vmem:[#allocation146_spill] sm:$0xff] %v8035_v7  ;;  %1556 = vst [vmem:[#allocation7 + $0x140] sm:$0xff] %v1492_v17  ;;  %v1493_v15 = vsel %vm5698_vm11, %v2368_v23, inf  ;;  %vm8038_vm6 = vcmp.ne.f32.partialorder %v5519_v55, 255.0  ;;  %vm8039_vm12 = vcmp.ne.f32.partialorder %v5519_v55, -1e+30 }
 0x1c8   :  { %vm5718_vm0 = vmand %vm8039_vm12, %vm8038_vm6  ;;  %v8040_v6 = vmov 0  ;;  %8042 = vst [vmem:[#allocation80_spill] sm:$0xff] %v5723_v25  ;;  %v2370_v9 = vld [vmem:[#allocation2 + $0x150] sm:$0xff]  ;;  %vm8043_vm8 = vcmp.ne.f32.partialorder %v5533_v18, 255.0  ;;  %vm8044_vm6 = vcmp.ne.f32.partialorder %v5533_v18, -1e+30 }
 0x1c9   :  { %v8041_v6 = vsel %vm5718_vm0, 4294967295, %v8040_v6  ;;  %1557 = vst [vmem:[#allocation7 + $0x148] sm:$0xff] %v1493_v15  ;;  %v1494_v17 = vsel %vm5718_vm0, %v2370_v9, inf  ;;  %vm5732_vm12 = vmand %vm8044_vm6, %vm8043_vm8  ;;  %v8045_v23 = vmov 0  ;;  %v5737_v7 = vld [vmem:[#allocation5 + $0x1b8] sm:$0xff]  ;;  %vm8050_vm0 = vnez %v7948_v34  ;;  %v2374_v9 = vld [vmem:[#allocation2 + $0x160] sm:$0xff] }
 0x1ca   :  { %v8046_v23 = vsel %vm5732_vm12, 4294967295, %v8045_v23  ;;  %8048 = vst [vmem:[#allocation61_spill] sm:$0xff] %v5737_v7  ;;  %vm8049_vm11 = vcmp.ne.f32.partialorder %v5227_v56, -1e+30  ;;  %v1968_v21 = vsel %vm8050_vm0, 1.0, %v7897_v3  ;;  %1558 = vst [vmem:[#allocation7 + $0x150] sm:$0xff] %v1494_v17  ;;  %v1857_v34 = vadd.f32 %v1967_v0, %v1856_v39 }
 0x1cb   :  { %8047 = vst [vmem:[#allocation147_spill] sm:$0xff] %v8046_v23  ;;  %v1605_v8 = vsel %vm8049_vm11, %v4925_v28, 0.0  ;;  %v2372_v63 = vld [vmem:[#allocation2 + $0x158] sm:$0xff]  ;;  %vm8051_vm8 = vcmp.ne.f32.partialorder %v5553_v57, 255.0  ;;  %vm8052_vm6 = vcmp.ne.f32.partialorder %v5553_v57, -1e+30  ;;  %v1667_v28 = vadd.f32 %v1666_v50, %v1604_v51 }
 0x1cc   :  { %v1495_v16 = vsel %vm5732_vm12, %v2372_v63, inf  ;;  %vm5752_vm10 = vmand %vm8052_vm6, %vm8051_vm8  ;;  %v5757_v56 = vld [vmem:[#allocation5 + $0x1c0] sm:$0xff]  ;;  %vm8056_vm0 = vcmp.ne.f32.partialorder %v5567_v58, 255.0  ;;  %vm8057_vm8 = vcmp.ne.f32.partialorder %v5567_v58, -1e+30  ;;  %v8058_v63 = vmov 0 }
 0x1cd   :  { %8055 = vst [vmem:[#allocation154_spill] sm:$0xff] %v5757_v56  ;;  %1559 = vst [vmem:[#allocation7 + $0x158] sm:$0xff] %v1495_v16  ;;  %v1496_v17 = vsel %vm5752_vm10, %v2374_v9, inf  ;;  %v5771_v23 = vld [vmem:[#allocation5 + $0x1c8] sm:$0xff]  ;;  %vm8062_vm12 = vcmp.ne.f32.partialorder %v5247_v49, -1e+30  ;;  %v1668_v49 = vadd.f32 %v1667_v28, %v1605_v8  ;;  %v1858_v19 = vadd.f32 %v1968_v21, %v1857_v34 }
 0x1ce   :  { %vm5766_vm6 = vmand %vm8057_vm8, %vm8056_vm0  ;;  %8061 = vst [vmem:[#allocation148_spill] sm:$0xff] %v5771_v23  ;;  %v1606_v51 = vsel %vm8062_vm12, %v4933_v12, 0.0  ;;  %v1969_v0 = vsel %vm5412_vm15, 1.0, %v7897_v3  ;;  %v2376_v50 = vld [vmem:[#allocation2 + $0x168] sm:$0xff]  ;;  %vm8063_vm0 = vcmp.ne.f32.partialorder %v5587_v42, 255.0  ;;  %v8065_v16 = vmov 0 }
 0x1cf   :  { %v8059_v63 = vsel %vm5766_vm6, 4294967295, %v8058_v63  ;;  %1560 = vst [vmem:[#allocation7 + $0x160] sm:$0xff] %v1496_v17  ;;  %v1497_v39 = vsel %vm5766_vm6, %v2376_v50, inf  ;;  %vm8064_vm8 = vcmp.ne.f32.partialorder %v5587_v42, -1e+30  ;;  %v5791_v12 = vld [vmem:[#allocation5 + $0x1d0] sm:$0xff] }
 0x1d0   :  { %8060 = vst [vmem:[#allocation81_spill] sm:$0xff] %v8059_v63  ;;  %vm5786_vm13 = vmand %vm8064_vm8, %vm8063_vm0  ;;  %v2378_v9 = vld [vmem:[#allocation2 + $0x170] sm:$0xff]  ;;  %vm8068_vm15 = vcmp.ne.f32.partialorder %v5601_v5, 255.0  ;;  %vm8069_vm0 = vcmp.ne.f32.partialorder %v5601_v5, -1e+30  ;;  %v8070_v50 = vmov 0 }
 0x1d1   :  { %v8066_v16 = vsel %vm5786_vm13, 4294967295, %v8065_v16  ;;  %8067 = vst [vmem:[#allocation65_spill] sm:$0xff] %v5791_v12  ;;  %1561 = vst [vmem:[#allocation7 + $0x168] sm:$0xff] %v1497_v39  ;;  %v1498_v17 = vsel %vm5786_vm13, %v2378_v9, inf  ;;  %v5805_v63 = vld [vmem:[#allocation5 + $0x1d8] sm:$0xff]  ;;  %vm8075_vm13 = vnez %v7957_v32  ;;  %v1859_v32 = vadd.f32 %v1969_v0, %v1858_v19  ;;  %v2382_v9 = vld [vmem:[#allocation2 + $0x180] sm:$0xff] }
 0x1d2   :  { %vm5800_vm8 = vmand %vm8069_vm0, %vm8068_vm15  ;;  %8073 = vst [vmem:[#allocation84_spill] sm:$0xff] %v5805_v63  ;;  %vm8074_vm6 = vcmp.ne.f32.partialorder %v5261_v22, -1e+30  ;;  %v1970_v21 = vsel %vm8075_vm13, 1.0, %v7897_v3  ;;  %v2380_v28 = vld [vmem:[#allocation2 + $0x178] sm:$0xff]  ;;  %vm8076_vm15 = vcmp.ne.f32.partialorder %v5621_v43, 255.0  ;;  %v1669_v22 = vadd.f32 %v1668_v49, %v1606_v51 }
 0x1d3   :  { %v8071_v50 = vsel %vm5800_vm8, 4294967295, %v8070_v50  ;;  %v1607_v8 = vsel %vm8074_vm6, %v4941_v60, 0.0  ;;  %1562 = vst [vmem:[#allocation7 + $0x170] sm:$0xff] %v1498_v17  ;;  %v1499_v34 = vsel %vm5800_vm8, %v2380_v28, inf  ;;  %vm8077_vm0 = vcmp.ne.f32.partialorder %v5621_v43, -1e+30 }
 0x1d4   :  { %8072 = vst [vmem:[#allocation155_spill] sm:$0xff] %v8071_v50  ;;  %vm5820_vm11 = vmand %vm8077_vm0, %vm8076_vm15  ;;  %v5825_v60 = vld [vmem:[#allocation5 + $0x1e0] sm:$0xff]  ;;  %vm8081_vm13 = vcmp.ne.f32.partialorder %v5635_v37, 255.0  ;;  %vm8082_vm15 = vcmp.ne.f32.partialorder %v5635_v37, -1e+30  ;;  %v8083_v28 = vmov 0  ;;  %v1860_v47 = vadd.f32 %v1970_v21, %v1859_v32 }
 0x1d5   :  { %8080 = vst [vmem:[#allocation67_spill] sm:$0xff] %v5825_v60  ;;  %1563 = vst [vmem:[#allocation7 + $0x178] sm:$0xff] %v1499_v34  ;;  %v1500_v17 = vsel %vm5820_vm11, %v2382_v9, inf  ;;  %v5839_v50 = vld [vmem:[#allocation5 + $0x1e8] sm:$0xff]  ;;  %vm8087_vm8 = vcmp.ne.f32.partialorder %v5281_v31, -1e+30  ;;  %v1670_v31 = vadd.f32 %v1669_v22, %v1607_v8 }
 0x1d6   :  { %vm5834_vm0 = vmand %vm8082_vm15, %vm8081_vm13  ;;  %8086 = vst [vmem:[#allocation86_spill] sm:$0xff] %v5839_v50  ;;  %v1608_v51 = vsel %vm8087_vm8, %v4949_v14, 0.0  ;;  %v1971_v0 = vsel %vm5446_vm2, 1.0, %v7897_v3  ;;  %v2384_v49 = vld [vmem:[#allocation2 + $0x188] sm:$0xff]  ;;  %vm8088_vm13 = vcmp.ne.f32.partialorder %v5655_v41, 255.0  ;;  %v8090_v34 = vmov 0 }
 0x1d7   :  { %v8084_v28 = vsel %vm5834_vm0, 4294967295, %v8083_v28  ;;  %1564 = vst [vmem:[#allocation7 + $0x180] sm:$0xff] %v1500_v17  ;;  %v1501_v19 = vsel %vm5834_vm0, %v2384_v49, inf  ;;  %vm8089_vm15 = vcmp.ne.f32.partialorder %v5655_v41, -1e+30  ;;  %v5859_v14 = vld [vmem:[#allocation5 + $0x1f0] sm:$0xff] }
 0x1d8   :  { %8085 = vst [vmem:[#allocation19_spill] sm:$0xff] %v8084_v28  ;;  %vm5854_vm12 = vmand %vm8089_vm15, %vm8088_vm13  ;;  %v2386_v9 = vld [vmem:[#allocation2 + $0x190] sm:$0xff]  ;;  %vm8093_vm2 = vcmp.ne.f32.partialorder %v5669_v48, 255.0  ;;  %vm8094_vm13 = vcmp.ne.f32.partialorder %v5669_v48, -1e+30  ;;  %v8095_v49 = vmov 0 }
 0x1d9   :  { %v8091_v34 = vsel %vm5854_vm12, 4294967295, %v8090_v34  ;;  %8092 = vst [vmem:[#allocation151_spill] sm:$0xff] %v5859_v14  ;;  %1565 = vst [vmem:[#allocation7 + $0x188] sm:$0xff] %v1501_v19  ;;  %v1502_v17 = vsel %vm5854_vm12, %v2386_v9, inf  ;;  %v5873_v28 = vld [vmem:[#allocation5 + $0x1f8] sm:$0xff]  ;;  %vm8099_vm12 = vnez %v7966_v13  ;;  %v8102_v19 = vmov 0 }
 0x1da   :  { %vm5868_vm15 = vmand %vm8094_vm13, %vm8093_vm2  ;;  %8097 = vst [vmem:[#allocation109_spill] sm:$0xff] %v5873_v28  ;;  %vm8098_vm0 = vcmp.ne.f32.partialorder %v5295_v40, -1e+30  ;;  %v1972_v21 = vsel %vm8099_vm12, 1.0, %v7897_v3  ;;  %v2388_v22 = vld [vmem:[#allocation2 + $0x198] sm:$0xff]  ;;  %vm8100_vm2 = vcmp.ne.f32.partialorder %v5689_v38, 255.0  ;;  %v1671_v40 = vadd.f32 %v1670_v31, %v1608_v51 }
 0x1db   :  { %v8096_v49 = vsel %vm5868_vm15, 4294967295, %v8095_v49  ;;  %v1609_v8 = vsel %vm8098_vm0, %v4957_v46, 0.0  ;;  %1566 = vst [vmem:[#allocation7 + $0x190] sm:$0xff] %v1502_v17  ;;  %v1503_v32 = vsel %vm5868_vm15, %v2388_v22, inf  ;;  %vm8101_vm13 = vcmp.ne.f32.partialorder %v5689_v38, -1e+30 }
 0x1dc   :  { %vm5888_vm6 = vmand %vm8101_vm13, %vm8100_vm2  ;;  %v1861_v46 = vadd.f32 %v1971_v0, %v1860_v47  ;;  %1567 = vst [vmem:[#allocation7 + $0x198] sm:$0xff] %v1503_v32  ;;  %v2389_v13 = vld [vmem:[#allocation2 + $0x1a0] sm:$0xff]  ;;  %vm8105_vm12 = vcmp.ne.f32.partialorder %v5703_v36, 255.0  ;;  %vm8106_vm0 = vcmp.ne.f32.partialorder %v5703_v36, -1e+30  ;;  %v8107_v17 = vmov 0 }
 0x1dd   :  { %v8103_v19 = vsel %vm5888_vm6, 4294967295, %v8102_v19  ;;  %v1504_v9 = vsel %vm5888_vm6, %v2389_v13, inf  ;;  %vm5899_vm15 = vmand %vm8106_vm0, %vm8105_vm12  ;;  %vm8110_vm13 = vcmp.ne.f32.partialorder %v5315_v4, -1e+30  ;;  %v1973_v0 = vsel %vm5480_vm14, 1.0, %v7897_v3  ;;  %v2390_v31 = vld [vmem:[#allocation2 + $0x1a8] sm:$0xff] }
 0x1de   :  { %8104 = vst [vmem:[#allocation159_spill] sm:$0xff] %v8103_v19  ;;  %v8108_v17 = vsel %vm5899_vm15, 4294967295, %v8107_v17  ;;  %v1610_v51 = vsel %vm8110_vm13, %v4965_v29, 0.0  ;;  %1568 = vst [vmem:[#allocation7 + $0x1a0] sm:$0xff] %v1504_v9  ;;  %v1505_v47 = vsel %vm5899_vm15, %v2390_v31, inf  ;;  %vm8111_vm12 = vcmp.ne.f32.partialorder %v5723_v25, 255.0 }
 0x1df   :  { %8109 = vst [vmem:[#allocation87_spill] sm:$0xff] %v8108_v17  ;;  %vm8112_vm0 = vcmp.ne.f32.partialorder %v5723_v25, -1e+30  ;;  %v8113_v22 = vmov 0  ;;  %v8116_v29 = vand.u32 2147483647, %v7625_v35  ;;  %v1672_v44 = vadd.f32 %v1671_v40, %v1609_v8 }
 0x1e0   :  { %vm5916_vm8 = vmand %vm8112_vm0, %vm8111_vm12  ;;  %v1862_v32 = vadd.f32 %v1972_v21, %v1861_v46  ;;  %1569 = vst [vmem:[#allocation7 + $0x1a8] sm:$0xff] %v1505_v47  ;;  %v2391_v13 = vld [vmem:[#allocation2 + $0x1b0] sm:$0xff]  ;;  %vm8119_vm14 = vcmp.ne.f32.partialorder %v5737_v7, 255.0  ;;  %vm8120_vm12 = vcmp.ne.f32.partialorder %v5737_v7, -1e+30  ;;  %v8121_v31 = vmov 0 }
 0x1e1   :  { %v8114_v22 = vsel %vm5916_vm8, 4294967295, %v8113_v22  ;;  %vm5923_vm13 = vcmp.lt.f32.partialorder %v8116_v29, 0.0004427343  ;;  %v1506_v9 = vsel %vm5916_vm8, %v2391_v13, inf  ;;  %vm5933_vm0 = vmand %vm8120_vm12, %vm8119_vm14  ;;  %v8124_v35 = vld [vmem:[#allocation145_spill] sm:$0xff]  ;;  %v2392_v46 = vld [vmem:[#allocation2 + $0x1b8] sm:$0xff] }
 0x1e2   :  { %8115 = vst [vmem:[#allocation152_spill] sm:$0xff] %v8114_v22  ;;  %v8122_v31 = vsel %vm5933_vm0, 4294967295, %v8121_v31  ;;  %vm8125_vm15 = vcmp.ne.f32.partialorder %v5329_v59, -1e+30  ;;  %v8126_v21 = vld [vmem:[#allocation141_spill] sm:$0xff]  ;;  %1570 = vst [vmem:[#allocation7 + $0x1b0] sm:$0xff] %v1506_v9  ;;  %v1673_v59 = vadd.f32 %v1672_v44, %v1610_v51  ;;  %v1863_v13 = vadd.f32 %v1973_v0, %v1862_v32 }
 0x1e3   :  { %8123 = vst [vmem:[#allocation112_spill] sm:$0xff] %v8122_v31  ;;  %v1611_v8 = vsel %vm8125_vm15, %v8124_v35, 0.0  ;;  %vm8127_vm6 = vnez %v8126_v21  ;;  %v1507_v47 = vsel %vm5933_vm0, %v2392_v46, inf  ;;  %vm8128_vm14 = vcmp.ne.f32.partialorder %v5757_v56, 255.0  ;;  %v2393_v35 = vld [vmem:[#allocation2 + $0x1c0] sm:$0xff]  ;;  %v8138_v46 = vld [vmem:[#allocation71_spill] sm:$0xff] }
 0x1e4   :  { %v1974_v40 = vsel %vm8127_vm6, 1.0, %v7897_v3  ;;  %vm8129_vm12 = vcmp.ne.f32.partialorder %v5757_v56, -1e+30  ;;  %v8130_v29 = vmov 0  ;;  %1571 = vst [vmem:[#allocation7 + $0x1b8] sm:$0xff] %v1507_v47  ;;  %vm8133_vm6 = vcmp.ne.f32.partialorder %v5771_v23, 255.0 }
 0x1e5   :  { %vm5950_vm8 = vmand %vm8129_vm12, %vm8128_vm14  ;;  %vm8134_vm15 = vcmp.ne.f32.partialorder %v5771_v23, -1e+30  ;;  %v8135_v21 = vmov 0  ;;  %vm8139_vm12 = vcmp.ne.f32.partialorder %v5349_v10, -1e+30  ;;  %v1975_v0 = vsel %vm5514_vm3, 1.0, %v7897_v3 }
 0x1e6   :  { %v8131_v29 = vsel %vm5950_vm8, 4294967295, %v8130_v29  ;;  %v1508_v9 = vsel %vm5950_vm8, %v2393_v35, inf  ;;  %vm5961_vm0 = vmand %vm8134_vm15, %vm8133_vm6  ;;  %v1612_v51 = vsel %vm8139_vm12, %v8138_v46, 0.0  ;;  %v2394_v44 = vld [vmem:[#allocation2 + $0x1c8] sm:$0xff]  ;;  %vm8140_vm6 = vcmp.ne.f32.partialorder %v5791_v12, 255.0  ;;  %v2395_v30 = vld [vmem:[#allocation2 + $0x1d0] sm:$0xff] }
 0x1e7   :  { %8132 = vst [vmem:[#allocation160_spill] sm:$0xff] %v8131_v29  ;;  %v8136_v21 = vsel %vm5961_vm0, 4294967295, %v8135_v21  ;;  %1572 = vst [vmem:[#allocation7 + $0x1c0] sm:$0xff] %v1508_v9  ;;  %v1509_v32 = vsel %vm5961_vm0, %v2394_v44, inf  ;;  %vm8141_vm15 = vcmp.ne.f32.partialorder %v5791_v12, -1e+30  ;;  %v1674_v10 = vadd.f32 %v1673_v59, %v1611_v8 }
 0x1e8   :  { %8137 = vst [vmem:[#allocation90_spill] sm:$0xff] %v8136_v21  ;;  %vm5978_vm2 = vmand %vm8141_vm15, %vm8140_vm6  ;;  %v8142_v47 = vmov 0  ;;  %v1864_v35 = vadd.f32 %v1974_v40, %v1863_v13  ;;  %vm8145_vm3 = vcmp.ne.f32.partialorder %v5805_v63, 255.0  ;;  %vm8146_vm12 = vcmp.ne.f32.partialorder %v5805_v63, -1e+30  ;;  %v8150_v44 = vld [vmem:[#allocation139_spill] sm:$0xff] }
 0x1e9   :  { %v8143_v47 = vsel %vm5978_vm2, 4294967295, %v8142_v47  ;;  %1573 = vst [vmem:[#allocation7 + $0x1c8] sm:$0xff] %v1509_v32  ;;  %v1510_v9 = vsel %vm5978_vm2, %v2395_v30, inf  ;;  %vm5989_vm0 = vmand %vm8146_vm12, %vm8145_vm3  ;;  %v8147_v46 = vmov 0  ;;  %vm8151_vm15 = vcmp.ne.f32.partialorder %v5363_v61, -1e+30 }
 0x1ea   :  { %8144 = vst [vmem:[#allocation22_spill] sm:$0xff] %v8143_v47  ;;  %v8148_v46 = vsel %vm5989_vm0, 4294967295, %v8147_v46  ;;  %v1613_v8 = vsel %vm8151_vm15, %v8150_v44, 0.0  ;;  %v8152_v40 = vld [vmem:[#allocation76_spill] sm:$0xff]  ;;  %1574 = vst [vmem:[#allocation7 + $0x1d0] sm:$0xff] %v1510_v9  ;;  %vm8154_vm3 = vcmp.ne.f32.partialorder %v5825_v60, 255.0  ;;  %v1865_v9 = vadd.f32 %v1975_v0, %v1864_v35 }
 0x1eb   :  { %8149 = vst [vmem:[#allocation29_spill] sm:$0xff] %v8148_v46  ;;  %vm8153_vm14 = vnez %v8152_v40  ;;  %v2396_v13 = vld [vmem:[#allocation2 + $0x1d8] sm:$0xff]  ;;  %vm8155_vm12 = vcmp.ne.f32.partialorder %v5825_v60, -1e+30  ;;  %v8156_v30 = vmov 0  ;;  %v8159_v61 = vld [vmem:[#allocation227_spill] sm:$0xff]  ;;  %v1675_v40 = vadd.f32 %v1674_v10, %v1612_v51 }
 0x1ec   :  { %v1976_v59 = vsel %vm8153_vm14, 1.0, %v7897_v3  ;;  %v1511_v32 = vsel %vm5989_vm0, %v2396_v13, inf  ;;  %vm6006_vm2 = vmand %vm8155_vm12, %vm8154_vm3  ;;  %v1128_v44 = vadd.f32 1.0, %v8159_v61  ;;  %v2397_v47 = vld [vmem:[#allocation2 + $0x1e0] sm:$0xff]  ;;  %vm8160_vm14 = vcmp.ne.f32.partialorder %v5839_v50, 255.0  ;;  %v8165_v60 = vld [vmem:[#allocation118_spill] sm:$0xff] }
 0x1ed   :  { %v8157_v30 = vsel %vm6006_vm2, 4294967295, %v8156_v30  ;;  %1575 = vst [vmem:[#allocation7 + $0x1d8] sm:$0xff] %v1511_v32  ;;  %v1512_v13 = vsel %vm6006_vm2, %v2397_v47, inf  ;;  %vm8161_vm15 = vcmp.ne.f32.partialorder %v5839_v50, -1e+30  ;;  %v8162_v46 = vmov 0 }
 0x1ee   :  { %8158 = vst [vmem:[#allocation17_spill] sm:$0xff] %v8157_v30  ;;  %vm6018_vm3 = vmand %vm8161_vm15, %vm8160_vm14  ;;  %v8166_v21 = vand.u32 2147483647, %v8165_v60  ;;  %v8169_v51 = vld [vmem:[#allocation40_spill] sm:$0xff]  ;;  %v8170_v0 = vld [vmem:[#allocation66_spill] sm:$0xff]  ;;  %v1977_v50 = vsel %vm5548_vm1, 1.0, %v7897_v3 }
 0x1ef   :  { %v8163_v46 = vsel %vm6018_vm3, 4294967295, %v8162_v46  ;;  %vm8171_vm6 = vnez %v8170_v0  ;;  %v8172_v10 = vld [vmem:[#allocation63_spill] sm:$0xff]  ;;  %v8173_v35 = vld [vmem:[#allocation193_spill] sm:$0xff]  ;;  %v8175_v61 = vld [vmem:[#allocation18_spill] sm:$0xff]  ;;  %vm8176_vm2 = vcmp.ne.f32.partialorder %v5383_v33, -1e+30 }
 0x1f0   :  { %8164 = vst [vmem:[#allocation116_spill] sm:$0xff] %v8163_v46  ;;  %vm6024_vm12 = vcmp.lt.f32.partialorder %v8166_v21, 0.0004427343  ;;  %v8174_v47 = vsel %vm8171_vm6, %v8172_v10, %v8173_v35  ;;  %v1614_v30 = vsel %vm8176_vm2, %v8175_v61, 0.0  ;;  %1576 = vst [vmem:[#allocation7 + $0x1e0] sm:$0xff] %v1512_v13  ;;  %v2398_v60 = vld [vmem:[#allocation2 + $0x1e8] sm:$0xff]  ;;  %v1676_v10 = vadd.f32 %v1675_v40, %v1613_v8 }
 0x1f1   :  { %v1232_v32 = vadd.f32 %v8174_v47, %v8169_v51  ;;  %v1513_v21 = vsel %vm6018_vm3, %v2398_v60, inf  ;;  %vm8177_vm14 = vcmp.ne.f32.partialorder %v5859_v14, 255.0  ;;  %vm8178_vm15 = vcmp.ne.f32.partialorder %v5859_v14, -1e+30  ;;  %v8182_v51 = vld [vmem:[#allocation127_spill] sm:$0xff]  ;;  %v8192_v8 = vld [vmem:[#allocation41_spill] sm:$0xff] }
 0x1f2   :  { %vm6046_vm0 = vmand %vm8178_vm15, %vm8177_vm14  ;;  %v8179_v0 = vmov 0  ;;  %v1133_v33 = vadd.f32 1.0, %v8182_v51  ;;  %v1866_v35 = vadd.f32 %v1976_v59, %v1865_v9  ;;  %1577 = vst [vmem:[#allocation7 + $0x1e8] sm:$0xff] %v1513_v21  ;;  %v2399_v62 = vld [vmem:[#allocation2 + $0x1f0] sm:$0xff]  ;;  %vm8183_vm1 = vcmp.ne.f32.partialorder %v5873_v28, 255.0  ;;  %v8193_v59 = vld [vmem:[#allocation188_spill] sm:$0xff] }
 0x1f3   :  { %v8180_v0 = vsel %vm6046_vm0, 4294967295, %v8179_v0  ;;  %v1514_v13 = vsel %vm6046_vm0, %v2399_v62, inf  ;;  %vm8184_vm2 = vcmp.ne.f32.partialorder %v5873_v28, -1e+30  ;;  %v8185_v47 = vmov 0  ;;  %v8188_v61 = vld [vmem:[#allocation119_spill] sm:$0xff] }
 0x1f4   :  { %8181 = vst [vmem:[#allocation163_spill] sm:$0xff] %v8180_v0  ;;  %vm6057_vm6 = vmand %vm8184_vm2, %vm8183_vm1  ;;  %v8189_v60 = vand.u32 2147483647, %v8188_v61  ;;  %vm8194_vm15 = vnez %v8193_v59  ;;  %v8195_v40 = vld [vmem:[#allocation189_spill] sm:$0xff]  ;;  %v8196_v9 = vld [vmem:[#allocation110_spill] sm:$0xff]  ;;  %v1136_v12 = vmul.f32 -0.5, %v8182_v51  ;;  %v1677_v31 = vadd.f32 %v1676_v10, %v1614_v30 }
 0x1f5   :  { %v8186_v47 = vsel %vm6057_vm6, 4294967295, %v8185_v47  ;;  %v8197_v21 = vsel %vm8194_vm15, %v8195_v40, %v8196_v9  ;;  %v8198_v0 = vld [vmem:[#allocation75_spill] sm:$0xff]  ;;  %vm8199_vm1 = vcmp.ne.f32.partialorder %v5397_v24, -1e+30  ;;  %1578 = vst [vmem:[#allocation7 + $0x1f0] sm:$0xff] %v1514_v13  ;;  %v2400_v61 = vld [vmem:[#allocation2 + $0x1f8] sm:$0xff]  ;;  %v1867_v40 = vadd.f32 %v1977_v50, %v1866_v35 }
 0x1f6   :  { %8187 = vst [vmem:[#allocation93_spill] sm:$0xff] %v8186_v47  ;;  %vm6063_vm14 = vcmp.lt.f32.partialorder %v8189_v60, 0.0004427343  ;;  %v1233_v62 = vadd.f32 %v8197_v21, %v8192_v8  ;;  %v1615_v28 = vsel %vm8199_vm1, %v8198_v0, 0.0  ;;  %v8200_v14 = vld [vmem:[#allocation143_spill] sm:$0xff]  ;;  %v1515_v60 = vsel %vm6057_vm6, %v2400_v61, inf }
 0x1f7   :  { %vm8201_vm2 = vnez %v8200_v14  ;;  %1579 = vst [vmem:[#allocation7 + $0x1f8] sm:$0xff] %v1515_v60  ;;  %v8202_v8 = vld [vmem:[#allocation228_spill] sm:$0xff]  ;;  %v8203_v9 = vld [vmem:[#allocation218_spill] sm:$0xff]  ;;  %v8208_v21 = vld [vmem:[#allocation115_spill] sm:$0xff]  ;;  %vm8210_vm1 = vcmp.ne.f32.partialorder %v5417_v53, -1e+30 }
 0x1f8   :  { %v1978_v29 = vsel %vm8201_vm2, 1.0, %v7897_v3  ;;  %v8204_v0 = vld [vmem:[#allocation42_spill] sm:$0xff]  ;;  %v8207_v13 = vld [vmem:[#allocation108_spill] sm:$0xff]  ;;  %v1616_v61 = vsel %vm8210_vm1, %v1232_v32, 0.0  ;;  %v1979_v50 = vsel %vm5582_vm4, 1.0, %v7897_v3 }
 0x1f9   :  { %v8205_v14 = vld [vmem:[#allocation190_spill] sm:$0xff] }
 0x1fa   :  { %vm8206_vm15 = vnez %v8205_v14 }
 0x1fb   :  { %v8209_v23 = vsel %vm8206_vm15, %v8207_v13, %v8208_v21 }
 0x1fc   :  { %v1234_v47 = vadd.f32 %v8209_v23, %v8204_v0 }
 0x1fd   :  { %2452 = shalt.err (!%p2449_p0)
}
 0x1fe   :  { %1911 = dma.vmem_to_hbm [thread:$0]  %s1906_s1, 8192, %s6511_s2, [#allocation4], %s2510_s18, %s2510_s18, %s2511_s19   ;;  %v8211_v53 = vld [vmem:[#allocation129_spill] sm:$0xff]  ;;  %v1678_v1 = vadd.f32 %v1677_v31, %v1615_v28  ;;  %v1868_v32 = vadd.f32 %v1978_v29, %v1867_v40  ;;  %v8212_v10 = vld [vmem:[#allocation70_spill] sm:$0xff]  ;;  %v8216_v14 = vld [vmem:[#allocation191_spill] sm:$0xff]  ;;  %v1137_v31 = vadd.f32 1.0, %v1136_v12  ;;  %2259 = vlog2.f32 %v1133_v33 }
 0x1ff   :  { %v1142_v23 = vadd.f32 1.0, %v8211_v53  ;;  %v1145_v30 = vmul.f32 -0.5, %v8211_v53  ;;  %v6107_v35 = vmul.f32 0.6931472, %v8212_v10  ;;  %v8213_v60 = vld [vmem:[#allocation82_spill] sm:$0xff]  ;;  %v8217_v13 = vld [vmem:[#allocation200_spill] sm:$0xff] }
 0x200   :  { %v8214_v0 = vld [vmem:[#allocation194_spill] sm:$0xff]  ;;  %vm8219_vm2 = vcmp.ne.f32.partialorder %v5431_v2, -1e+30  ;;  %v1679_v29 = vadd.f32 %v1678_v1, %v1616_v61  ;;  %v1869_v40 = vadd.f32 %v1979_v50, %v1868_v32  ;;  %v8223_v10 = vld [vmem:[#allocation83_spill] sm:$0xff]  ;;  %v8226_v7 = vld [vmem:[#allocation192_spill] sm:$0xff]  ;;  %s2515_s2 = smov [#allocation8]  }
 0x201   :  { %vm8215_vm4 = vnez %v8214_v0  ;;  %v1617_v59 = vsel %vm8219_vm2, %v1233_v62, 0.0  ;;  %v8220_v22 = vld [vmem:[#allocation58_spill] sm:$0xff]  ;;  %v8224_v0 = vld [vmem:[#allocation111_spill] sm:$0xff]  ;;  %v8231_v12 = vld [vmem:[#allocation121_spill] sm:$0xff]  ;;  %2261 = vlog2.f32 %v1142_v23  ;;  %v1146_v1 = vadd.f32 1.0, %v1145_v30  ;;  %s1918_s30 = sshll.u32 %s2515_s2, 4  ;;  %s1919_s30 = int_to_ptr.vmem [resolvable:$true] %s1918_s30 }
 0x202   :  { %v8218_v21 = vsel %vm8215_vm4, %v8216_v14, %v8217_v13  ;;  %vm8221_vm15 = vnez %v8220_v22  ;;  %v8222_v17 = vld [vmem:[#allocation126_spill] sm:$0xff]  ;;  %vm8225_vm1 = vnez %v8224_v0  ;;  %v8227_v14 = vld [vmem:[#allocation117_spill] sm:$0xff]  ;;  %vm8229_vm4 = vcmp.ne.f32.partialorder %v5451_v45, -1e+30  ;;  %v8235_v32 = vld [vmem:[#allocation44_spill] sm:$0xff]  ;;  %s2516_s5 = smov [#allocation10]   ;;  %p2466_p2 = scmp.lt.s32.totalorder %s1919_s30, %s1919_s30 }
 0x203   :  { %v1235_v24 = vadd.f32 %v8218_v21, %v8213_v60  ;;  %v1980_v56 = vsel %vm8221_vm15, 1.0, %v7897_v3  ;;  %v6121_v28 = vmul.f32 %v8222_v17, %v1128_v44  ;;  %v8228_v60 = vsel %vm8225_vm1, %v8226_v7, %v8227_v14  ;;  %v8230_v44 = vld [vmem:[#allocation137_spill] sm:$0xff]  ;;  %v8236_v45 = vld [vmem:[#allocation195_spill] sm:$0xff]  ;;  %v8239_v21 = vld [vmem:[#allocation204_spill] sm:$0xff]  ;;  %s1928_s6 = sshll.u32 %s2516_s5, 4  ;;  %s2461_s7 = scalar_lea.vmem %s1919_s30, 128  ;;  %s1929_s6 = int_to_ptr.vmem [resolvable:$true] %s1928_s6 }
 0x204   :  { %v1236_v13 = vadd.f32 %v8228_v60, %v8223_v10  ;;  %v1618_v2 = vsel %vm8229_vm4, %v1234_v47, 0.0  ;;  %v1981_v22 = vsel %vm5616_vm9, 1.0, %v7897_v3  ;;  %v6135_v62 = vmul.f32 0.6931472, %v8230_v44  ;;  %v8238_v47 = vld [vmem:[#allocation113_spill] sm:$0xff]  ;;  %v8242_v14 = vld [vmem:[#allocation98_spill] sm:$0xff]  ;;  %p2462_p1 = scmp.ne.s32.totalorder %s1919_s30, %s2461_s7  ;;  %p2467_p3 = scmp.lt.s32.totalorder %s2461_s7, %s2461_s7 }
 0x205   :  { %v8232_v61 = vand.u32 2147483647, %v8231_v12  ;;  %v1680_v50 = vadd.f32 %v1679_v29, %v1617_v59  ;;  %v1870_v7 = vadd.f32 %v1980_v56, %v1869_v40  ;;  %vm8237_vm15 = vnez %v8236_v45  ;;  %v8244_v44 = vld [vmem:[#allocation223_spill] sm:$0xff]  ;;  %v8246_v40 = vld [vmem:[#allocation45_spill] sm:$0xff] }
 0x206   :  { %v8240_v54 = vsel %vm8237_vm15, %v8238_v47, %v8239_v21  ;;  %vm8241_vm9 = vcmp.ne.f32.partialorder %v5465_v52, -1e+30  ;;  %vm8243_vm1 = vnez %v8242_v14  ;;  %v6159_v59 = vmul.f32 %v8182_v51, %v1137_v31  ;;  %v8247_v12 = vld [vmem:[#allocation197_spill] sm:$0xff]  ;;  %v8249_v52 = vld [vmem:[#allocation196_spill] sm:$0xff]  ;;  %v8255_v14 = vld [vmem:[#allocation46_spill] sm:$0xff]  ;;  %p2468_p4 = por %p2467_p3, %p2466_p2 }
 0x207   :  { %vm6139_vm2 = vcmp.lt.f32.partialorder %v8232_v61, 0.0004427343  ;;  %v1237_v10 = vadd.f32 %v8240_v54, %v8235_v32  ;;  %v1619_v0 = vsel %vm8241_vm9, %v1235_v24, 0.0  ;;  %v1982_v60 = vsel %vm8243_vm1, 1.0, %v7897_v3  ;;  %v8250_v24 = vld [vmem:[#allocation206_spill] sm:$0xff]  ;;  %v8253_v31 = vld [vmem:[#allocation224_spill] sm:$0xff] }
 0x208   :  { %8245 = vst [vmem:[#allocation21_spill] sm:$0xff] %v6159_v59  ;;  %v1681_v23 = vadd.f32 %v1680_v50, %v1618_v2  ;;  %v1871_v30 = vadd.f32 %v1981_v22, %v1870_v7  ;;  %vm8248_vm4 = vnez %v8247_v12  ;;  %vm8252_vm15 = vcmp.ne.f32.partialorder %v5485_v20, -1e+30  ;;  %v8254_v22 = vld [vmem:[#allocation131_spill] sm:$0xff]  ;;  %v8258_v20 = vld [vmem:[#allocation198_spill] sm:$0xff]  ;;  %v8266_v56 = vld [vmem:[#allocation85_spill] sm:$0xff]  ;;  %p2469_p5 = pnand %p2468_p4, %p2462_p1 }
 0x209   :  { %v8251_v61 = vsel %vm8248_vm4, %v8249_v52, %v8250_v24  ;;  %v1620_v45 = vsel %vm8252_vm15, %v1236_v13, 0.0  ;;  %v1983_v47 = vsel %vm5650_vm7, 1.0, %v7897_v3  ;;  %v1151_v50 = vadd.f32 1.0, %v8254_v22  ;;  %v8259_v13 = vld [vmem:[#allocation207_spill] sm:$0xff]  ;;  %v8262_v24 = vld [vmem:[#allocation78_spill] sm:$0xff]  ;;  %v8312_v59 = vld [vmem:[#allocation213_spill] sm:$0xff] }
 0x20a   :  { %v1238_v32 = vadd.f32 %v8251_v61, %v8246_v40  ;;  %v1682_v7 = vadd.f32 %v1681_v23, %v1619_v0  ;;  %v1872_v21 = vadd.f32 %v1982_v60, %v1871_v30  ;;  %v1154_v54 = vmul.f32 -0.5, %v8254_v22  ;;  %v8256_v40 = vld [vmem:[#allocation199_spill] sm:$0xff]  ;;  %v8265_v30 = vld [vmem:[#allocation16_spill] sm:$0xff] }
 0x20b   :  { %vm8257_vm9 = vnez %v8256_v40  ;;  %vm8261_vm7 = vcmp.ne.f32.partialorder %v5499_v26, -1e+30  ;;  %vm8263_vm1 = vnez %v8262_v24  ;;  %v6191_v2 = vmul.f32 %v8211_v53, %v1146_v1  ;;  %v8270_v26 = vld [vmem:[#allocation210_spill] sm:$0xff]  ;;  %v8273_v24 = vld [vmem:[#allocation123_spill] sm:$0xff] }
 0x20c   :  { %v8260_v12 = vsel %vm8257_vm9, %v8258_v20, %v8259_v13  ;;  %v1621_v27 = vsel %vm8261_vm7, %v1237_v10, 0.0  ;;  %v1984_v61 = vsel %vm8263_vm1, 1.0, %v7897_v3  ;;  %v1683_v60 = vadd.f32 %v1682_v7, %v1620_v45  ;;  %v8267_v20 = vld [vmem:[#allocation201_spill] sm:$0xff]  ;;  %v8277_v7 = vld [vmem:[#allocation94_spill] sm:$0xff] }
 0x20d   :  { %v1239_v52 = vadd.f32 %v8260_v12, %v8255_v14  ;;  %8264 = vst [vmem:[#allocation120_spill] sm:$0xff] %v6191_v2  ;;  %v1873_v23 = vadd.f32 %v1983_v47, %v1872_v21  ;;  %v6195_v40 = vmul.f32 0.6931472, %v8265_v30  ;;  %vm8268_vm4 = vnez %v8267_v20  ;;  %v8269_v14 = vld [vmem:[#allocation202_spill] sm:$0xff] }
 0x20e   :  { %v8271_v10 = vsel %vm8268_vm4, %v8269_v14, %v8270_v26  ;;  %vm8272_vm15 = vcmp.ne.f32.partialorder %v5519_v55, -1e+30  ;;  %v1985_v1 = vsel %vm5684_vm5, 1.0, %v7897_v3  ;;  %v8274_v45 = vand.u32 2147483647, %v8273_v24  ;;  %v8279_v26 = vld [vmem:[#allocation205_spill] sm:$0xff] }
 0x20f   :  { %v1240_v13 = vadd.f32 %v8271_v10, %v8266_v56  ;;  %v1622_v12 = vsel %vm8272_vm15, %v1238_v32, 0.0  ;;  %2263 = vlog2.f32 %v1151_v50  ;;  %v1160_v21 = vadd.f32 1.0, %v8277_v7  ;;  %v8278_v56 = vld [vmem:[#allocation47_spill] sm:$0xff]  ;;  %v8282_v32 = vld [vmem:[#allocation214_spill] sm:$0xff] }
 0x210   :  { %vm6210_vm9 = vcmp.lt.f32.partialorder %v8274_v45, 0.0004427343  ;;  %v1684_v30 = vadd.f32 %v1683_v60, %v1621_v27  ;;  %v1874_v20 = vadd.f32 %v1984_v61, %v1873_v23  ;;  %v1155_v14 = vadd.f32 1.0, %v1154_v54  ;;  %v8281_v55 = vld [vmem:[#allocation203_spill] sm:$0xff]  ;;  %v8285_v45 = vld [vmem:[#allocation146_spill] sm:$0xff]  ;;  %v8287_v60 = vld [vmem:[#allocation225_spill] sm:$0xff] }
 0x211   :  { %vm8280_vm7 = vnez %v8279_v26  ;;  %vm8284_vm5 = vcmp.ne.f32.partialorder %v5533_v18, -1e+30  ;;  %vm8286_vm1 = vnez %v8285_v45  ;;  %v1163_v50 = vmul.f32 -0.5, %v8277_v7  ;;  %v8288_v26 = vld [vmem:[#allocation49_spill] sm:$0xff]  ;;  %v8291_v18 = vld [vmem:[#allocation208_spill] sm:$0xff] }
 0x212   :  { %v8283_v10 = vsel %vm8280_vm7, %v8281_v55, %v8282_v32  ;;  %v1623_v24 = vsel %vm8284_vm5, %v1239_v52, 0.0  ;;  %v1986_v0 = vsel %vm8286_vm1, 1.0, %v7897_v3  ;;  %v1685_v61 = vadd.f32 %v1684_v30, %v1622_v12  ;;  %v8292_v52 = vld [vmem:[#allocation219_spill] sm:$0xff]  ;;  %v8296_v30 = vld [vmem:[#allocation133_spill] sm:$0xff] }
 0x213   :  { %v1241_v11 = vadd.f32 %v8283_v10, %v8278_v56  ;;  %v1875_v54 = vadd.f32 %v1985_v1, %v1874_v20  ;;  %v8289_v56 = vld [vmem:[#allocation209_spill] sm:$0xff]  ;;  %vm8294_vm15 = vcmp.ne.f32.partialorder %v5553_v57, -1e+30  ;;  %vm8295_vm7 = vnez %v8041_v6  ;;  %v6243_v1 = vpop.eup %2259  ;;  %v8302_v6 = vld [vmem:[#allocation211_spill] sm:$0xff] }
 0x214   :  { %vm8290_vm4 = vnez %v8289_v56  ;;  %v1624_v10 = vsel %vm8294_vm15, %v1240_v13, 0.0  ;;  %v1987_v12 = vsel %vm8295_vm7, 1.0, %v7897_v3  ;;  %2265 = vlog2.f32 %v1160_v21  ;;  %v6246_v27 = vpop.eup %2261  ;;  %v8297_v56 = vld [vmem:[#allocation124_spill] sm:$0xff] }
 0x215   :  { %v8293_v55 = vsel %vm8290_vm4, %v8291_v18, %v8292_v52  ;;  %v1169_v20 = vadd.f32 1.0, %v8296_v30  ;;  %v1686_v45 = vadd.f32 %v1685_v61, %v1623_v24  ;;  %v1876_v23 = vadd.f32 %v1986_v0, %v1875_v54  ;;  %v8301_v13 = vld [vmem:[#allocation48_spill] sm:$0xff]  ;;  %v8308_v24 = vld [vmem:[#allocation147_spill] sm:$0xff] }
 0x216   :  { %v1242_v32 = vadd.f32 %v8293_v55, %v8288_v26  ;;  %v8298_v29 = vand.u32 2147483647, %v8297_v56  ;;  %v1172_v57 = vmul.f32 -0.5, %v8296_v30  ;;  %vm8303_vm1 = vnez %v8302_v6  ;;  %v8304_v18 = vld [vmem:[#allocation212_spill] sm:$0xff]  ;;  %v8311_v6 = vld [vmem:[#allocation50_spill] sm:$0xff] }
 0x217   :  { %v8305_v52 = vld [vmem:[#allocation220_spill] sm:$0xff]  ;;  %vm8307_vm4 = vcmp.ne.f32.partialorder %v5567_v58, -1e+30  ;;  %vm8309_vm15 = vnez %v8308_v24  ;;  %v6268_v56 = vmul.f32 %v8254_v22, %v1155_v14  ;;  %v1687_v2 = vadd.f32 %v1686_v45, %v1624_v10  ;;  %v8322_v24 = vld [vmem:[#allocation23_spill] sm:$0xff] }
 0x218   :  { %vm6250_vm5 = vcmp.lt.f32.partialorder %v8298_v29, 0.0004427343  ;;  %v8306_v21 = vsel %vm8303_vm1, %v8304_v18, %v8305_v52  ;;  %v1625_v0 = vsel %vm8307_vm4, %v1241_v11, 0.0  ;;  %v1988_v61 = vsel %vm8309_vm15, 1.0, %v7897_v3  ;;  %v8310_v29 = vld [vmem:[#allocation72_spill] sm:$0xff]  ;;  %v8314_v18 = vld [vmem:[#allocation215_spill] sm:$0xff] }
 0x219   :  { %v1243_v55 = vadd.f32 %v8306_v21, %v8301_v13  ;;  %v1108_v54 = vmul.f32 0.6931472, %v8310_v29  ;;  %v1877_v19 = vadd.f32 %v1987_v12, %v1876_v23  ;;  %v1164_v25 = vadd.f32 1.0, %v1163_v50  ;;  %v8315_v13 = vld [vmem:[#allocation221_spill] sm:$0xff]  ;;  %v8321_v50 = vld [vmem:[#allocation134_spill] sm:$0xff]  ;;  %v8323_v29 = vld [vmem:[#allocation216_spill] sm:$0xff] }
 0x21a   :  { %vm8313_vm7 = vnez %v8312_v59  ;;  %vm8317_vm1 = vcmp.ne.f32.partialorder %v5587_v42, -1e+30  ;;  %v1989_v21 = vsel %vm5752_vm10, 1.0, %v7897_v3  ;;  %v8318_v14 = vand.u32 2147483647, %v8222_v17  ;;  %v8325_v42 = vld [vmem:[#allocation217_spill] sm:$0xff] }
 0x21b   :  { %v8316_v52 = vsel %vm8313_vm7, %v8314_v18, %v8315_v13  ;;  %v1626_v11 = vsel %vm8317_vm1, %v1242_v32, 0.0  ;;  %2267 = vlog2.f32 %v1169_v20  ;;  %v1178_v59 = vadd.f32 1.0, %v8321_v50  ;;  %v8326_v32 = vld [vmem:[#allocation222_spill] sm:$0xff]  ;;  %v8329_v18 = vld [vmem:[#allocation81_spill] sm:$0xff] }
 0x21c   :  { %v1244_v58 = vadd.f32 %v8316_v52, %v8311_v6  ;;  %vm6283_vm4 = vcmp.lt.f32.partialorder %v8318_v14, 0.0004427343  ;;  %v1688_v23 = vadd.f32 %v1687_v2, %v1625_v0  ;;  %v1878_v12 = vadd.f32 %v1988_v61, %v1877_v19  ;;  %v8331_v52 = vld [vmem:[#allocation136_spill] sm:$0xff]  ;;  %v8332_v0 = vld [vmem:[#allocation226_spill] sm:$0xff] }
 0x21d   :  { %v1173_v45 = vadd.f32 1.0, %v1172_v57  ;;  %vm8324_vm15 = vnez %v8323_v29  ;;  %vm8328_vm10 = vcmp.ne.f32.partialorder %v5601_v5, -1e+30  ;;  %vm8330_vm7 = vnez %v8329_v18  ;;  %v8336_v5 = vld [vmem:[#allocation24_spill] sm:$0xff]  ;;  %v8349_v18 = vld [vmem:[#allocation74_spill] sm:$0xff] }
 0x21e   :  { %v8327_v6 = vsel %vm8324_vm15, %v8325_v42, %v8326_v32  ;;  %v1627_v17 = vsel %vm8328_vm10, %v1243_v55, 0.0  ;;  %v1990_v13 = vsel %vm8330_vm7, 1.0, %v7897_v3  ;;  %v1175_v20 = vand.u32 2147483647, %v8296_v30 }
 0x21f   :  { %v1245_v15 = vadd.f32 %v8327_v6, %v8322_v24  ;;  %v1187_v2 = vadd.f32 1.0, %v8331_v52  ;;  %v1689_v19 = vadd.f32 %v1688_v23, %v1626_v11  ;;  %v1879_v57 = vadd.f32 %v1989_v21, %v1878_v12  ;;  %v2264_v12 = vpop.eup %2263 }
 0x220   :  { %v1114_v61 = vsel %vm6210_vm9, %v8332_v0, %v1108_v54  ;;  %v8333_v14 = vand.u32 2147483647, %v8182_v51  ;;  %v8337_v55 = vsel %vm5923_vm13, %v8203_v9, %v8202_v8  ;;  %vm8338_vm15 = vcmp.ne.f32.partialorder %v5621_v43, -1e+30  ;;  %v8340_v54 = vld [vmem:[#allocation73_spill] sm:$0xff]  ;;  %v8344_v43 = vld [vmem:[#allocation51_spill] sm:$0xff] }
 0x221   :  { %v1246_v29 = vadd.f32 %v8337_v55, %v8336_v5  ;;  %v1628_v11 = vsel %vm8338_vm15, %v1244_v58, 0.0  ;;  %vm8339_vm10 = vnez %v8066_v16  ;;  %v1117_v51 = vmul.f32 0.6931472, %v8340_v54  ;;  %v8360_v5 = vld [vmem:[#allocation27_spill] sm:$0xff] }
 0x222   :  { %vm6306_vm1 = vcmp.lt.f32.partialorder %v8333_v14, 0.0004427343  ;;  %v1991_v47 = vsel %vm8339_vm10, 1.0, %v7897_v3  ;;  %2269 = vlog2.f32 %v1178_v59  ;;  %v1690_v21 = vadd.f32 %v1689_v19, %v1627_v17  ;;  %v8347_v59 = vld [vmem:[#allocation155_spill] sm:$0xff]  ;;  %v8356_v19 = vld [vmem:[#allocation229_spill] sm:$0xff]  ;;  %v2266_v14 = vpop.eup %2265 }
 0x223   :  { %v1880_v23 = vadd.f32 %v1990_v13, %v1879_v57  ;;  %v8341_v42 = vand.u32 2147483647, %v8211_v53  ;;  %v1181_v8 = vmul.f32 -0.5, %v8321_v50  ;;  %v8345_v16 = vsel %vm6024_vm12, %v8244_v44, %v6107_v35 }
 0x224   :  { %v1247_v9 = vadd.f32 %v8345_v16, %v8344_v43  ;;  %vm8346_vm13 = vcmp.ne.f32.partialorder %v5635_v37, -1e+30  ;;  %vm8348_vm7 = vnez %v8347_v59  ;;  %v6341_v32 = vmul.f32 %v8277_v7, %v1164_v25  ;;  %v8353_v37 = vld [vmem:[#allocation26_spill] sm:$0xff]  ;;  %v8374_v59 = vld [vmem:[#allocation52_spill] sm:$0xff] }
 0x225   :  { %vm6324_vm9 = vcmp.lt.f32.partialorder %v8341_v42, 0.0004427343  ;;  %v1629_v58 = vsel %vm8346_vm13, %v1245_v15, 0.0  ;;  %v1992_v53 = vsel %vm8348_vm7, 1.0, %v7897_v3  ;;  %2271 = vlog2.f32 %v1187_v2  ;;  %v8370_v42 = vld [vmem:[#allocation88_spill] sm:$0xff] }
 0x226   :  { %v1691_v6 = vadd.f32 %v1690_v21, %v1628_v11  ;;  %v1881_v17 = vadd.f32 %v1991_v47, %v1880_v23  ;;  %v1126_v13 = vmul.f32 0.6931472, %v8349_v18  ;;  %v8350_v63 = vand.u32 2147483647, %v8254_v22 }
 0x227   :  { %v8354_v44 = vsel %vm6063_vm14, %v8253_v31, %v6135_v62  ;;  %vm8355_vm12 = vcmp.ne.f32.partialorder %v5655_v41, -1e+30  ;;  %v1993_v2 = vsel %vm5820_vm11, 1.0, %v7897_v3  ;;  %v1123_v22 = vsel %vm6250_vm5, %v8356_v19, %v1117_v51  ;;  %v8383_v19 = vld [vmem:[#allocation87_spill] sm:$0xff] }
 0x228   :  { %vm6346_vm15 = vcmp.lt.f32.partialorder %v8350_v63, 0.0004427343  ;;  %v1248_v15 = vadd.f32 %v8354_v44, %v8353_v37  ;;  %v1630_v25 = vsel %vm8355_vm12, %v1246_v29, 0.0  ;;  %v6365_v57 = vmul.f32 %v8296_v30, %v1173_v45  ;;  %v8363_v45 = vld [vmem:[#allocation19_spill] sm:$0xff] }
 0x229   :  { %v1692_v0 = vadd.f32 %v1691_v6, %v1629_v58  ;;  %v1882_v46 = vadd.f32 %v1992_v53, %v1881_v17  ;;  %v8357_v62 = vand.u32 2147483647, %v8277_v7  ;;  %v1182_v41 = vadd.f32 1.0, %v1181_v8  ;;  %v8375_v6 = vld [vmem:[#allocation80_spill] sm:$0xff] }
 0x22a   :  { %v8361_v39 = vsel %vm6139_vm2, %v8287_v60, %v6195_v40  ;;  %vm8362_vm11 = vcmp.ne.f32.partialorder %v5669_v48, -1e+30  ;;  %vm8364_vm5 = vnez %v8363_v45  ;;  %v1135_v7 = vmul.f32 0.6931472, %v6243_v1  ;;  %v8367_v48 = vld [vmem:[#allocation28_spill] sm:$0xff] }
 0x22b   :  { %vm6369_vm14 = vcmp.lt.f32.partialorder %v8357_v62, 0.0004427343  ;;  %v1249_v26 = vadd.f32 %v8361_v39, %v8360_v5  ;;  %v1631_v30 = vsel %vm8362_vm11, %v1247_v9, 0.0  ;;  %v1994_v55 = vsel %vm8364_vm5, 1.0, %v7897_v3  ;;  %v8387_v5 = vld [vmem:[#allocation53_spill] sm:$0xff]  ;;  %v8390_v45 = vld [vmem:[#allocation152_spill] sm:$0xff] }
 0x22c   :  { %v1184_v29 = vand.u32 2147483647, %v8321_v50  ;;  %v1693_v11 = vadd.f32 %v1692_v0, %v1630_v25  ;;  %v1883_v47 = vadd.f32 %v1993_v2, %v1882_v46  ;;  %v1132_v33 = vsel %vm6283_vm4, %v6121_v28, %v1126_v13  ;;  %v2268_v28 = vpop.eup %2267  ;;  %v8381_v25 = vld [vmem:[#allocation61_spill] sm:$0xff] }
 0x22d   :  { %vm6389_vm10 = vcmp.lt.f32.partialorder %v1175_v20, 0.0004427343  ;;  %v1250_v60 = vadd.f32 %v1114_v61, %v8367_v48  ;;  %vm8368_vm2 = vcmp.ne.f32.partialorder %v5689_v38, -1e+30  ;;  %vm8369_vm13 = vnez %v8091_v34  ;;  %v8373_v34 = vld [vmem:[#allocation21_spill] sm:$0xff]  ;;  %v8393_v48 = vld [vmem:[#allocation148_spill] sm:$0xff] }
 0x22e   :  { %v1632_v54 = vsel %vm8368_vm2, %v1248_v15, 0.0  ;;  %v1995_v1 = vsel %vm8369_vm13, 1.0, %v7897_v3  ;;  %v1144_v51 = vmul.f32 0.6931472, %v6246_v27  ;;  %v1190_v21 = vmul.f32 -0.5, %v8331_v52  ;;  %v8380_v15 = vld [vmem:[#allocation89_spill] sm:$0xff] }
 0x22f   :  { %v1694_v23 = vadd.f32 %v1693_v11, %v1631_v30  ;;  %v1884_v10 = vadd.f32 %v1994_v55, %v1883_v47  ;;  %v1193_v20 = vand.u32 2147483647, %v8331_v52  ;;  %v1251_v8 = vadd.f32 %v1123_v22, %v8370_v42  ;;  %v2270_v37 = vpop.eup %2269  ;;  %v8392_v47 = vld [vmem:[#allocation54_spill] sm:$0xff] }
 0x230   :  { %vm8371_vm4 = vcmp.ne.f32.partialorder %v5703_v36, -1e+30  ;;  %vm8372_vm7 = vnez %v8096_v49  ;;  %v1141_v27 = vsel %vm6306_vm1, %v8373_v34, %v1135_v7  ;;  %v1153_v43 = vmul.f32 0.6931472, %v2264_v12  ;;  %v8377_v36 = vld [vmem:[#allocation159_spill] sm:$0xff]  ;;  %v8379_v49 = vld [vmem:[#allocation120_spill] sm:$0xff] }
 0x231   :  { %v1633_v61 = vsel %vm8371_vm4, %v1249_v26, 0.0  ;;  %v1996_v38 = vsel %vm8372_vm7, 1.0, %v7897_v3  ;;  %v1695_v16 = vadd.f32 %v1694_v23, %v1632_v54  ;;  %v1885_v9 = vadd.f32 %v1995_v1, %v1884_v10  ;;  %v8388_v26 = vld [vmem:[#allocation154_spill] sm:$0xff]  ;;  %v8395_v54 = vld [vmem:[#allocation112_spill] sm:$0xff] }
 0x232   :  { %v1183_v58 = vmul.f32 %v8321_v50, %v1182_v41  ;;  %v1252_v53 = vadd.f32 %v1132_v33, %v8374_v59  ;;  %vm8376_vm12 = vcmp.ne.f32.partialorder %v8375_v6, -1e+30  ;;  %vm8378_vm11 = vnez %v8377_v36  ;;  %v2272_v62 = vpop.eup %2271  ;;  %v8403_v34 = vld [vmem:[#allocation100_spill] sm:$0xff]  ;;  %v8409_v6 = vld [vmem:[#allocation90_spill] sm:$0xff] }
 0x233   :  { %v1634_v17 = vsel %vm8376_vm12, %v1250_v60, 0.0  ;;  %v1997_v18 = vsel %vm8378_vm11, 1.0, %v7897_v3  ;;  %v1150_v13 = vsel %vm6324_vm9, %v8379_v49, %v1144_v51  ;;  %v1162_v24 = vmul.f32 0.6931472, %v2266_v14  ;;  %v8407_v59 = vld [vmem:[#allocation84_spill] sm:$0xff] }
 0x234   :  { %v1696_v63 = vadd.f32 %v1695_v16, %v1633_v61  ;;  %v1886_v12 = vadd.f32 %v1996_v38, %v1885_v9  ;;  %v1191_v44 = vadd.f32 1.0, %v1190_v21  ;;  %v1253_v50 = vadd.f32 %v1141_v27, %v8380_v15  ;;  %v8404_v27 = vld [vmem:[#allocation69_spill] sm:$0xff]  ;;  %v8406_v16 = vld [vmem:[#allocation91_spill] sm:$0xff]  ;;  %v8411_v49 = vld [vmem:[#allocation56_spill] sm:$0xff] }
 0x235   :  { %vm8382_vm1 = vcmp.ne.f32.partialorder %v8381_v25, -1e+30  ;;  %vm8384_vm5 = vnez %v8383_v19  ;;  %v1159_v0 = vsel %vm6346_vm15, %v6268_v56, %v1153_v43  ;;  %v1171_v4 = vmul.f32 0.6931472, %v2268_v28  ;;  %v8400_v28 = vld [vmem:[#allocation65_spill] sm:$0xff]  ;;  %v8416_v25 = vld [vmem:[#allocation86_spill] sm:$0xff] }
 0x236   :  { %v1635_v2 = vsel %vm8382_vm1, %v1251_v8, 0.0  ;;  %v1998_v22 = vsel %vm8384_vm5, 1.0, %v7897_v3  ;;  %v1697_v46 = vadd.f32 %v1696_v63, %v1634_v17  ;;  %v1887_v14 = vadd.f32 %v1997_v18, %v1886_v12  ;;  %v8414_v12 = vld [vmem:[#allocation22_spill] sm:$0xff]  ;;  %v8418_v19 = vld [vmem:[#allocation29_spill] sm:$0xff] }
 0x237   :  { %vm6430_vm9 = vcmp.lt.f32.partialorder %v1184_v29, 0.0004427343  ;;  %v1254_v39 = vadd.f32 %v1150_v13, %v8387_v5  ;;  %vm8389_vm2 = vcmp.ne.f32.partialorder %v8388_v26, -1e+30  ;;  %vm8391_vm13 = vnez %v8390_v45  ;;  %v8424_v26 = vld [vmem:[#allocation109_spill] sm:$0xff] }
 0x238   :  { %v1636_v30 = vsel %vm8389_vm2, %v1252_v53, 0.0  ;;  %v1999_v55 = vsel %vm8391_vm13, 1.0, %v7897_v3  ;;  %v1168_v56 = vsel %vm6369_vm14, %v6341_v32, %v1162_v24  ;;  %v1180_v35 = vmul.f32 0.6931472, %v2270_v37  ;;  %v8412_v24 = vld [vmem:[#allocation67_spill] sm:$0xff] }
 0x239   :  { %v1698_v7 = vadd.f32 %v1697_v46, %v1635_v2  ;;  %v1888_v11 = vadd.f32 %v1998_v22, %v1887_v14  ;;  %v1192_v29 = vmul.f32 %v8331_v52, %v1191_v44  ;;  %v1255_v33 = vadd.f32 %v1159_v0, %v8392_v47  ;;  %v8399_v52 = vld [vmem:[#allocation55_spill] sm:$0xff] }
 0x23a   :  { %vm8394_vm15 = vcmp.ne.f32.partialorder %v8393_v48, -1e+30  ;;  %vm8396_vm4 = vnez %v8395_v54  ;;  %v1177_v51 = vsel %vm6389_vm10, %v6365_v57, %v1171_v4  ;;  %v1189_v31 = vmul.f32 0.6931472, %v2272_v62  ;;  %v8420_v46 = vld [vmem:[#allocation151_spill] sm:$0xff]  ;;  %v8422_v62 = vld [vmem:[#allocation17_spill] sm:$0xff] }
 0x23b   :  { %v1637_v60 = vsel %vm8394_vm15, %v1253_v50, 0.0  ;;  %v2000_v1 = vsel %vm8396_vm4, 1.0, %v7897_v3  ;;  %v1699_v32 = vadd.f32 %v1698_v7, %v1636_v30  ;;  %v1889_v21 = vadd.f32 %v1999_v55, %v1888_v11 }
 0x23c   :  { %vm6453_vm14 = vcmp.lt.f32.partialorder %v1193_v20, 0.0004427343  ;;  %v1256_v10 = vadd.f32 %v1168_v56, %v8399_v52  ;;  %vm8401_vm7 = vcmp.ne.f32.partialorder %v8400_v28, -1e+30  ;;  %v2001_v61 = vsel %vm5950_vm8, 1.0, %v7897_v3 }
 0x23d   :  { %v1638_v42 = vsel %vm8401_vm7, %v1254_v39, 0.0  ;;  %v1186_v40 = vsel %vm6430_vm9, %v1183_v58, %v1180_v35  ;;  %v1700_v57 = vadd.f32 %v1699_v32, %v1637_v60  ;;  %v1890_v38 = vadd.f32 %v2000_v1, %v1889_v21 }
 0x23e   :  { %v8405_v20 = vmax.f32 %v8404_v27, 0.0  ;;  %v1257_v9 = vadd.f32 %v1177_v51, %v8406_v16  ;;  %vm8408_vm10 = vcmp.ne.f32.partialorder %v8407_v59, -1e+30  ;;  %vm8410_vm12 = vnez %v8409_v6 }
 0x23f   :  { %v1639_v53 = vsel %vm8408_vm10, %v1255_v33, 0.0  ;;  %v2002_v17 = vsel %vm8410_vm12, 1.0, %v7897_v3  ;;  %v1195_v36 = vsel %vm6453_vm14, %v1192_v29, %v1189_v31  ;;  %v1701_v18 = vadd.f32 %v1700_v57, %v1638_v42 }
 0x240   :  { %v363_v43 = vsub.f32 %v8405_v20, %v8403_v34  ;;  %v1891_v58 = vadd.f32 %v2001_v61, %v1890_v38  ;;  %v1258_v13 = vadd.f32 %v1186_v40, %v8411_v49  ;;  %vm8413_vm8 = vcmp.ne.f32.partialorder %v8412_v24, -1e+30 }
 0x241   :  { %v1640_v63 = vsel %vm8413_vm8, %v1256_v10, 0.0  ;;  %vm8415_vm11 = vnez %v8414_v12  ;;  %v1702_v44 = vadd.f32 %v1701_v18, %v1639_v53  ;;  %vm8417_vm1 = vcmp.ne.f32.partialorder %v8416_v25, -1e+30 }
 0x242   :  { %v2003_v37 = vsel %vm8415_vm11, 1.0, %v7897_v3  ;;  %v1892_v15 = vadd.f32 %v2002_v17, %v1891_v58  ;;  %v1259_v50 = vadd.f32 %v1195_v36, %v363_v43  ;;  %v1641_v2 = vsel %vm8417_vm1, %v1257_v9, 0.0 }
 0x243   :  { %vm8419_vm5 = vnez %v8418_v19  ;;  %v1703_v0 = vadd.f32 %v1702_v44, %v1640_v63  ;;  %vm8421_vm9 = vcmp.ne.f32.partialorder %v8420_v46, -1e+30  ;;  %vm8423_vm2 = vnez %v8422_v62 }
 0x244   :  { %v2004_v22 = vsel %vm8419_vm5, 1.0, %v7897_v3  ;;  %v1893_v4 = vadd.f32 %v2003_v37, %v1892_v15  ;;  %v1642_v14 = vsel %vm8421_vm9, %v1258_v13, 0.0  ;;  %v2005_v41 = vsel %vm8423_vm2, 1.0, %v7897_v3 }
 0x245   :  { %v1704_v5 = vadd.f32 %v1703_v0, %v1641_v2  ;;  %vm8425_vm13 = vcmp.ne.f32.partialorder %v8424_v26, -1e+30  ;;  %v2006_v55 = vsel %vm6018_vm3, 1.0, %v7897_v3  ;;  %v2007_v11 = vsel %vm6046_vm0, 1.0, %v7897_v3 }
 0x246   :  { %v1894_v39 = vadd.f32 %v2004_v22, %v1893_v4  ;;  %v1643_v30 = vsel %vm8425_vm13, %v1259_v50, 0.0  ;;  %v2008_v48 = vsel %vm6057_vm6, 1.0, %v7897_v3 }
 0x247   :  { %v1705_v56 = vadd.f32 %v1704_v5, %v1642_v14 }
 0x248   :  { %v1895_v35 = vadd.f32 %v2005_v41, %v1894_v39 }
 0x249   :  { %v1706_v29 = vadd.f32 %v1705_v56, %v1643_v30 }
 0x24a   :  { %v1896_v47 = vadd.f32 %v2006_v55, %v1895_v35 }
 0x24b   :  { %1707 = vst [vmem:[#allocation8] sm:$0xff] %v1706_v29 }
 0x24c   :  { %v1897_v60 = vadd.f32 %v2007_v11, %v1896_v47 }
 0x24d   :  { %2472 = shalt.err (!%p2469_p5)
}
 0x24e   :  { %1921 = dma.vmem_to_hbm [thread:$0]  %s1919_s30, 128, %s6512_s3, [#allocation9]   ;;  %v1898_v54 = vadd.f32 %v2008_v48, %v1897_v60 }
 0x24f   :  { %s2481_s10 = scalar_lea.vmem %s1929_s6, 128  ;;  %p2486_p7 = scmp.lt.s32.totalorder %s1929_s6, %s1929_s6 }
 0x250   :  { %1899 = vst [vmem:[#allocation10] sm:$0xff] %v1898_v54  ;;  %p2482_p6 = scmp.ne.s32.totalorder %s1929_s6, %s2481_s10  ;;  %p2487_p8 = scmp.lt.s32.totalorder %s2481_s10, %s2481_s10 }
 0x252   :  { %p2488_p9 = por %p2487_p8, %p2486_p7 }
 0x254   :  { %p2489_p10 = pnand %p2488_p9, %p2482_p6 }
 0x256   :  { %2492 = shalt.err (!%p2489_p10)
}
 0x257   :  { %1931 = dma.vmem_to_hbm [thread:$0]  %s1929_s6, 128, %s6513_s4, [#allocation9]  }
 0x258   :  { %2505 = dma.done.wait [#allocation4], 8192  }
 0x259   :  { %2506 = vsyncadd [#allocation4], 4294959104 }
 0x25a   :  { %2507 = dma.done.wait [#allocation9], 256  }
 0x25b   :  { %2508 = vsyncadd [#allocation9], 4294967040 }
 0x25c   :  { %1941 = vsyncpa [#allocation3], 1 }
 0x25d   :  { %1942 = vsyncpa [#allocation6], 1 }
 0x25e   :  { %1943 = vsyncpa [#allocation4], 1 }
 0x25f   :  { %1944 = vsyncpa [#allocation9], 1 }

</bundles_post_ra>
